<compile_context>
chip_gen: v5e
topology: v5e:2x2
jax: 0.10.0
libtpu: 0.0.40
codegen_flags: <defaults>
</compile_context>

<pallas_src>
import functools

import jax
import jax.numpy as jnp
from jax import lax
from jax.experimental import pallas as pl
from jax.experimental.pallas import tpu as pltpu


def _fused_downsample_kernel(p_ref, w_ref, g_ref, b_ref, o_ref, s_ref, ss_ref, *,
                             tm, sub, chunk, rows_total, m_total, c_out, pack,
                             eps, negative_slope, activation, batchnorm):
    i = pl.program_id(0)
    nm = pl.num_programs(0)
    cp = pack * c_out

    if batchnorm:
        @pl.when(i == 0)
        def _():
            s_ref[...] = jnp.zeros_like(s_ref)
            ss_ref[...] = jnp.zeros_like(ss_ref)

    # ---- conv-as-matmul for this row tile (lane-dense packed layout) -------
    # Sub-tiled so the f32 result stays a handful of vregs; stored straight into
    # the VMEM-resident output block.  One-pass BN stats taken while y is live.
    if batchnorm:
        acc_s = jnp.zeros((1, cp), jnp.float32)
        acc_ss = jnp.zeros((1, cp), jnp.float32)
    for t in range(tm // sub):
        y = jnp.dot(p_ref[pl.ds(t * sub, sub), :], w_ref[...],
                    preferred_element_type=jnp.float32)
        start = pl.multiple_of(i * tm + t * sub, sub)
        o_ref[pl.ds(start, sub), :] = y
        if batchnorm:
            acc_s = acc_s + jnp.sum(y, axis=0, keepdims=True)
            acc_ss = acc_ss + jnp.sum(y * y, axis=0, keepdims=True)
    if batchnorm:
        s_ref[...] += acc_s
        ss_ref[...] += acc_ss

    # ---- final step: BN affine + LeakyReLU over the resident output --------
    @pl.when(i == nm - 1)
    def _():
        if batchnorm:
            s = s_ref[...]
            ss = ss_ref[...]
            # fold the lane-pack groups: every lane ends up holding its channel's
            # total (pack is a power of two, every shift is a multiple of c_out)
            half = cp // 2
            while half >= c_out:
                s = s + pltpu.roll(s, shift=half, axis=1)
                ss = ss + pltpu.roll(ss, shift=half, axis=1)
                half //= 2
            inv_m = 1.0 / m_total
            mean = s * inv_m
            var = jnp.maximum(ss * inv_m - mean * mean, 0.0)
            scale = g_ref[...] * lax.rsqrt(var + eps)
            shift = b_ref[...] - mean * scale       # conv bias cancels under BN
        else:
            scale = g_ref[...]                      # ones
            shift = b_ref[...]                      # conv bias

        n_chunks = rows_total // chunk

        def apply(start):
            idx = pl.ds(start, chunk)
            v = o_ref[idx, :] * scale + shift
            if activation:
                v = jnp.where(v > 0, v, negative_slope * v)
            o_ref[idx, :] = v

        if n_chunks <= 32:
            # static unroll: the epilogue is pure vld/VALU/vst with no DMA to hide
            for t in range(n_chunks):
                apply(t * chunk)
        else:
            @pl.loop(0, n_chunks)
            def _(t):
                apply(pl.multiple_of(t * chunk, chunk))


def downsample_conv(x, weight, bias, gamma, beta, *, stride=2, padding=1,
                    activation=True, batchnorm=True, eps=1e-5):
    N, C_in, H, W = x.shape
    C_out, _, KH, KW = weight.shape
    Ho = (H + 2 * padding - KH) // stride + 1
    Wo = (W + 2 * padding - KW) // stride + 1
    M = N * Ho * Wo
    Kdim = C_in * KH * KW

    # lane-dense packing: pack `pack` spatial rows per output row when C_out < 128
    pack = 1
    if C_out < 128 and 128 % C_out == 0:
        pack = 128 // C_out
        while pack > 1 and M % pack != 0:
            pack //= 2
    rows = M // pack
    Kp = Kdim * pack
    Cp = C_out * pack

    # ---- Kdim-aware VMEM budget (safe for v5e/v6e/v7x scoped VMEM) ---------
    VMEM_BUDGET = 24 * 1024 * 1024
    fixed = rows * Cp * 4 + 2 * Kp * Cp * 2 + 8 * Cp * 4   # output + dbl-buf weight + params/scratch
    assert fixed < VMEM_BUDGET, "activation/weight too large for fused single-K path"
    # TODO(synk): K-tiled / in-kernel-im2col fallback for deep encoder layers.

    tm = None
    for t in (1024, 512, 256, 128, 64, 32, 16, 8):
        if rows % t:
            continue
        if fixed + 2 * t * Kp * 2 <= VMEM_BUDGET:   # + double-buffered bf16 patch tile
            tm = t
            break
    assert tm is not None, "N*Ho*Wo/pack must be a multiple of 8 and fit in VMEM"
    sub = tm if tm <= 128 else 128                  # bounds live vregs of the dot result
    chunk = 128 if rows % 128 == 0 else tm          # epilogue chunk
    nm = rows // tm

    # ---- channels-last im2col (bf16 BEFORE the 16x expansion) --------------
    xt = jnp.transpose(x, (0, 2, 3, 1)).astype(jnp.bfloat16)          # NHWC
    xp = jnp.pad(xt, ((0, 0), (padding, padding), (padding, padding), (0, 0)))
    cols = []
    for kh in range(KH):
        for kw in range(KW):
            cols.append(xp[:, kh:kh + stride * Ho:stride,
                           kw:kw + stride * Wo:stride, :])             # (N,Ho,Wo,C_in)
    patches = jnp.concatenate(cols, axis=-1).reshape(M, Kdim)          # (M, Kdim)
    patches = patches.reshape(rows, Kp)                                # lane-dense pack (free)

    # weight flattened in the same (kh, kw, c_in) order; block-diagonal when packing
    w2 = jnp.transpose(weight, (2, 3, 1, 0)).reshape(Kdim, C_out).astype(jnp.bfloat16)
    if pack > 1:
        wbd = jnp.zeros((Kp, Cp), jnp.bfloat16)
        for p in range(pack):
            wbd = wbd.at[p * Kdim:(p + 1) * Kdim, p * C_out:(p + 1) * C_out].set(w2)
    else:
        wbd = w2

    if batchnorm:
        g2 = jnp.tile(gamma.reshape(1, C_out).astype(jnp.float32), (1, pack))
        b2 = jnp.tile(beta.reshape(1, C_out).astype(jnp.float32), (1, pack))
    else:
        g2 = jnp.ones((1, Cp), jnp.float32)
        b2 = jnp.tile(bias.reshape(1, C_out).astype(jnp.float32), (1, pack))

    kernel = functools.partial(
        _fused_downsample_kernel, tm=tm, sub=sub, chunk=chunk, rows_total=rows,
        m_total=M, c_out=C_out, pack=pack, eps=eps, negative_slope=0.2,
        activation=activation, batchnorm=batchnorm)

    cost = pl.CostEstimate(
        flops=2 * rows * Kp * Cp + 10 * rows * Cp,
        transcendentals=Cp,
        bytes_accessed=rows * Kp * 2 + Kp * Cp * 2 + rows * Cp * 4 + 4 * Cp * 4)

    out2d = pl.pallas_call(
        kernel,
        out_shape=jax.ShapeDtypeStruct((rows, Cp), jnp.float32),
        grid_spec=pltpu.PrefetchScalarGridSpec(
            num_scalar_prefetch=0,
            grid=(nm,),
            in_specs=[pl.BlockSpec((tm, Kp), lambda i: (i, 0)),
                      pl.BlockSpec((Kp, Cp), lambda i: (0, 0)),
                      pl.BlockSpec((1, Cp), lambda i: (0, 0)),
                      pl.BlockSpec((1, Cp), lambda i: (0, 0))],
            out_specs=pl.BlockSpec((rows, Cp), lambda i: (0, 0)),
            scratch_shapes=[pltpu.VMEM((1, Cp), jnp.float32),
                            pltpu.VMEM((1, Cp), jnp.float32)]),
        compiler_params=pltpu.CompilerParams(
            dimension_semantics=("arbitrary",),        # TODO(synk): core-parallel split on v7x
            vmem_limit_bytes=32 * 1024 * 1024),
        cost_estimate=cost,
    )(patches, wbd, g2, b2)

    # unpack lanes -> (M, C_out); rows are (N, Ho, Wo) ordered; external contract is NCHW.
    # TODO(synk): when chaining encoder layers, stay NHWC and drop this transpose.
    return out2d.reshape(M, C_out).reshape(N, Ho, Wo, C_out).transpose(0, 3, 1, 2)


def _reference(x, weight, bias, gamma, beta, *, activation=True,
               batchnorm=True, eps=1e-5):
    y = lax.conv_general_dilated(
        x, weight, window_strides=(2, 2), padding=((1, 1), (1, 1)),
        dimension_numbers=("NCHW", "OIHW", "NCHW"))
    y = y + bias.reshape(1, -1, 1, 1)
    if batchnorm:
        mean = y.mean(axis=(0, 2, 3), keepdims=True)
        var = y.var(axis=(0, 2, 3), keepdims=True)
        y = (y - mean) / jnp.sqrt(var + eps)
        y = y * gamma.reshape(1, -1, 1, 1) + beta.reshape(1, -1, 1, 1)
    if activation:
        y = jnp.where(y > 0, y, 0.2 * y)
    return y


if __name__ == "__main__":
    key = jax.random.PRNGKey(0)
    kx, kw, kb = jax.random.split(key, 3)

    # matches the spec: x = torch.randn(2, 1, 16, 256); first encoder layer C64
    N, C_in, H, W = 2, 1, 16, 256
    C_out, K = 64, 4

    x = jax.random.normal(kx, (N, C_in, H, W), dtype=jnp.float32)
    weight = 0.1 * jax.random.normal(kw, (C_out, C_in, K, K), dtype=jnp.float32)
    bias = 0.1 * jax.random.normal(kb, (C_out,), dtype=jnp.float32)
    gamma = jnp.ones((C_out,), jnp.float32)     # nn.BatchNorm2d default init
    beta = jnp.zeros((C_out,), jnp.float32)

    fn = jax.jit(functools.partial(downsample_conv,
                                   activation=True, batchnorm=True))
    out = jax.block_until_ready(fn(x, weight, bias, gamma, beta))

    ref = _reference(x, weight, bias, gamma, beta)
    err = float(jnp.max(jnp.abs(out - ref)))
    assert out.shape == (N, C_out, H // 2, W // 2), out.shape
    # bf16 MXU inputs (f32 accumulation) vs. a pure-f32 XLA reference
    assert err < 5e-2, f"max abs error {err}"

    print("KERNEL_OK")
</pallas_src>

<mosaic_0001>
module attributes {stable_mosaic.version = 11 : i64} {
  func.func @_fused_downsample_kernel(%arg0: i32, %arg1: memref<1024x32xbf16, #tpu.memory_space<vmem>>, %arg2: memref<32x128xbf16, #tpu.memory_space<vmem>>, %arg3: memref<1x128xf32, #tpu.memory_space<vmem>>, %arg4: memref<1x128xf32, #tpu.memory_space<vmem>>, %arg5: memref<1024x128xf32, #tpu.memory_space<vmem>>, %arg6: memref<1x128xf32, #tpu.memory_space<vmem>>, %arg7: memref<1x128xf32, #tpu.memory_space<vmem>>) attributes {dimension_semantics = [#tpu.dimension_semantics<arbitrary>], iteration_bounds = array<i64: 1>, scalar_prefetch = 0 : i64, scratch_operands = 2 : i64, tpu.core_type = #tpu.core_type<tc>, window_params = [{transform_indices = @transform_0, window_bounds = array<i64: 1024, 32>}, {pipeline_mode = #tpu.pipeline_mode<synchronous>, transform_indices = @transform_1, window_bounds = array<i64: 32, 128>}, {pipeline_mode = #tpu.pipeline_mode<synchronous>, transform_indices = @transform_2, window_bounds = array<i64: 1, 128>}, {pipeline_mode = #tpu.pipeline_mode<synchronous>, transform_indices = @transform_3, window_bounds = array<i64: 1, 128>}, {pipeline_mode = #tpu.pipeline_mode<synchronous>, transform_indices = @transform_4, window_bounds = array<i64: 1024, 128>}]} {
    %c0_i32 = arith.constant 0 : i32
    %0 = arith.cmpi eq, %arg0, %c0_i32 : i32
    %1 = arith.extui %0 : i1 to i32
    %c0_i32_0 = arith.constant 0 : i32
    %2 = arith.cmpi ne, %1, %c0_i32_0 : i32
    scf.if %2 {
      %cst_76 = arith.constant 0.000000e+00 : f32
      %134 = vector.broadcast %cst_76 : f32 to vector<1x128xf32>
      %c0_77 = arith.constant 0 : index
      %c0_78 = arith.constant 0 : index
      %135 = vector.load %arg6[%c0_77, %c0_78] : memref<1x128xf32, #tpu.memory_space<vmem>>, vector<1x128xf32>
      tpu.vector_store %arg6[%c0_77, %c0_78], %134 {strides = array<i32>} : memref<1x128xf32, #tpu.memory_space<vmem>>, vector<1x128xf32>,
      %cst_79 = arith.constant 0.000000e+00 : f32
      %136 = vector.broadcast %cst_79 : f32 to vector<1x128xf32>
      %c0_80 = arith.constant 0 : index
      %c0_81 = arith.constant 0 : index
      %137 = vector.load %arg7[%c0_80, %c0_81] : memref<1x128xf32, #tpu.memory_space<vmem>>, vector<1x128xf32>
      tpu.vector_store %arg7[%c0_80, %c0_81], %136 {strides = array<i32>} : memref<1x128xf32, #tpu.memory_space<vmem>>, vector<1x128xf32>,
    } else {
    }
    %cst = arith.constant 0.000000e+00 : f32
    %3 = vector.broadcast %cst : f32 to vector<1x128xf32>
    %cst_1 = arith.constant 0.000000e+00 : f32
    %4 = vector.broadcast %cst_1 : f32 to vector<1x128xf32>
    %c0 = arith.constant 0 : index
    %c0_2 = arith.constant 0 : index
    %5 = vector.load %arg1[%c0, %c0_2] : memref<1024x32xbf16, #tpu.memory_space<vmem>>, vector<128x32xbf16>
    %c0_3 = arith.constant 0 : index
    %c0_4 = arith.constant 0 : index
    %6 = vector.load %arg2[%c0_3, %c0_4] : memref<32x128xbf16, #tpu.memory_space<vmem>>, vector<32x128xbf16>
    %cst_5 = arith.constant dense<0.000000e+00> : vector<128x128xf32>
    %7 = tpu.matmul %5, %6, %cst_5 {dimension_numbers = #tpu.dot_dimension_numbers<[1], [0], [0], [1], [0, 0, 1, 1], [], []>} : vector<128x32xbf16>, vector<32x128xbf16>, vector<128x128xf32> -> vector<128x128xf32>
    %c1024_i32 = arith.constant 1024 : i32
    %8 = arith.muli %arg0, %c1024_i32 : i32
    %c0_i32_6 = arith.constant 0 : i32
    %9 = arith.addi %8, %c0_i32_6 : i32
    %10 = tpu.assume_multiple %9, 128 : i32
    %11 = arith.index_cast %10 : i32 to index
    %c0_7 = arith.constant 0 : index
    %12 = vector.load %arg5[%11, %c0_7] : memref<1024x128xf32, #tpu.memory_space<vmem>>, vector<128x128xf32>
    tpu.vector_store %arg5[%11, %c0_7], %7 {strides = array<i32>} : memref<1024x128xf32, #tpu.memory_space<vmem>>, vector<128x128xf32>,
    %cst_8 = arith.constant dense<0.000000e+00> : vector<128xf32>
    %13 = vector.multi_reduction <add>, %7, %cst_8 [0] : vector<128x128xf32> to vector<128xf32>
    %14 = vector.shape_cast %13 : vector<128xf32> to vector<1x128xf32>
    %15 = arith.addf %3, %14 : vector<1x128xf32>
    %16 = arith.mulf %7, %7 : vector<128x128xf32>
    %cst_9 = arith.constant dense<0.000000e+00> : vector<128xf32>
    %17 = vector.multi_reduction <add>, %16, %cst_9 [0] : vector<128x128xf32> to vector<128xf32>
    %18 = vector.shape_cast %17 : vector<128xf32> to vector<1x128xf32>
    %19 = arith.addf %4, %18 : vector<1x128xf32>
    %c128 = arith.constant 128 : index
    %c0_10 = arith.constant 0 : index
    %20 = vector.load %arg1[%c128, %c0_10] : memref<1024x32xbf16, #tpu.memory_space<vmem>>, vector<128x32xbf16>
    %c0_11 = arith.constant 0 : index
    %c0_12 = arith.constant 0 : index
    %21 = vector.load %arg2[%c0_11, %c0_12] : memref<32x128xbf16, #tpu.memory_space<vmem>>, vector<32x128xbf16>
    %cst_13 = arith.constant dense<0.000000e+00> : vector<128x128xf32>
    %22 = tpu.matmul %20, %21, %cst_13 {dimension_numbers = #tpu.dot_dimension_numbers<[1], [0], [0], [1], [0, 0, 1, 1], [], []>} : vector<128x32xbf16>, vector<32x128xbf16>, vector<128x128xf32> -> vector<128x128xf32>
    %c1024_i32_14 = arith.constant 1024 : i32
    %23 = arith.muli %arg0, %c1024_i32_14 : i32
    %c128_i32 = arith.constant 128 : i32
    %24 = arith.addi %23, %c128_i32 : i32
    %25 = tpu.assume_multiple %24, 128 : i32
    %26 = arith.index_cast %25 : i32 to index
    %c0_15 = arith.constant 0 : index
    %27 = vector.load %arg5[%26, %c0_15] : memref<1024x128xf32, #tpu.memory_space<vmem>>, vector<128x128xf32>
    tpu.vector_store %arg5[%26, %c0_15], %22 {strides = array<i32>} : memref<1024x128xf32, #tpu.memory_space<vmem>>, vector<128x128xf32>,
    %cst_16 = arith.constant dense<0.000000e+00> : vector<128xf32>
    %28 = vector.multi_reduction <add>, %22, %cst_16 [0] : vector<128x128xf32> to vector<128xf32>
    %29 = vector.shape_cast %28 : vector<128xf32> to vector<1x128xf32>
    %30 = arith.addf %15, %29 : vector<1x128xf32>
    %31 = arith.mulf %22, %22 : vector<128x128xf32>
    %cst_17 = arith.constant dense<0.000000e+00> : vector<128xf32>
    %32 = vector.multi_reduction <add>, %31, %cst_17 [0] : vector<128x128xf32> to vector<128xf32>
    %33 = vector.shape_cast %32 : vector<128xf32> to vector<1x128xf32>
    %34 = arith.addf %19, %33 : vector<1x128xf32>
    %c256 = arith.constant 256 : index
    %c0_18 = arith.constant 0 : index
    %35 = vector.load %arg1[%c256, %c0_18] : memref<1024x32xbf16, #tpu.memory_space<vmem>>, vector<128x32xbf16>
    %c0_19 = arith.constant 0 : index
    %c0_20 = arith.constant 0 : index
    %36 = vector.load %arg2[%c0_19, %c0_20] : memref<32x128xbf16, #tpu.memory_space<vmem>>, vector<32x128xbf16>
    %cst_21 = arith.constant dense<0.000000e+00> : vector<128x128xf32>
    %37 = tpu.matmul %35, %36, %cst_21 {dimension_numbers = #tpu.dot_dimension_numbers<[1], [0], [0], [1], [0, 0, 1, 1], [], []>} : vector<128x32xbf16>, vector<32x128xbf16>, vector<128x128xf32> -> vector<128x128xf32>
    %c1024_i32_22 = arith.constant 1024 : i32
    %38 = arith.muli %arg0, %c1024_i32_22 : i32
    %c256_i32 = arith.constant 256 : i32
    %39 = arith.addi %38, %c256_i32 : i32
    %40 = tpu.assume_multiple %39, 128 : i32
    %41 = arith.index_cast %40 : i32 to index
    %c0_23 = arith.constant 0 : index
    %42 = vector.load %arg5[%41, %c0_23] : memref<1024x128xf32, #tpu.memory_space<vmem>>, vector<128x128xf32>
    tpu.vector_store %arg5[%41, %c0_23], %37 {strides = array<i32>} : memref<1024x128xf32, #tpu.memory_space<vmem>>, vector<128x128xf32>,
    %cst_24 = arith.constant dense<0.000000e+00> : vector<128xf32>
    %43 = vector.multi_reduction <add>, %37, %cst_24 [0] : vector<128x128xf32> to vector<128xf32>
    %44 = vector.shape_cast %43 : vector<128xf32> to vector<1x128xf32>
    %45 = arith.addf %30, %44 : vector<1x128xf32>
    %46 = arith.mulf %37, %37 : vector<128x128xf32>
    %cst_25 = arith.constant dense<0.000000e+00> : vector<128xf32>
    %47 = vector.multi_reduction <add>, %46, %cst_25 [0] : vector<128x128xf32> to vector<128xf32>
    %48 = vector.shape_cast %47 : vector<128xf32> to vector<1x128xf32>
    %49 = arith.addf %34, %48 : vector<1x128xf32>
    %c384 = arith.constant 384 : index
    %c0_26 = arith.constant 0 : index
    %50 = vector.load %arg1[%c384, %c0_26] : memref<1024x32xbf16, #tpu.memory_space<vmem>>, vector<128x32xbf16>
    %c0_27 = arith.constant 0 : index
    %c0_28 = arith.constant 0 : index
    %51 = vector.load %arg2[%c0_27, %c0_28] : memref<32x128xbf16, #tpu.memory_space<vmem>>, vector<32x128xbf16>
    %cst_29 = arith.constant dense<0.000000e+00> : vector<128x128xf32>
    %52 = tpu.matmul %50, %51, %cst_29 {dimension_numbers = #tpu.dot_dimension_numbers<[1], [0], [0], [1], [0, 0, 1, 1], [], []>} : vector<128x32xbf16>, vector<32x128xbf16>, vector<128x128xf32> -> vector<128x128xf32>
    %c1024_i32_30 = arith.constant 1024 : i32
    %53 = arith.muli %arg0, %c1024_i32_30 : i32
    %c384_i32 = arith.constant 384 : i32
    %54 = arith.addi %53, %c384_i32 : i32
    %55 = tpu.assume_multiple %54, 128 : i32
    %56 = arith.index_cast %55 : i32 to index
    %c0_31 = arith.constant 0 : index
    %57 = vector.load %arg5[%56, %c0_31] : memref<1024x128xf32, #tpu.memory_space<vmem>>, vector<128x128xf32>
    tpu.vector_store %arg5[%56, %c0_31], %52 {strides = array<i32>} : memref<1024x128xf32, #tpu.memory_space<vmem>>, vector<128x128xf32>,
    %cst_32 = arith.constant dense<0.000000e+00> : vector<128xf32>
    %58 = vector.multi_reduction <add>, %52, %cst_32 [0] : vector<128x128xf32> to vector<128xf32>
    %59 = vector.shape_cast %58 : vector<128xf32> to vector<1x128xf32>
    %60 = arith.addf %45, %59 : vector<1x128xf32>
    %61 = arith.mulf %52, %52 : vector<128x128xf32>
    %cst_33 = arith.constant dense<0.000000e+00> : vector<128xf32>
    %62 = vector.multi_reduction <add>, %61, %cst_33 [0] : vector<128x128xf32> to vector<128xf32>
    %63 = vector.shape_cast %62 : vector<128xf32> to vector<1x128xf32>
    %64 = arith.addf %49, %63 : vector<1x128xf32>
    %c512 = arith.constant 512 : index
    %c0_34 = arith.constant 0 : index
    %65 = vector.load %arg1[%c512, %c0_34] : memref<1024x32xbf16, #tpu.memory_space<vmem>>, vector<128x32xbf16>
    %c0_35 = arith.constant 0 : index
    %c0_36 = arith.constant 0 : index
    %66 = vector.load %arg2[%c0_35, %c0_36] : memref<32x128xbf16, #tpu.memory_space<vmem>>, vector<32x128xbf16>
    %cst_37 = arith.constant dense<0.000000e+00> : vector<128x128xf32>
    %67 = tpu.matmul %65, %66, %cst_37 {dimension_numbers = #tpu.dot_dimension_numbers<[1], [0], [0], [1], [0, 0, 1, 1], [], []>} : vector<128x32xbf16>, vector<32x128xbf16>, vector<128x128xf32> -> vector<128x128xf32>
    %c1024_i32_38 = arith.constant 1024 : i32
    %68 = arith.muli %arg0, %c1024_i32_38 : i32
    %c512_i32 = arith.constant 512 : i32
    %69 = arith.addi %68, %c512_i32 : i32
    %70 = tpu.assume_multiple %69, 128 : i32
    %71 = arith.index_cast %70 : i32 to index
    %c0_39 = arith.constant 0 : index
    %72 = vector.load %arg5[%71, %c0_39] : memref<1024x128xf32, #tpu.memory_space<vmem>>, vector<128x128xf32>
    tpu.vector_store %arg5[%71, %c0_39], %67 {strides = array<i32>} : memref<1024x128xf32, #tpu.memory_space<vmem>>, vector<128x128xf32>,
    %cst_40 = arith.constant dense<0.000000e+00> : vector<128xf32>
    %73 = vector.multi_reduction <add>, %67, %cst_40 [0] : vector<128x128xf32> to vector<128xf32>
    %74 = vector.shape_cast %73 : vector<128xf32> to vector<1x128xf32>
    %75 = arith.addf %60, %74 : vector<1x128xf32>
    %76 = arith.mulf %67, %67 : vector<128x128xf32>
    %cst_41 = arith.constant dense<0.000000e+00> : vector<128xf32>
    %77 = vector.multi_reduction <add>, %76, %cst_41 [0] : vector<128x128xf32> to vector<128xf32>
    %78 = vector.shape_cast %77 : vector<128xf32> to vector<1x128xf32>
    %79 = arith.addf %64, %78 : vector<1x128xf32>
    %c640 = arith.constant 640 : index
    %c0_42 = arith.constant 0 : index
    %80 = vector.load %arg1[%c640, %c0_42] : memref<1024x32xbf16, #tpu.memory_space<vmem>>, vector<128x32xbf16>
    %c0_43 = arith.constant 0 : index
    %c0_44 = arith.constant 0 : index
    %81 = vector.load %arg2[%c0_43, %c0_44] : memref<32x128xbf16, #tpu.memory_space<vmem>>, vector<32x128xbf16>
    %cst_45 = arith.constant dense<0.000000e+00> : vector<128x128xf32>
    %82 = tpu.matmul %80, %81, %cst_45 {dimension_numbers = #tpu.dot_dimension_numbers<[1], [0], [0], [1], [0, 0, 1, 1], [], []>} : vector<128x32xbf16>, vector<32x128xbf16>, vector<128x128xf32> -> vector<128x128xf32>
    %c1024_i32_46 = arith.constant 1024 : i32
    %83 = arith.muli %arg0, %c1024_i32_46 : i32
    %c640_i32 = arith.constant 640 : i32
    %84 = arith.addi %83, %c640_i32 : i32
    %85 = tpu.assume_multiple %84, 128 : i32
    %86 = arith.index_cast %85 : i32 to index
    %c0_47 = arith.constant 0 : index
    %87 = vector.load %arg5[%86, %c0_47] : memref<1024x128xf32, #tpu.memory_space<vmem>>, vector<128x128xf32>
    tpu.vector_store %arg5[%86, %c0_47], %82 {strides = array<i32>} : memref<1024x128xf32, #tpu.memory_space<vmem>>, vector<128x128xf32>,
    %cst_48 = arith.constant dense<0.000000e+00> : vector<128xf32>
    %88 = vector.multi_reduction <add>, %82, %cst_48 [0] : vector<128x128xf32> to vector<128xf32>
    %89 = vector.shape_cast %88 : vector<128xf32> to vector<1x128xf32>
    %90 = arith.addf %75, %89 : vector<1x128xf32>
    %91 = arith.mulf %82, %82 : vector<128x128xf32>
    %cst_49 = arith.constant dense<0.000000e+00> : vector<128xf32>
    %92 = vector.multi_reduction <add>, %91, %cst_49 [0] : vector<128x128xf32> to vector<128xf32>
    %93 = vector.shape_cast %92 : vector<128xf32> to vector<1x128xf32>
    %94 = arith.addf %79, %93 : vector<1x128xf32>
    %c768 = arith.constant 768 : index
    %c0_50 = arith.constant 0 : index
    %95 = vector.load %arg1[%c768, %c0_50] : memref<1024x32xbf16, #tpu.memory_space<vmem>>, vector<128x32xbf16>
    %c0_51 = arith.constant 0 : index
    %c0_52 = arith.constant 0 : index
    %96 = vector.load %arg2[%c0_51, %c0_52] : memref<32x128xbf16, #tpu.memory_space<vmem>>, vector<32x128xbf16>
    %cst_53 = arith.constant dense<0.000000e+00> : vector<128x128xf32>
    %97 = tpu.matmul %95, %96, %cst_53 {dimension_numbers = #tpu.dot_dimension_numbers<[1], [0], [0], [1], [0, 0, 1, 1], [], []>} : vector<128x32xbf16>, vector<32x128xbf16>, vector<128x128xf32> -> vector<128x128xf32>
    %c1024_i32_54 = arith.constant 1024 : i32
    %98 = arith.muli %arg0, %c1024_i32_54 : i32
    %c768_i32 = arith.constant 768 : i32
    %99 = arith.addi %98, %c768_i32 : i32
    %100 = tpu.assume_multiple %99, 128 : i32
    %101 = arith.index_cast %100 : i32 to index
    %c0_55 = arith.constant 0 : index
    %102 = vector.load %arg5[%101, %c0_55] : memref<1024x128xf32, #tpu.memory_space<vmem>>, vector<128x128xf32>
    tpu.vector_store %arg5[%101, %c0_55], %97 {strides = array<i32>} : memref<1024x128xf32, #tpu.memory_space<vmem>>, vector<128x128xf32>,
    %cst_56 = arith.constant dense<0.000000e+00> : vector<128xf32>
    %103 = vector.multi_reduction <add>, %97, %cst_56 [0] : vector<128x128xf32> to vector<128xf32>
    %104 = vector.shape_cast %103 : vector<128xf32> to vector<1x128xf32>
    %105 = arith.addf %90, %104 : vector<1x128xf32>
    %106 = arith.mulf %97, %97 : vector<128x128xf32>
    %cst_57 = arith.constant dense<0.000000e+00> : vector<128xf32>
    %107 = vector.multi_reduction <add>, %106, %cst_57 [0] : vector<128x128xf32> to vector<128xf32>
    %108 = vector.shape_cast %107 : vector<128xf32> to vector<1x128xf32>
    %109 = arith.addf %94, %108 : vector<1x128xf32>
    %c896 = arith.constant 896 : index
    %c0_58 = arith.constant 0 : index
    %110 = vector.load %arg1[%c896, %c0_58] : memref<1024x32xbf16, #tpu.memory_space<vmem>>, vector<128x32xbf16>
    %c0_59 = arith.constant 0 : index
    %c0_60 = arith.constant 0 : index
    %111 = vector.load %arg2[%c0_59, %c0_60] : memref<32x128xbf16, #tpu.memory_space<vmem>>, vector<32x128xbf16>
    %cst_61 = arith.constant dense<0.000000e+00> : vector<128x128xf32>
    %112 = tpu.matmul %110, %111, %cst_61 {dimension_numbers = #tpu.dot_dimension_numbers<[1], [0], [0], [1], [0, 0, 1, 1], [], []>} : vector<128x32xbf16>, vector<32x128xbf16>, vector<128x128xf32> -> vector<128x128xf32>
    %c1024_i32_62 = arith.constant 1024 : i32
    %113 = arith.muli %arg0, %c1024_i32_62 : i32
    %c896_i32 = arith.constant 896 : i32
    %114 = arith.addi %113, %c896_i32 : i32
    %115 = tpu.assume_multiple %114, 128 : i32
    %116 = arith.index_cast %115 : i32 to index
    %c0_63 = arith.constant 0 : index
    %117 = vector.load %arg5[%116, %c0_63] : memref<1024x128xf32, #tpu.memory_space<vmem>>, vector<128x128xf32>
    tpu.vector_store %arg5[%116, %c0_63], %112 {strides = array<i32>} : memref<1024x128xf32, #tpu.memory_space<vmem>>, vector<128x128xf32>,
    %cst_64 = arith.constant dense<0.000000e+00> : vector<128xf32>
    %118 = vector.multi_reduction <add>, %112, %cst_64 [0] : vector<128x128xf32> to vector<128xf32>
    %119 = vector.shape_cast %118 : vector<128xf32> to vector<1x128xf32>
    %120 = arith.addf %105, %119 : vector<1x128xf32>
    %121 = arith.mulf %112, %112 : vector<128x128xf32>
    %cst_65 = arith.constant dense<0.000000e+00> : vector<128xf32>
    %122 = vector.multi_reduction <add>, %121, %cst_65 [0] : vector<128x128xf32> to vector<128xf32>
    %123 = vector.shape_cast %122 : vector<128xf32> to vector<1x128xf32>
    %124 = arith.addf %109, %123 : vector<1x128xf32>
    %c0_66 = arith.constant 0 : index
    %c0_67 = arith.constant 0 : index
    %125 = vector.load %arg6[%c0_66, %c0_67] : memref<1x128xf32, #tpu.memory_space<vmem>>, vector<1x128xf32>
    %126 = arith.addf %125, %120 : vector<1x128xf32>
    %c0_68 = arith.constant 0 : index
    %c0_69 = arith.constant 0 : index
    %127 = vector.load %arg6[%c0_68, %c0_69] : memref<1x128xf32, #tpu.memory_space<vmem>>, vector<1x128xf32>
    tpu.vector_store %arg6[%c0_68, %c0_69], %126 {strides = array<i32>} : memref<1x128xf32, #tpu.memory_space<vmem>>, vector<1x128xf32>,
    %c0_70 = arith.constant 0 : index
    %c0_71 = arith.constant 0 : index
    %128 = vector.load %arg7[%c0_70, %c0_71] : memref<1x128xf32, #tpu.memory_space<vmem>>, vector<1x128xf32>
    %129 = arith.addf %128, %124 : vector<1x128xf32>
    %c0_72 = arith.constant 0 : index
    %c0_73 = arith.constant 0 : index
    %130 = vector.load %arg7[%c0_72, %c0_73] : memref<1x128xf32, #tpu.memory_space<vmem>>, vector<1x128xf32>
    tpu.vector_store %arg7[%c0_72, %c0_73], %129 {strides = array<i32>} : memref<1x128xf32, #tpu.memory_space<vmem>>, vector<1x128xf32>,
    %c0_i32_74 = arith.constant 0 : i32
    %131 = arith.cmpi eq, %arg0, %c0_i32_74 : i32
    %132 = arith.extui %131 : i1 to i32
    %c0_i32_75 = arith.constant 0 : i32
    %133 = arith.cmpi ne, %132, %c0_i32_75 : i32
    scf.if %133 {
      %c0_76 = arith.constant 0 : index
      %c0_77 = arith.constant 0 : index
      %134 = vector.load %arg6[%c0_76, %c0_77] : memref<1x128xf32, #tpu.memory_space<vmem>>, vector<1x128xf32>
      %c0_78 = arith.constant 0 : index
      %c0_79 = arith.constant 0 : index
      %135 = vector.load %arg7[%c0_78, %c0_79] : memref<1x128xf32, #tpu.memory_space<vmem>>, vector<1x128xf32>
      %c64_i32 = arith.constant 64 : i32
      %136 = tpu.dynamic_rotate %134 by %c64_i32 dim 1 : vector<1x128xf32>, i32 -> vector<1x128xf32>
      %137 = arith.addf %134, %136 : vector<1x128xf32>
      %c64_i32_80 = arith.constant 64 : i32
      %138 = tpu.dynamic_rotate %135 by %c64_i32_80 dim 1 : vector<1x128xf32>, i32 -> vector<1x128xf32>
      %139 = arith.addf %135, %138 : vector<1x128xf32>
      %cst_81 = arith.constant 4.8828125E-4 : f32
      %140 = vector.broadcast %cst_81 : f32 to vector<1x128xf32>
      %141 = arith.mulf %137, %140 : vector<1x128xf32>
      %cst_82 = arith.constant 4.8828125E-4 : f32
      %142 = vector.broadcast %cst_82 : f32 to vector<1x128xf32>
      %143 = arith.mulf %139, %142 : vector<1x128xf32>
      %144 = arith.mulf %141, %141 : vector<1x128xf32>
      %145 = arith.subf %143, %144 : vector<1x128xf32>
      %cst_83 = arith.constant 0.000000e+00 : f32
      %146 = vector.broadcast %cst_83 : f32 to vector<1x128xf32>
      %147 = arith.maximumf %145, %146 : vector<1x128xf32>
      %c0_84 = arith.constant 0 : index
      %c0_85 = arith.constant 0 : index
      %148 = vector.load %arg3[%c0_84, %c0_85] : memref<1x128xf32, #tpu.memory_space<vmem>>, vector<1x128xf32>
      %cst_86 = arith.constant 9.99999974E-6 : f32
      %149 = vector.broadcast %cst_86 : f32 to vector<1x128xf32>
      %150 = arith.addf %147, %149 : vector<1x128xf32>
      %151 = math.rsqrt %150 : vector<1x128xf32>
      %152 = arith.mulf %148, %151 : vector<1x128xf32>
      %c0_87 = arith.constant 0 : index
      %c0_88 = arith.constant 0 : index
      %153 = vector.load %arg4[%c0_87, %c0_88] : memref<1x128xf32, #tpu.memory_space<vmem>>, vector<1x128xf32>
      %154 = arith.mulf %141, %152 : vector<1x128xf32>
      %155 = arith.subf %153, %154 : vector<1x128xf32>
      %c0_89 = arith.constant 0 : index
      %c0_90 = arith.constant 0 : index
      %156 = vector.load %arg5[%c0_89, %c0_90] : memref<1024x128xf32, #tpu.memory_space<vmem>>, vector<128x128xf32>
      %157 = vector.broadcast %152 : vector<1x128xf32> to vector<128x128xf32>
      %158 = arith.mulf %156, %157 : vector<128x128xf32>
      %159 = vector.broadcast %155 : vector<1x128xf32> to vector<128x128xf32>
      %160 = arith.addf %158, %159 : vector<128x128xf32>
      %cst_91 = arith.constant 0.000000e+00 : f32
      %161 = vector.broadcast %cst_91 : f32 to vector<128x128xf32>
      %162 = arith.cmpf ogt, %160, %161 : vector<128x128xf32>
      %cst_92 = arith.constant 2.000000e-01 : f32
      %163 = vector.broadcast %cst_92 : f32 to vector<128x128xf32>
      %164 = arith.mulf %163, %160 : vector<128x128xf32>
      %165 = arith.select %162, %160, %164 : vector<128x128xi1>, vector<128x128xf32>
      %c0_93 = arith.constant 0 : index
      %c0_94 = arith.constant 0 : index
      %166 = vector.load %arg5[%c0_93, %c0_94] : memref<1024x128xf32, #tpu.memory_space<vmem>>, vector<128x128xf32>
      tpu.vector_store %arg5[%c0_93, %c0_94], %165 {strides = array<i32>} : memref<1024x128xf32, #tpu.memory_space<vmem>>, vector<128x128xf32>,
      %c128_95 = arith.constant 128 : index
      %c0_96 = arith.constant 0 : index
      %167 = vector.load %arg5[%c128_95, %c0_96] : memref<1024x128xf32, #tpu.memory_space<vmem>>, vector<128x128xf32>
      %168 = vector.broadcast %152 : vector<1x128xf32> to vector<128x128xf32>
      %169 = arith.mulf %167, %168 : vector<128x128xf32>
      %170 = vector.broadcast %155 : vector<1x128xf32> to vector<128x128xf32>
      %171 = arith.addf %169, %170 : vector<128x128xf32>
      %cst_97 = arith.constant 0.000000e+00 : f32
      %172 = vector.broadcast %cst_97 : f32 to vector<128x128xf32>
      %173 = arith.cmpf ogt, %171, %172 : vector<128x128xf32>
      %cst_98 = arith.constant 2.000000e-01 : f32
      %174 = vector.broadcast %cst_98 : f32 to vector<128x128xf32>
      %175 = arith.mulf %174, %171 : vector<128x128xf32>
      %176 = arith.select %173, %171, %175 : vector<128x128xi1>, vector<128x128xf32>
      %c128_99 = arith.constant 128 : index
      %c0_100 = arith.constant 0 : index
      %177 = vector.load %arg5[%c128_99, %c0_100] : memref<1024x128xf32, #tpu.memory_space<vmem>>, vector<128x128xf32>
      tpu.vector_store %arg5[%c128_99, %c0_100], %176 {strides = array<i32>} : memref<1024x128xf32, #tpu.memory_space<vmem>>, vector<128x128xf32>,
      %c256_101 = arith.constant 256 : index
      %c0_102 = arith.constant 0 : index
      %178 = vector.load %arg5[%c256_101, %c0_102] : memref<1024x128xf32, #tpu.memory_space<vmem>>, vector<128x128xf32>
      %179 = vector.broadcast %152 : vector<1x128xf32> to vector<128x128xf32>
      %180 = arith.mulf %178, %179 : vector<128x128xf32>
      %181 = vector.broadcast %155 : vector<1x128xf32> to vector<128x128xf32>
      %182 = arith.addf %180, %181 : vector<128x128xf32>
      %cst_103 = arith.constant 0.000000e+00 : f32
      %183 = vector.broadcast %cst_103 : f32 to vector<128x128xf32>
      %184 = arith.cmpf ogt, %182, %183 : vector<128x128xf32>
      %cst_104 = arith.constant 2.000000e-01 : f32
      %185 = vector.broadcast %cst_104 : f32 to vector<128x128xf32>
      %186 = arith.mulf %185, %182 : vector<128x128xf32>
      %187 = arith.select %184, %182, %186 : vector<128x128xi1>, vector<128x128xf32>
      %c256_105 = arith.constant 256 : index
      %c0_106 = arith.constant 0 : index
      %188 = vector.load %arg5[%c256_105, %c0_106] : memref<1024x128xf32, #tpu.memory_space<vmem>>, vector<128x128xf32>
      tpu.vector_store %arg5[%c256_105, %c0_106], %187 {strides = array<i32>} : memref<1024x128xf32, #tpu.memory_space<vmem>>, vector<128x128xf32>,
      %c384_107 = arith.constant 384 : index
      %c0_108 = arith.constant 0 : index
      %189 = vector.load %arg5[%c384_107, %c0_108] : memref<1024x128xf32, #tpu.memory_space<vmem>>, vector<128x128xf32>
      %190 = vector.broadcast %152 : vector<1x128xf32> to vector<128x128xf32>
      %191 = arith.mulf %189, %190 : vector<128x128xf32>
      %192 = vector.broadcast %155 : vector<1x128xf32> to vector<128x128xf32>
      %193 = arith.addf %191, %192 : vector<128x128xf32>
      %cst_109 = arith.constant 0.000000e+00 : f32
      %194 = vector.broadcast %cst_109 : f32 to vector<128x128xf32>
      %195 = arith.cmpf ogt, %193, %194 : vector<128x128xf32>
      %cst_110 = arith.constant 2.000000e-01 : f32
      %196 = vector.broadcast %cst_110 : f32 to vector<128x128xf32>
      %197 = arith.mulf %196, %193 : vector<128x128xf32>
      %198 = arith.select %195, %193, %197 : vector<128x128xi1>, vector<128x128xf32>
      %c384_111 = arith.constant 384 : index
      %c0_112 = arith.constant 0 : index
      %199 = vector.load %arg5[%c384_111, %c0_112] : memref<1024x128xf32, #tpu.memory_space<vmem>>, vector<128x128xf32>
      tpu.vector_store %arg5[%c384_111, %c0_112], %198 {strides = array<i32>} : memref<1024x128xf32, #tpu.memory_space<vmem>>, vector<128x128xf32>,
      %c512_113 = arith.constant 512 : index
      %c0_114 = arith.constant 0 : index
      %200 = vector.load %arg5[%c512_113, %c0_114] : memref<1024x128xf32, #tpu.memory_space<vmem>>, vector<128x128xf32>
      %201 = vector.broadcast %152 : vector<1x128xf32> to vector<128x128xf32>
      %202 = arith.mulf %200, %201 : vector<128x128xf32>
      %203 = vector.broadcast %155 : vector<1x128xf32> to vector<128x128xf32>
      %204 = arith.addf %202, %203 : vector<128x128xf32>
      %cst_115 = arith.constant 0.000000e+00 : f32
      %205 = vector.broadcast %cst_115 : f32 to vector<128x128xf32>
      %206 = arith.cmpf ogt, %204, %205 : vector<128x128xf32>
      %cst_116 = arith.constant 2.000000e-01 : f32
      %207 = vector.broadcast %cst_116 : f32 to vector<128x128xf32>
      %208 = arith.mulf %207, %204 : vector<128x128xf32>
      %209 = arith.select %206, %204, %208 : vector<128x128xi1>, vector<128x128xf32>
      %c512_117 = arith.constant 512 : index
      %c0_118 = arith.constant 0 : index
      %210 = vector.load %arg5[%c512_117, %c0_118] : memref<1024x128xf32, #tpu.memory_space<vmem>>, vector<128x128xf32>
      tpu.vector_store %arg5[%c512_117, %c0_118], %209 {strides = array<i32>} : memref<1024x128xf32, #tpu.memory_space<vmem>>, vector<128x128xf32>,
      %c640_119 = arith.constant 640 : index
      %c0_120 = arith.constant 0 : index
      %211 = vector.load %arg5[%c640_119, %c0_120] : memref<1024x128xf32, #tpu.memory_space<vmem>>, vector<128x128xf32>
      %212 = vector.broadcast %152 : vector<1x128xf32> to vector<128x128xf32>
      %213 = arith.mulf %211, %212 : vector<128x128xf32>
      %214 = vector.broadcast %155 : vector<1x128xf32> to vector<128x128xf32>
      %215 = arith.addf %213, %214 : vector<128x128xf32>
      %cst_121 = arith.constant 0.000000e+00 : f32
      %216 = vector.broadcast %cst_121 : f32 to vector<128x128xf32>
      %217 = arith.cmpf ogt, %215, %216 : vector<128x128xf32>
      %cst_122 = arith.constant 2.000000e-01 : f32
      %218 = vector.broadcast %cst_122 : f32 to vector<128x128xf32>
      %219 = arith.mulf %218, %215 : vector<128x128xf32>
      %220 = arith.select %217, %215, %219 : vector<128x128xi1>, vector<128x128xf32>
      %c640_123 = arith.constant 640 : index
      %c0_124 = arith.constant 0 : index
      %221 = vector.load %arg5[%c640_123, %c0_124] : memref<1024x128xf32, #tpu.memory_space<vmem>>, vector<128x128xf32>
      tpu.vector_store %arg5[%c640_123, %c0_124], %220 {strides = array<i32>} : memref<1024x128xf32, #tpu.memory_space<vmem>>, vector<128x128xf32>,
      %c768_125 = arith.constant 768 : index
      %c0_126 = arith.constant 0 : index
      %222 = vector.load %arg5[%c768_125, %c0_126] : memref<1024x128xf32, #tpu.memory_space<vmem>>, vector<128x128xf32>
      %223 = vector.broadcast %152 : vector<1x128xf32> to vector<128x128xf32>
      %224 = arith.mulf %222, %223 : vector<128x128xf32>
      %225 = vector.broadcast %155 : vector<1x128xf32> to vector<128x128xf32>
      %226 = arith.addf %224, %225 : vector<128x128xf32>
      %cst_127 = arith.constant 0.000000e+00 : f32
      %227 = vector.broadcast %cst_127 : f32 to vector<128x128xf32>
      %228 = arith.cmpf ogt, %226, %227 : vector<128x128xf32>
      %cst_128 = arith.constant 2.000000e-01 : f32
      %229 = vector.broadcast %cst_128 : f32 to vector<128x128xf32>
      %230 = arith.mulf %229, %226 : vector<128x128xf32>
      %231 = arith.select %228, %226, %230 : vector<128x128xi1>, vector<128x128xf32>
      %c768_129 = arith.constant 768 : index
      %c0_130 = arith.constant 0 : index
      %232 = vector.load %arg5[%c768_129, %c0_130] : memref<1024x128xf32, #tpu.memory_space<vmem>>, vector<128x128xf32>
      tpu.vector_store %arg5[%c768_129, %c0_130], %231 {strides = array<i32>} : memref<1024x128xf32, #tpu.memory_space<vmem>>, vector<128x128xf32>,
      %c896_131 = arith.constant 896 : index
      %c0_132 = arith.constant 0 : index
      %233 = vector.load %arg5[%c896_131, %c0_132] : memref<1024x128xf32, #tpu.memory_space<vmem>>, vector<128x128xf32>
      %234 = vector.broadcast %152 : vector<1x128xf32> to vector<128x128xf32>
      %235 = arith.mulf %233, %234 : vector<128x128xf32>
      %236 = vector.broadcast %155 : vector<1x128xf32> to vector<128x128xf32>
      %237 = arith.addf %235, %236 : vector<128x128xf32>
      %cst_133 = arith.constant 0.000000e+00 : f32
      %238 = vector.broadcast %cst_133 : f32 to vector<128x128xf32>
      %239 = arith.cmpf ogt, %237, %238 : vector<128x128xf32>
      %cst_134 = arith.constant 2.000000e-01 : f32
      %240 = vector.broadcast %cst_134 : f32 to vector<128x128xf32>
      %241 = arith.mulf %240, %237 : vector<128x128xf32>
      %242 = arith.select %239, %237, %241 : vector<128x128xi1>, vector<128x128xf32>
      %c896_135 = arith.constant 896 : index
      %c0_136 = arith.constant 0 : index
      %243 = vector.load %arg5[%c896_135, %c0_136] : memref<1024x128xf32, #tpu.memory_space<vmem>>, vector<128x128xf32>
      tpu.vector_store %arg5[%c896_135, %c0_136], %242 {strides = array<i32>} : memref<1024x128xf32, #tpu.memory_space<vmem>>, vector<128x128xf32>,
    } else {
    }
    return
  }
  func.func @transform_0(%arg0: i32) -> (i32, i32) {
    %c0_i32 = arith.constant 0 : i32
    %c0_i32_0 = arith.constant 0 : i32
    return %arg0, %c0_i32 : i32, i32
  }
  func.func @transform_1(%arg0: i32) -> (i32, i32) {
    %c0_i32 = arith.constant 0 : i32
    %c0_i32_0 = arith.constant 0 : i32
    %c0_i32_1 = arith.constant 0 : i32
    return %c0_i32, %c0_i32_0 : i32, i32
  }
  func.func @transform_2(%arg0: i32) -> (i32, i32) {
    %c0_i32 = arith.constant 0 : i32
    %c0_i32_0 = arith.constant 0 : i32
    %c0_i32_1 = arith.constant 0 : i32
    return %c0_i32, %c0_i32_0 : i32, i32
  }
  func.func @transform_3(%arg0: i32) -> (i32, i32) {
    %c0_i32 = arith.constant 0 : i32
    %c0_i32_0 = arith.constant 0 : i32
    %c0_i32_1 = arith.constant 0 : i32
    return %c0_i32, %c0_i32_0 : i32, i32
  }
  func.func @transform_4(%arg0: i32) -> (i32, i32) {
    %c0_i32 = arith.constant 0 : i32
    %c0_i32_0 = arith.constant 0 : i32
    %c0_i32_1 = arith.constant 0 : i32
    return %c0_i32, %c0_i32_0 : i32, i32
  }
}

</mosaic_0001>

<bundles_post_ra>
// kernel: downsample_conv.1
= control target key start
LH: loop header
LB: loop body
LE: loop exit
PB: predicated region body
PF: predicated region fallthrough
CT: control target
= control target key end

     0   :  { %vm96_vm0 = vcmask 261120   ;;  %s5205_s1 = inlined_call_operand.vmem [shape: bf16[32,128], index: 1, kind: input, shape index: {}]   ;;  %s5206_s0 = inlined_call_operand.vmem [shape: bf16[1024,32], index: 0, kind: input, shape index: {}]   ;;  %s5207_s2 = inlined_call_operand.vmem [shape: f32[1,128], index: 2, kind: input, shape index: {}]   ;;  %s5208_s3 = inlined_call_operand.vmem [shape: f32[1,128], index: 3, kind: input, shape index: {}]   ;;  %s5209_s4 = inlined_call_operand.vmem [shape: f32[1024,128], index: 4, kind: output, shape index: {}]  }
   0x1   :  { %v3265_v0 = vld [vmem:[%s5205_s1 + $0x8] sm:$0xff]  ;;  %v3264_v4 = vld [vmem:[%s5205_s1] sm:$0xff]  ;;  %v3258_v20 = vld [vmem:[%s5206_s0 + $0x10] sm:$0xff] }
   0x2   :  { %v3275_v1 = vld [vmem:[%s5205_s1 + $0x8] sm:$0xff]  ;;  %127 = vmatpush.bf16.msra.mxu0 %v3265_v0  ;;  %v3274_v5 = vld [vmem:[%s5205_s1] sm:$0xff]  ;;  %v3268_v21 = vld [vmem:[%s5206_s0 + $0x50] sm:$0xff] }
   0x3   :  { %v3285_v2 = vld [vmem:[%s5205_s1 + $0x8] sm:$0xff]  ;;  %350 = vmatpush.bf16.msra.mxu1 %v3275_v1  ;;  %v3284_v6 = vld [vmem:[%s5205_s1] sm:$0xff]  ;;  %v3278_v22 = vld [vmem:[%s5206_s0 + $0x90] sm:$0xff] }
   0x4   :  { %v3295_v3 = vld [vmem:[%s5205_s1 + $0x8] sm:$0xff]  ;;  %573 = vmatpush.bf16.msra.mxu2 %v3285_v2  ;;  %v3294_v7 = vld [vmem:[%s5205_s1] sm:$0xff]  ;;  %v3288_v23 = vld [vmem:[%s5206_s0 + $0xd0] sm:$0xff] }
   0x5   :  { %796 = vmatpush.bf16.msra.mxu3 %v3295_v3  ;;  %v3325_v8 = vld [vmem:[%s5205_s1 + $0x8] sm:$0xff]  ;;  %v3256_v10 = vld [vmem:[%s5206_s0] sm:$0xff]  ;;  %v3259_v28 = vld [vmem:[%s5206_s0 + $0x18] sm:$0xff] }
   0x6   :  { %v3305_v9 = vld [vmem:[%s5205_s1 + $0x8] sm:$0xff]  ;;  %v3266_v11 = vld [vmem:[%s5206_s0 + $0x40] sm:$0xff]  ;;  %128 = vmatpush.bf16.msra.mxu0 %v3264_v4  ;;  %v3269_v29 = vld [vmem:[%s5206_s0 + $0x58] sm:$0xff] }
   0x7   :  { %351 = vmatpush.bf16.msra.mxu1 %v3274_v5  ;;  %v3276_v12 = vld [vmem:[%s5206_s0 + $0x80] sm:$0xff]  ;;  %v3335_v14 = vld [vmem:[%s5205_s1 + $0x8] sm:$0xff]  ;;  %v3279_v30 = vld [vmem:[%s5206_s0 + $0x98] sm:$0xff] }
   0x8   :  { %v3286_v13 = vld [vmem:[%s5206_s0 + $0xc0] sm:$0xff]  ;;  %574 = vmatpush.bf16.msra.mxu2 %v3284_v6  ;;  %v3315_v15 = vld [vmem:[%s5205_s1 + $0x8] sm:$0xff]  ;;  %v3289_v31 = vld [vmem:[%s5206_s0 + $0xd8] sm:$0xff] }
   0x9   :  { %797 = vmatpush.bf16.msra.mxu3 %v3294_v7  ;;  %2800 = vmatmul.msk.bf16.vlgmr.msra.gmra.mxu0 %vm96_vm0, %v3256_v10  ;;  %v3257_v16 = vld [vmem:[%s5206_s0 + $0x8] sm:$0xff]  ;;  %v3324_v24 = vld [vmem:[%s5205_s1] sm:$0xff]  ;;  %v3262_v40 = vld [vmem:[%s5206_s0 + $0x30] sm:$0xff] }
   0xa   :  { %1019 = vmatpush.bf16.msrb.mxu0 %v3305_v9  ;;  %2848 = vmatmul.msk.bf16.vlgmr.msra.gmra.mxu1 %vm96_vm0, %v3266_v11  ;;  %v3267_v17 = vld [vmem:[%s5206_s0 + $0x48] sm:$0xff]  ;;  %v3304_v25 = vld [vmem:[%s5205_s1] sm:$0xff]  ;;  %v3272_v41 = vld [vmem:[%s5206_s0 + $0x70] sm:$0xff] }
   0xb   :  { %2912 = vmatmul.msk.bf16.vlgmr.msra.gmra.mxu2 %vm96_vm0, %v3276_v12  ;;  %1242 = vmatpush.bf16.msrb.mxu1 %v3315_v15  ;;  %v3277_v18 = vld [vmem:[%s5206_s0 + $0x88] sm:$0xff]  ;;  %v3334_v26 = vld [vmem:[%s5205_s1] sm:$0xff]  ;;  %v3282_v42 = vld [vmem:[%s5206_s0 + $0xb0] sm:$0xff] }
   0xc   :  { %1465 = vmatpush.bf16.msrb.mxu2 %v3325_v8  ;;  %2976 = vmatmul.msk.bf16.vlgmr.msra.gmra.mxu3 %vm96_vm0, %v3286_v13  ;;  %v3287_v19 = vld [vmem:[%s5206_s0 + $0xc8] sm:$0xff]  ;;  %v3314_v27 = vld [vmem:[%s5205_s1] sm:$0xff]  ;;  %v3292_v43 = vld [vmem:[%s5206_s0 + $0xf0] sm:$0xff] }
   0xd   :  { %1688 = vmatpush.bf16.msrb.mxu3 %v3335_v14  ;;  %v3260_v32 = vld [vmem:[%s5206_s0 + $0x20] sm:$0xff]  ;;  %v3261_v36 = vld [vmem:[%s5206_s0 + $0x28] sm:$0xff]  ;;  %v3263_v44 = vld [vmem:[%s5206_s0 + $0x38] sm:$0xff] }
   0xe   :  { %1020 = vmatpush.bf16.msrb.mxu0 %v3304_v25  ;;  %v3270_v33 = vld [vmem:[%s5206_s0 + $0x60] sm:$0xff]  ;;  %v3271_v37 = vld [vmem:[%s5206_s0 + $0x68] sm:$0xff]  ;;  %v3273_v45 = vld [vmem:[%s5206_s0 + $0x78] sm:$0xff] }
   0xf   :  { %1243 = vmatpush.bf16.msrb.mxu1 %v3314_v27  ;;  %v3280_v34 = vld [vmem:[%s5206_s0 + $0xa0] sm:$0xff]  ;;  %v3281_v38 = vld [vmem:[%s5206_s0 + $0xa8] sm:$0xff]  ;;  %v3283_v46 = vld [vmem:[%s5206_s0 + $0xb8] sm:$0xff] }
  0x10   :  { %1466 = vmatpush.bf16.msrb.mxu2 %v3324_v24  ;;  %v3290_v35 = vld [vmem:[%s5206_s0 + $0xe0] sm:$0xff]  ;;  %v3291_v39 = vld [vmem:[%s5206_s0 + $0xe8] sm:$0xff]  ;;  %v3293_v47 = vld [vmem:[%s5206_s0 + $0xf8] sm:$0xff] }
  0x11   :  { %1689 = vmatpush.bf16.msrb.mxu3 %v3334_v26  ;;  %v3296_v48 = vld [vmem:[%s5206_s0 + $0x100] sm:$0xff]  ;;  %v3297_v60 = vld [vmem:[%s5206_s0 + $0x108] sm:$0xff]  ;;  %v3298_v8 = vld [vmem:[%s5206_s0 + $0x110] sm:$0xff] }
  0x12   :  { %v3306_v49 = vld [vmem:[%s5206_s0 + $0x140] sm:$0xff]  ;;  %v3307_v61 = vld [vmem:[%s5206_s0 + $0x148] sm:$0xff]  ;;  %v3308_v9 = vld [vmem:[%s5206_s0 + $0x150] sm:$0xff] }
  0x13   :  { %v3316_v52 = vld [vmem:[%s5206_s0 + $0x180] sm:$0xff]  ;;  %v3317_v0 = vld [vmem:[%s5206_s0 + $0x188] sm:$0xff]  ;;  %v3318_v12 = vld [vmem:[%s5206_s0 + $0x190] sm:$0xff] }
  0x14   :  { %v3326_v53 = vld [vmem:[%s5206_s0 + $0x1c0] sm:$0xff]  ;;  %v3327_v1 = vld [vmem:[%s5206_s0 + $0x1c8] sm:$0xff]  ;;  %v3328_v13 = vld [vmem:[%s5206_s0 + $0x1d0] sm:$0xff] }
  0x15   :  { %v3319_v24 = vld [vmem:[%s5206_s0 + $0x198] sm:$0xff] }
  0x16   :  { %v3329_v25 = vld [vmem:[%s5206_s0 + $0x1d8] sm:$0xff] }
  0x19   :  { %2801 = vmatmul.msk.bf16.gmra.mxu0 %vm96_vm0, %v3257_v16 }
  0x1a   :  { %2849 = vmatmul.msk.bf16.gmra.mxu1 %vm96_vm0, %v3267_v17 }
  0x1b   :  { %2913 = vmatmul.msk.bf16.gmra.mxu2 %vm96_vm0, %v3277_v18 }
  0x1c   :  { %2977 = vmatmul.msk.bf16.gmra.mxu3 %vm96_vm0, %v3287_v19 }
  0x29   :  { %2802 = vmatmul.msk.bf16.gmra.mxu0 %vm96_vm0, %v3258_v20  ;;  %v3299_v20 = vld [vmem:[%s5206_s0 + $0x118] sm:$0xff] }
  0x2a   :  { %2850 = vmatmul.msk.bf16.gmra.mxu1 %vm96_vm0, %v3268_v21  ;;  %v3309_v21 = vld [vmem:[%s5206_s0 + $0x158] sm:$0xff] }
  0x2b   :  { %2914 = vmatmul.msk.bf16.gmra.mxu2 %vm96_vm0, %v3278_v22 }
  0x2c   :  { %2978 = vmatmul.msk.bf16.gmra.mxu3 %vm96_vm0, %v3288_v23 }
  0x39   :  { %2803 = vmatmul.msk.bf16.gmra.mxu0 %vm96_vm0, %v3259_v28 }
  0x3a   :  { %2851 = vmatmul.msk.bf16.gmra.mxu1 %vm96_vm0, %v3269_v29 }
  0x3b   :  { %2915 = vmatmul.msk.bf16.gmra.mxu2 %vm96_vm0, %v3279_v30 }
  0x3c   :  { %2979 = vmatmul.msk.bf16.gmra.mxu3 %vm96_vm0, %v3289_v31 }
  0x49   :  { %2804 = vmatmul.msk.bf16.gmra.mxu0 %vm96_vm0, %v3260_v32  ;;  %v3300_v32 = vld [vmem:[%s5206_s0 + $0x120] sm:$0xff] }
  0x4a   :  { %2852 = vmatmul.msk.bf16.gmra.mxu1 %vm96_vm0, %v3270_v33  ;;  %v3310_v33 = vld [vmem:[%s5206_s0 + $0x160] sm:$0xff] }
  0x4b   :  { %2916 = vmatmul.msk.bf16.gmra.mxu2 %vm96_vm0, %v3280_v34 }
  0x4c   :  { %2980 = vmatmul.msk.bf16.gmra.mxu3 %vm96_vm0, %v3290_v35 }
  0x59   :  { %2805 = vmatmul.msk.bf16.gmra.mxu0 %vm96_vm0, %v3261_v36  ;;  %v3320_v36 = vld [vmem:[%s5206_s0 + $0x1a0] sm:$0xff] }
  0x5a   :  { %2853 = vmatmul.msk.bf16.gmra.mxu1 %vm96_vm0, %v3271_v37  ;;  %v3330_v37 = vld [vmem:[%s5206_s0 + $0x1e0] sm:$0xff] }
  0x5b   :  { %2917 = vmatmul.msk.bf16.gmra.mxu2 %vm96_vm0, %v3281_v38 }
  0x5c   :  { %2981 = vmatmul.msk.bf16.gmra.mxu3 %vm96_vm0, %v3291_v39 }
  0x69   :  { %2806 = vmatmul.msk.bf16.gmra.mxu0 %vm96_vm0, %v3262_v40 }
  0x6a   :  { %2854 = vmatmul.msk.bf16.gmra.mxu1 %vm96_vm0, %v3272_v41 }
  0x6b   :  { %2918 = vmatmul.msk.bf16.gmra.mxu2 %vm96_vm0, %v3282_v42 }
  0x6c   :  { %2982 = vmatmul.msk.bf16.gmra.mxu3 %vm96_vm0, %v3292_v43 }
  0x79   :  { %2807 = vmatmul.msk.bf16.gmra.mxu0 %vm96_vm0, %v3263_v44  ;;  %v3301_v44 = vld [vmem:[%s5206_s0 + $0x128] sm:$0xff] }
  0x7a   :  { %2855 = vmatmul.msk.bf16.gmra.mxu1 %vm96_vm0, %v3273_v45  ;;  %v3311_v45 = vld [vmem:[%s5206_s0 + $0x168] sm:$0xff] }
  0x7b   :  { %2919 = vmatmul.msk.bf16.gmra.mxu2 %vm96_vm0, %v3283_v46 }
  0x7c   :  { %2983 = vmatmul.msk.bf16.gmra.mxu3 %vm96_vm0, %v3293_v47 }
  0x86   :  { %v3549_v50 = vpop.f32.mrf.mxu0 }
  0x87   :  { %5334 = vst [vmem:[#allocation4_spill] sm:$0xff] %v3549_v50  ;;  %v3551_v51 = vpop.f32.mrf.mxu1 }
  0x88   :  { %5335 = vst [vmem:[#allocation5_spill] sm:$0xff] %v3551_v51 }
  0x89   :  { %3040 = vmatmul.msk.bf16.vlgmr.msrb.gmra.mxu0 %vm96_vm0, %v3296_v48  ;;  %v3321_v48 = vld [vmem:[%s5206_s0 + $0x1a8] sm:$0xff] }
  0x8a   :  { %3104 = vmatmul.msk.bf16.vlgmr.msrb.gmra.mxu1 %vm96_vm0, %v3306_v49  ;;  %v3331_v49 = vld [vmem:[%s5206_s0 + $0x1e8] sm:$0xff] }
  0x8b   :  { %3168 = vmatmul.msk.bf16.vlgmr.msrb.gmra.mxu2 %vm96_vm0, %v3316_v52 }
  0x8c   :  { %3232 = vmatmul.msk.bf16.vlgmr.msrb.gmra.mxu3 %vm96_vm0, %v3326_v53 }
  0x8e   :  { %v3563_v54 = vpop.f32.mrf.mxu2  ;;  %v3567_v56 = vpop.f32.mrf.mxu0 }
  0x8f   :  { %5336 = vst [vmem:[#allocation6_spill] sm:$0xff] %v3563_v54  ;;  %v3565_v55 = vpop.f32.mrf.mxu3  ;;  %v3569_v57 = vpop.f32.mrf.mxu1 }
  0x90   :  { %5337 = vst [vmem:[#allocation7_spill] sm:$0xff] %v3565_v55 }
  0x91   :  { %5338 = vst [vmem:[#allocation8_spill] sm:$0xff] %v3567_v56 }
  0x92   :  { %5339 = vst [vmem:[#allocation9_spill] sm:$0xff] %v3569_v57 }
  0x96   :  { %v3571_v58 = vpop.f32.mrf.mxu2  ;;  %v3581_v62 = vpop.f32.mrf.mxu0 }
  0x97   :  { %5340 = vst [vmem:[#allocation10_spill] sm:$0xff] %v3571_v58  ;;  %v3573_v59 = vpop.f32.mrf.mxu3  ;;  %v3583_v63 = vpop.f32.mrf.mxu1 }
  0x98   :  { %5341 = vst [vmem:[#allocation11_spill] sm:$0xff] %v3573_v59 }
  0x99   :  { %5342 = vst [vmem:[#allocation12_spill] sm:$0xff] %v3581_v62  ;;  %3041 = vmatmul.msk.bf16.gmra.mxu0 %vm96_vm0, %v3297_v60 }
  0x9a   :  { %5343 = vst [vmem:[#allocation13_spill] sm:$0xff] %v3583_v63  ;;  %3105 = vmatmul.msk.bf16.gmra.mxu1 %vm96_vm0, %v3307_v61 }
  0x9b   :  { %3169 = vmatmul.msk.bf16.gmra.mxu2 %vm96_vm0, %v3317_v0 }
  0x9c   :  { %3233 = vmatmul.msk.bf16.gmra.mxu3 %vm96_vm0, %v3327_v1 }
  0x9e   :  { %v3595_v2 = vpop.f32.mrf.mxu2  ;;  %v3599_v4 = vpop.f32.mrf.mxu0 }
  0x9f   :  { %5344 = vst [vmem:[#allocation14_spill] sm:$0xff] %v3595_v2  ;;  %v3597_v3 = vpop.f32.mrf.mxu3  ;;  %v3601_v5 = vpop.f32.mrf.mxu1 }
  0xa0   :  { %5345 = vst [vmem:[#allocation15_spill] sm:$0xff] %v3597_v3 }
  0xa1   :  { %5346 = vst [vmem:[#allocation16_spill] sm:$0xff] %v3599_v4 }
  0xa2   :  { %5347 = vst [vmem:[#allocation17_spill] sm:$0xff] %v3601_v5 }
  0xa6   :  { %v3603_v6 = vpop.f32.mrf.mxu2  ;;  %v3613_v10 = vpop.f32.mrf.mxu0 }
  0xa7   :  { %5348 = vst [vmem:[#allocation18_spill] sm:$0xff] %v3603_v6  ;;  %v3605_v7 = vpop.f32.mrf.mxu3  ;;  %v3615_v11 = vpop.f32.mrf.mxu1 }
  0xa8   :  { %5349 = vst [vmem:[#allocation19_spill] sm:$0xff] %v3605_v7 }
  0xa9   :  { %5350 = vst [vmem:[#allocation20_spill] sm:$0xff] %v3613_v10  ;;  %3042 = vmatmul.msk.bf16.gmra.mxu0 %vm96_vm0, %v3298_v8  ;;  %v3302_v8 = vld [vmem:[%s5206_s0 + $0x130] sm:$0xff] }
  0xaa   :  { %5351 = vst [vmem:[#allocation21_spill] sm:$0xff] %v3615_v11  ;;  %3106 = vmatmul.msk.bf16.gmra.mxu1 %vm96_vm0, %v3308_v9  ;;  %v3312_v9 = vld [vmem:[%s5206_s0 + $0x170] sm:$0xff] }
  0xab   :  { %3170 = vmatmul.msk.bf16.gmra.mxu2 %vm96_vm0, %v3318_v12 }
  0xac   :  { %3234 = vmatmul.msk.bf16.gmra.mxu3 %vm96_vm0, %v3328_v13 }
  0xae   :  { %v3627_v14 = vpop.f32.mrf.mxu2  ;;  %v3631_v16 = vpop.f32.mrf.mxu0 }
  0xaf   :  { %5352 = vst [vmem:[#allocation22_spill] sm:$0xff] %v3627_v14  ;;  %v3629_v15 = vpop.f32.mrf.mxu3  ;;  %v3633_v17 = vpop.f32.mrf.mxu1 }
  0xb0   :  { %5353 = vst [vmem:[#allocation23_spill] sm:$0xff] %v3629_v15 }
  0xb1   :  { %5354 = vst [vmem:[#allocation24_spill] sm:$0xff] %v3631_v16 }
  0xb2   :  { %5355 = vst [vmem:[#allocation25_spill] sm:$0xff] %v3633_v17 }
  0xb6   :  { %v3635_v18 = vpop.f32.mrf.mxu2  ;;  %v3645_v22 = vpop.f32.mrf.mxu0 }
  0xb7   :  { %5356 = vst [vmem:[#allocation26_spill] sm:$0xff] %v3635_v18  ;;  %v3637_v19 = vpop.f32.mrf.mxu3  ;;  %v3647_v23 = vpop.f32.mrf.mxu1 }
  0xb8   :  { %5357 = vst [vmem:[#allocation27_spill] sm:$0xff] %v3637_v19 }
  0xb9   :  { %5358 = vst [vmem:[#allocation28_spill] sm:$0xff] %v3645_v22  ;;  %3043 = vmatmul.msk.bf16.gmra.mxu0 %vm96_vm0, %v3299_v20  ;;  %v3322_v20 = vld [vmem:[%s5206_s0 + $0x1b0] sm:$0xff] }
  0xba   :  { %5359 = vst [vmem:[#allocation29_spill] sm:$0xff] %v3647_v23  ;;  %3107 = vmatmul.msk.bf16.gmra.mxu1 %vm96_vm0, %v3309_v21  ;;  %v3332_v21 = vld [vmem:[%s5206_s0 + $0x1f0] sm:$0xff] }
  0xbb   :  { %3171 = vmatmul.msk.bf16.gmra.mxu2 %vm96_vm0, %v3319_v24 }
  0xbc   :  { %3235 = vmatmul.msk.bf16.gmra.mxu3 %vm96_vm0, %v3329_v25 }
  0xbe   :  { %v3659_v26 = vpop.f32.mrf.mxu2  ;;  %v3663_v28 = vpop.f32.mrf.mxu0 }
  0xbf   :  { %5360 = vst [vmem:[#allocation30_spill] sm:$0xff] %v3659_v26  ;;  %v3661_v27 = vpop.f32.mrf.mxu3  ;;  %v3665_v29 = vpop.f32.mrf.mxu1 }
  0xc0   :  { %5361 = vst [vmem:[#allocation31_spill] sm:$0xff] %v3661_v27 }
  0xc1   :  { %5362 = vst [vmem:[#allocation32_spill] sm:$0xff] %v3663_v28 }
  0xc2   :  { %5363 = vst [vmem:[#allocation33_spill] sm:$0xff] %v3665_v29 }
  0xc6   :  { %v3667_v30 = vpop.f32.mrf.mxu2  ;;  %v3677_v34 = vpop.f32.mrf.mxu0 }
  0xc7   :  { %5364 = vst [vmem:[#allocation34_spill] sm:$0xff] %v3667_v30  ;;  %v3669_v31 = vpop.f32.mrf.mxu3  ;;  %v3679_v35 = vpop.f32.mrf.mxu1 }
  0xc8   :  { %5365 = vst [vmem:[#allocation35_spill] sm:$0xff] %v3669_v31 }
  0xc9   :  { %5366 = vst [vmem:[#allocation36_spill] sm:$0xff] %v3677_v34  ;;  %3044 = vmatmul.msk.bf16.gmra.mxu0 %vm96_vm0, %v3300_v32 }
  0xca   :  { %5367 = vst [vmem:[#allocation37_spill] sm:$0xff] %v3679_v35  ;;  %3108 = vmatmul.msk.bf16.gmra.mxu1 %vm96_vm0, %v3310_v33 }
  0xcb   :  { %3172 = vmatmul.msk.bf16.gmra.mxu2 %vm96_vm0, %v3320_v36 }
  0xcc   :  { %3236 = vmatmul.msk.bf16.gmra.mxu3 %vm96_vm0, %v3330_v37 }
  0xce   :  { %v3691_v38 = vpop.f32.mrf.mxu2  ;;  %v3695_v40 = vpop.f32.mrf.mxu0 }
  0xcf   :  { %5368 = vst [vmem:[#allocation38_spill] sm:$0xff] %v3691_v38  ;;  %v3693_v39 = vpop.f32.mrf.mxu3  ;;  %v3697_v41 = vpop.f32.mrf.mxu1 }
  0xd0   :  { %5369 = vst [vmem:[#allocation39_spill] sm:$0xff] %v3693_v39 }
  0xd1   :  { %5370 = vst [vmem:[#allocation40_spill] sm:$0xff] %v3695_v40 }
  0xd2   :  { %5371 = vst [vmem:[#allocation41_spill] sm:$0xff] %v3697_v41 }
  0xd6   :  { %v3699_v42 = vpop.f32.mrf.mxu2  ;;  %v3709_v46 = vpop.f32.mrf.mxu0 }
  0xd7   :  { %5372 = vst [vmem:[#allocation42_spill] sm:$0xff] %v3699_v42  ;;  %v3701_v43 = vpop.f32.mrf.mxu3  ;;  %v3711_v47 = vpop.f32.mrf.mxu1 }
  0xd8   :  { %5373 = vst [vmem:[#allocation43_spill] sm:$0xff] %v3701_v43 }
  0xd9   :  { %5374 = vst [vmem:[#allocation44_spill] sm:$0xff] %v3709_v46  ;;  %3045 = vmatmul.msk.bf16.gmra.mxu0 %vm96_vm0, %v3301_v44  ;;  %v3303_v44 = vld [vmem:[%s5206_s0 + $0x138] sm:$0xff] }
  0xda   :  { %5375 = vst [vmem:[#allocation45_spill] sm:$0xff] %v3711_v47  ;;  %3109 = vmatmul.msk.bf16.gmra.mxu1 %vm96_vm0, %v3311_v45  ;;  %v3313_v45 = vld [vmem:[%s5206_s0 + $0x178] sm:$0xff] }
  0xdb   :  { %3173 = vmatmul.msk.bf16.gmra.mxu2 %vm96_vm0, %v3321_v48 }
  0xdc   :  { %3237 = vmatmul.msk.bf16.gmra.mxu3 %vm96_vm0, %v3331_v49 }
  0xde   :  { %v3723_v52 = vpop.f32.mrf.mxu2  ;;  %v3727_v60 = vpop.f32.mrf.mxu0 }
  0xdf   :  { %5376 = vst [vmem:[#allocation46_spill] sm:$0xff] %v3723_v52  ;;  %v3725_v53 = vpop.f32.mrf.mxu3  ;;  %v3729_v61 = vpop.f32.mrf.mxu1 }
  0xe0   :  { %5377 = vst [vmem:[#allocation47_spill] sm:$0xff] %v3725_v53 }
  0xe1   :  { %5378 = vst [vmem:[#allocation48_spill] sm:$0xff] %v3727_v60 }
  0xe2   :  { %5379 = vst [vmem:[#allocation49_spill] sm:$0xff] %v3729_v61 }
  0xe6   :  { %v3731_v0 = vpop.f32.mrf.mxu2  ;;  %v3741_v12 = vpop.f32.mrf.mxu0 }
  0xe7   :  { %5380 = vst [vmem:[#allocation50_spill] sm:$0xff] %v3731_v0  ;;  %v3733_v1 = vpop.f32.mrf.mxu3  ;;  %v3743_v13 = vpop.f32.mrf.mxu1 }
  0xe8   :  { %5381 = vst [vmem:[#allocation51_spill] sm:$0xff] %v3733_v1 }
  0xe9   :  { %5382 = vst [vmem:[#allocation52_spill] sm:$0xff] %v3741_v12  ;;  %3046 = vmatmul.msk.bf16.gmra.mxu0 %vm96_vm0, %v3302_v8  ;;  %v3323_v8 = vld [vmem:[%s5206_s0 + $0x1b8] sm:$0xff] }
  0xea   :  { %5383 = vst [vmem:[#allocation53_spill] sm:$0xff] %v3743_v13  ;;  %3110 = vmatmul.msk.bf16.gmra.mxu1 %vm96_vm0, %v3312_v9  ;;  %v3333_v9 = vld [vmem:[%s5206_s0 + $0x1f8] sm:$0xff]  ;;  %s3341_s0 = smov 64  }
  0xeb   :  { %3174 = vmatmul.msk.bf16.gmra.mxu2 %vm96_vm0, %v3322_v20 }
  0xec   :  { %3238 = vmatmul.msk.bf16.gmra.mxu3 %vm96_vm0, %v3332_v21 }
  0xee   :  { %v3755_v24 = vpop.f32.mrf.mxu2  ;;  %v3759_v32 = vpop.f32.mrf.mxu0 }
  0xef   :  { %5384 = vst [vmem:[#allocation54_spill] sm:$0xff] %v3755_v24  ;;  %v3757_v25 = vpop.f32.mrf.mxu3  ;;  %v3761_v33 = vpop.f32.mrf.mxu1 }
  0xf0   :  { %5385 = vst [vmem:[#allocation55_spill] sm:$0xff] %v3757_v25 }
  0xf1   :  { %5386 = vst [vmem:[#allocation56_spill] sm:$0xff] %v3759_v32  ;;  %v857_v32 = vadd.f32 %v3573_v59, %v3565_v55 }
  0xf2   :  { %5387 = vst [vmem:[#allocation57_spill] sm:$0xff] %v3761_v33  ;;  %v634_v33 = vadd.f32 %v3571_v58, %v3563_v54 }
  0xf6   :  { %v3763_v36 = vpop.f32.mrf.mxu2  ;;  %v3773_v48 = vpop.f32.mrf.mxu0 }
  0xf7   :  { %5388 = vst [vmem:[#allocation58_spill] sm:$0xff] %v3763_v36  ;;  %v3765_v37 = vpop.f32.mrf.mxu3  ;;  %v3775_v49 = vpop.f32.mrf.mxu1 }
  0xf8   :  { %5389 = vst [vmem:[#allocation59_spill] sm:$0xff] %v3765_v37 }
  0xf9   :  { %5390 = vst [vmem:[#allocation60_spill] sm:$0xff] %v3773_v48  ;;  %3047 = vmatmul.msk.bf16.gmra.mxu0 %vm96_vm0, %v3303_v44 }
  0xfa   :  { %5391 = vst [vmem:[#allocation61_spill] sm:$0xff] %v3775_v49  ;;  %3111 = vmatmul.msk.bf16.gmra.mxu1 %vm96_vm0, %v3313_v45  ;;  %v435_v49 = vmul.f32 %v3583_v63, %v3583_v63 }
  0xfb   :  { %3175 = vmatmul.msk.bf16.gmra.mxu2 %vm96_vm0, %v3323_v8 }
  0xfc   :  { %3239 = vmatmul.msk.bf16.gmra.mxu3 %vm96_vm0, %v3333_v9 }
  0xfe   :  { %v3787_v20 = vpop.f32.mrf.mxu2  ;;  %v3791_v37 = vpop.f32.mrf.mxu0 }
  0xff   :  { %5392 = vst [vmem:[#allocation62_spill] sm:$0xff] %v3787_v20  ;;  %v3789_v21 = vpop.f32.mrf.mxu3  ;;  %v3793_v36 = vpop.f32.mrf.mxu1 }
 0x100   :  { %5393 = vst [vmem:[#allocation63_spill] sm:$0xff] %v3789_v21  ;;  %v211_v21 = vmul.f32 %v3567_v56, %v3567_v56 }
 0x101   :  { %5394 = vst [vmem:[#allocation64_spill] sm:$0xff] %v3791_v37  ;;  %v411_v37 = vadd.f32 %v3569_v57, %v3551_v51 }
 0x102   :  { %5395 = vst [vmem:[#allocation65_spill] sm:$0xff] %v3793_v36  ;;  %v212_v36 = vmul.f32 %v3581_v62, %v3581_v62 }
 0x106   :  { %v3795_v25 = vpop.f32.mrf.mxu2  ;;  %v3799_v1 = vpop.f32.mrf.mxu0 }
 0x107   :  { %5396 = vst [vmem:[#allocation66_spill] sm:$0xff] %v3795_v25  ;;  %v3797_v24 = vpop.f32.mrf.mxu3  ;;  %v3801_v44 = vpop.f32.mrf.mxu1  ;;  %v434_v25 = vmul.f32 %v3569_v57, %v3569_v57  ;;  %v881_v57 = vmul.f32 %v3597_v3, %v3597_v3 }
 0x108   :  { %5397 = vst [vmem:[#allocation67_spill] sm:$0xff] %v3797_v24  ;;  %v210_v24 = vmul.f32 %v3549_v50, %v3549_v50 }
 0x109   :  { %5398 = vst [vmem:[#allocation68_spill] sm:$0xff] %v3799_v1  ;;  %v880_v1 = vmul.f32 %v3573_v59, %v3573_v59 }
 0x10a   :  { %5399 = vst [vmem:[#allocation69_spill] sm:$0xff] %v3801_v44  ;;  %v433_v44 = vmul.f32 %v3551_v51, %v3551_v51  ;;  %v226_v48 = vadd.f32 %v211_v21, %v210_v24 }
 0x10c   :  { %v449_v0 = vadd.f32 %v434_v25, %v433_v44  ;;  %v213_v44 = vmul.f32 %v3599_v4, %v3599_v4 }
 0x10e   :  { %v3803_v45 = vpop.f32.mrf.mxu2  ;;  %v3807_v9 = vpop.f32.mrf.mxu0 }
 0x10f   :  { %5400 = vst [vmem:[#allocation70_spill] sm:$0xff] %v3803_v45  ;;  %v3805_v8 = vpop.f32.mrf.mxu3  ;;  %v3809_v20 = vpop.f32.mrf.mxu1  ;;  %v656_v45 = vmul.f32 %v3563_v54, %v3563_v54  ;;  %v635_v54 = vadd.f32 %v634_v33, %v3595_v2 }
 0x110   :  { %5401 = vst [vmem:[#allocation71_spill] sm:$0xff] %v3805_v8  ;;  %v879_v8 = vmul.f32 %v3565_v55, %v3565_v55  ;;  %v227_v55 = vadd.f32 %v226_v48, %v212_v36  ;;  %v214_v36 = vmul.f32 %v3613_v10, %v3613_v10 }
 0x111   :  { %5402 = vst [vmem:[#allocation72_spill] sm:$0xff] %v3807_v9  ;;  %v188_v9 = vadd.f32 %v3567_v56, %v3549_v50  ;;  %v412_v56 = vadd.f32 %v411_v37, %v3583_v63  ;;  %v658_v50 = vmul.f32 %v3595_v2, %v3595_v2  ;;  %v858_v63 = vadd.f32 %v857_v32, %v3597_v3 }
 0x112   :  { %5403 = vst [vmem:[#allocation73_spill] sm:$0xff] %v3809_v20  ;;  %v657_v20 = vmul.f32 %v3571_v58, %v3571_v58  ;;  %v895_v21 = vadd.f32 %v880_v1, %v879_v8  ;;  %v450_v58 = vadd.f32 %v449_v0, %v435_v49  ;;  %v882_v1 = vmul.f32 %v3605_v7, %v3605_v7 }
 0x113   :  { %v189_v13 = vadd.f32 %v188_v9, %v3581_v62  ;;  %v436_v9 = vmul.f32 %v3601_v5, %v3601_v5  ;;  %v413_v8 = vadd.f32 %v412_v56, %v3601_v5  ;;  %v437_v0 = vmul.f32 %v3615_v11, %v3615_v11  ;;  %v5431_v5 = vld [vmem:[#allocation66_spill] sm:$0xff] }
 0x114   :  { %v672_v25 = vadd.f32 %v657_v20, %v656_v45  ;;  %v659_v20 = vmul.f32 %v3603_v6, %v3603_v6  ;;  %v228_v33 = vadd.f32 %v227_v55, %v213_v44  ;;  %v636_v48 = vadd.f32 %v635_v54, %v3603_v6 }
 0x115   :  { %v190_v45 = vadd.f32 %v189_v13, %v3599_v4  ;;  %v451_v32 = vadd.f32 %v450_v58, %v436_v9  ;;  %v859_v49 = vadd.f32 %v858_v63, %v3605_v7  ;;  %v414_v13 = vadd.f32 %v413_v8, %v3615_v11 }
 0x116   :  { %v3845_v51 = vpop.f32.mrf.mxu2  ;;  %v3853_v59 = vpop.f32.mrf.mxu0  ;;  %v673_v62 = vadd.f32 %v672_v25, %v658_v50  ;;  %v660_v50 = vmul.f32 %v3627_v14, %v3627_v14  ;;  %v883_v56 = vmul.f32 %v3629_v15, %v3629_v15  ;;  %v215_v55 = vmul.f32 %v3631_v16, %v3631_v16 }
 0x117   :  { %5404 = vst [vmem:[#allocation74_spill] sm:$0xff] %v3845_v51  ;;  %v3847_v24 = vpop.f32.mrf.mxu3  ;;  %v3855_v37 = vpop.f32.mrf.mxu1  ;;  %v191_v3 = vadd.f32 %v190_v45, %v3613_v10  ;;  %v438_v54 = vmul.f32 %v3633_v17, %v3633_v17  ;;  %v229_v58 = vadd.f32 %v228_v33, %v214_v36  ;;  %v452_v63 = vadd.f32 %v451_v32, %v437_v0 }
 0x118   :  { %5405 = vst [vmem:[#allocation75_spill] sm:$0xff] %v3847_v24  ;;  %v860_v44 = vadd.f32 %v859_v49, %v3629_v15  ;;  %v216_v32 = vmul.f32 %v3645_v22, %v3645_v22 }
 0x119   :  { %5406 = vst [vmem:[#allocation76_spill] sm:$0xff] %v3853_v59  ;;  %v896_v59 = vadd.f32 %v895_v21, %v881_v57  ;;  %v674_v57 = vadd.f32 %v673_v62, %v659_v20  ;;  %v637_v21 = vadd.f32 %v636_v48, %v3627_v14  ;;  %v661_v62 = vmul.f32 %v3635_v18, %v3635_v18  ;;  %v5441_v10 = vld [vmem:[#allocation73_spill] sm:$0xff] }
 0x11a   :  { %v192_v20 = vadd.f32 %v191_v3, %v3631_v16  ;;  %v439_v48 = vmul.f32 %v3647_v23, %v3647_v23  ;;  %v230_v49 = vadd.f32 %v229_v58, %v215_v55  ;;  %v453_v15 = vadd.f32 %v452_v63, %v438_v54 }
 0x11b   :  { %v897_v25 = vadd.f32 %v896_v59, %v882_v1  ;;  %v884_v59 = vmul.f32 %v3637_v19, %v3637_v19  ;;  %v415_v1 = vadd.f32 %v414_v13, %v3633_v17  ;;  %v675_v0 = vadd.f32 %v674_v57, %v660_v50 }
 0x11c   :  { %v638_v7 = vadd.f32 %v637_v21, %v3635_v18  ;;  %v861_v3 = vadd.f32 %v860_v44, %v3637_v19  ;;  %v193_v13 = vadd.f32 %v192_v20, %v3645_v22  ;;  %v662_v50 = vmul.f32 %v3659_v26, %v3659_v26  ;;  %v5415_v18 = vld [vmem:[#allocation56_spill] sm:$0xff] }
 0x11d   :  { %v898_v33 = vadd.f32 %v897_v25, %v883_v56  ;;  %v416_v14 = vadd.f32 %v415_v1, %v3647_v23  ;;  %v885_v56 = vmul.f32 %v3661_v27, %v3661_v27  ;;  %v676_v57 = vadd.f32 %v675_v0, %v661_v62  ;;  %v5440_v22 = vld [vmem:[#allocation68_spill] sm:$0xff] }
 0x11e   :  { %v3883_v9 = vpop.f32.mrf.mxu2  ;;  %v3893_v8 = vpop.f32.mrf.mxu0  ;;  %v217_v55 = vmul.f32 %v3663_v28, %v3663_v28  ;;  %v440_v54 = vmul.f32 %v3665_v29, %v3665_v29  ;;  %v231_v58 = vadd.f32 %v230_v49, %v216_v32  ;;  %v454_v63 = vadd.f32 %v453_v15, %v439_v48 }
 0x11f   :  { %5407 = vst [vmem:[#allocation77_spill] sm:$0xff] %v3883_v9  ;;  %v3885_v45 = vpop.f32.mrf.mxu3  ;;  %v3895_v36 = vpop.f32.mrf.mxu1  ;;  %v899_v25 = vadd.f32 %v898_v33, %v884_v59  ;;  %v639_v21 = vadd.f32 %v638_v7, %v3659_v26  ;;  %v862_v44 = vadd.f32 %v861_v3, %v3661_v27  ;;  %v663_v20 = vmul.f32 %v3667_v30, %v3667_v30 }
 0x120   :  { %5408 = vst [vmem:[#allocation78_spill] sm:$0xff] %v3885_v45  ;;  %v886_v1 = vmul.f32 %v3669_v31, %v3669_v31  ;;  %v194_v62 = vadd.f32 %v193_v13, %v3663_v28  ;;  %v417_v59 = vadd.f32 %v416_v14, %v3665_v29  ;;  %v677_v0 = vadd.f32 %v676_v57, %v662_v50 }
 0x121   :  { %5409 = vst [vmem:[#allocation79_spill] sm:$0xff] %v3895_v36  ;;  %v900_v33 = vadd.f32 %v899_v25, %v885_v56  ;;  %v218_v32 = vmul.f32 %v3677_v34, %v3677_v34  ;;  %v441_v7 = vmul.f32 %v3679_v35, %v3679_v35  ;;  %v232_v49 = vadd.f32 %v231_v58, %v217_v55 }
 0x122   :  { %v455_v3 = vadd.f32 %v454_v63, %v440_v54  ;;  %v640_v27 = vadd.f32 %v639_v21, %v3667_v30  ;;  %v863_v13 = vadd.f32 %v862_v44, %v3669_v31  ;;  %v195_v50 = vadd.f32 %v194_v62, %v3677_v34 }
 0x123   :  { %v418_v56 = vadd.f32 %v417_v59, %v3679_v35  ;;  %v664_v57 = vmul.f32 %v3691_v38, %v3691_v38  ;;  %v887_v25 = vmul.f32 %v3693_v39, %v3693_v39  ;;  %v678_v55 = vadd.f32 %v677_v0, %v663_v20  ;;  %v5427_v35 = vld [vmem:[#allocation58_spill] sm:$0xff] }
 0x124   :  { %v901_v54 = vadd.f32 %v900_v33, %v886_v1  ;;  %v219_v58 = vmul.f32 %v3695_v40, %v3695_v40  ;;  %v442_v63 = vmul.f32 %v3697_v41, %v3697_v41  ;;  %v233_v21 = vadd.f32 %v232_v49, %v218_v32 }
 0x125   :  { %v456_v44 = vadd.f32 %v455_v3, %v441_v7  ;;  %v641_v62 = vadd.f32 %v640_v27, %v3691_v38  ;;  %v864_v59 = vadd.f32 %v863_v13, %v3693_v39  ;;  %v196_v31 = vadd.f32 %v195_v50, %v3695_v40  ;;  %v5414_v39 = vld [vmem:[#allocation53_spill] sm:$0xff] }
 0x126   :  { %v3925_v15 = vpop.f32.mrf.mxu2  ;;  %v3931_v19 = vpop.f32.mrf.mxu0  ;;  %v419_v30 = vadd.f32 %v418_v56, %v3697_v41  ;;  %v665_v20 = vmul.f32 %v3699_v42, %v3699_v42  ;;  %v888_v1 = vmul.f32 %v3701_v43, %v3701_v43  ;;  %v679_v0 = vadd.f32 %v678_v55, %v664_v57 }
 0x127   :  { %5410 = vst [vmem:[#allocation80_spill] sm:$0xff] %v3925_v15  ;;  %v3927_v48 = vpop.f32.mrf.mxu3  ;;  %v3933_v14 = vpop.f32.mrf.mxu1  ;;  %v902_v33 = vadd.f32 %v901_v54, %v887_v25  ;;  %v220_v32 = vmul.f32 %v3709_v46, %v3709_v46  ;;  %v443_v27 = vmul.f32 %v3711_v47, %v3711_v47  ;;  %v234_v7 = vadd.f32 %v233_v21, %v219_v58 }
 0x128   :  { %5411 = vst [vmem:[#allocation81_spill] sm:$0xff] %v3927_v48  ;;  %v457_v49 = vadd.f32 %v456_v44, %v442_v63  ;;  %v642_v3 = vadd.f32 %v641_v62, %v3699_v42  ;;  %v865_v13 = vadd.f32 %v864_v59, %v3701_v43  ;;  %v197_v50 = vadd.f32 %v196_v31, %v3709_v46 }
 0x129   :  { %v420_v56 = vadd.f32 %v419_v30, %v3711_v47  ;;  %v221_v57 = vmul.f32 %v3727_v60, %v3727_v60  ;;  %v444_v25 = vmul.f32 %v3729_v61, %v3729_v61  ;;  %v680_v58 = vadd.f32 %v679_v0, %v665_v20 }
 0x12a   :  { %v903_v63 = vadd.f32 %v902_v33, %v888_v1  ;;  %v666_v21 = vmul.f32 %v3723_v52, %v3723_v52  ;;  %v889_v31 = vmul.f32 %v3725_v53, %v3725_v53  ;;  %v235_v62 = vadd.f32 %v234_v7, %v220_v32 }
 0x12b   :  { %v458_v59 = vadd.f32 %v457_v49, %v443_v27  ;;  %v222_v43 = vmul.f32 %v3741_v12, %v3741_v12  ;;  %v445_v42 = vmul.f32 %v5414_v39, %v5414_v39  ;;  %v643_v20 = vadd.f32 %v642_v3, %v3723_v52  ;;  %v5416_v27 = vld [vmem:[#allocation57_spill] sm:$0xff]  ;;  %v5417_v52 = vld [vmem:[#allocation50_spill] sm:$0xff] }
 0x12c   :  { %v866_v1 = vadd.f32 %v865_v13, %v3725_v53  ;;  %v198_v0 = vadd.f32 %v197_v50, %v3727_v60  ;;  %v421_v33 = vadd.f32 %v420_v56, %v3729_v61  ;;  %v236_v38 = vadd.f32 %v235_v62, %v221_v57 }
 0x12d   :  { %v459_v26 = vadd.f32 %v458_v59, %v444_v25  ;;  %v223_v32 = vmul.f32 %v5415_v18, %v5415_v18  ;;  %v446_v7 = vmul.f32 %v5416_v27, %v5416_v27  ;;  %v681_v49 = vadd.f32 %v680_v58, %v666_v21  ;;  %v5418_v59 = vld [vmem:[#allocation60_spill] sm:$0xff]  ;;  %v5419_v58 = vld [vmem:[#allocation61_spill] sm:$0xff]  ;;  %v5420_v21 = vld [vmem:[#allocation51_spill] sm:$0xff] }
 0x12e   :  { %v3965_v55 = vpop.f32.mrf.mxu2  ;;  %v3973_v44 = vpop.f32.mrf.mxu0  ;;  %v904_v6 = vadd.f32 %v903_v63, %v889_v31  ;;  %v199_v2 = vadd.f32 %v198_v0, %v3741_v12  ;;  %v422_v3 = vadd.f32 %v421_v33, %v5414_v39  ;;  %v644_v13 = vadd.f32 %v643_v20, %v5417_v52 }
 0x12f   :  { %5412 = vst [vmem:[#allocation82_spill] sm:$0xff] %v3965_v55  ;;  %v3967_v54 = vpop.f32.mrf.mxu3  ;;  %v3975_v30 = vpop.f32.mrf.mxu1  ;;  %v667_v50 = vmul.f32 %v5417_v52, %v5417_v52  ;;  %v237_v56 = vadd.f32 %v236_v38, %v222_v43  ;;  %v460_v57 = vadd.f32 %v459_v26, %v445_v42  ;;  %v224_v53 = vmul.f32 %v5418_v59, %v5418_v59  ;;  %v5423_v42 = vld [vmem:[#allocation64_spill] sm:$0xff] }
 0x130   :  { %5413 = vst [vmem:[#allocation83_spill] sm:$0xff] %v3967_v54  ;;  %v200_v25 = vadd.f32 %v199_v2, %v5415_v18  ;;  %v423_v62 = vadd.f32 %v422_v3, %v5416_v27  ;;  %v447_v63 = vmul.f32 %v5419_v58, %v5419_v58  ;;  %v867_v31 = vadd.f32 %v866_v1, %v5420_v21  ;;  %v5424_v3 = vld [vmem:[#allocation65_spill] sm:$0xff] }
 0x131   :  { %v890_v20 = vmul.f32 %v5420_v21, %v5420_v21  ;;  %v238_v0 = vadd.f32 %v237_v56, %v223_v32  ;;  %v461_v33 = vadd.f32 %v460_v57, %v446_v7  ;;  %v225_v43 = vmul.f32 %v5423_v42, %v5423_v42  ;;  %v5425_v7 = vld [vmem:[#allocation54_spill] sm:$0xff]  ;;  %v5426_v21 = vld [vmem:[#allocation55_spill] sm:$0xff] }
 0x132   :  { %v201_v2 = vadd.f32 %v200_v25, %v5418_v59  ;;  %v424_v38 = vadd.f32 %v423_v62, %v5419_v58  ;;  %v448_v27 = vmul.f32 %v5424_v3, %v5424_v3  ;;  %v682_v32 = vadd.f32 %v681_v49, %v667_v50  ;;  %v5428_v50 = vld [vmem:[#allocation59_spill] sm:$0xff] }
 0x133   :  { %v645_v56 = vadd.f32 %v644_v13, %v5425_v7  ;;  %v668_v57 = vmul.f32 %v5425_v7, %v5425_v7  ;;  %v891_v25 = vmul.f32 %v5426_v21, %v5426_v21  ;;  %v239_v62 = vadd.f32 %v238_v0, %v224_v53 }
 0x134   :  { %v462_v58 = vadd.f32 %v461_v33, %v447_v63  ;;  %v202_v61 = vadd.f32 %v201_v2, %v5423_v42  ;;  %v425_v47 = vadd.f32 %v424_v38, %v5424_v3  ;;  %v905_v41 = vadd.f32 %v904_v6, %v890_v20  ;;  %v5429_v63 = vld [vmem:[#allocation62_spill] sm:$0xff]  ;;  %v5430_v20 = vld [vmem:[#allocation63_spill] sm:$0xff] }
 0x135   :  { %v646_v29 = vadd.f32 %v645_v56, %v5427_v35  ;;  %v669_v49 = vmul.f32 %v5427_v35, %v5427_v35  ;;  %v892_v13 = vmul.f32 %v5428_v50, %v5428_v50  ;;  %v868_v7 = vadd.f32 %v867_v31, %v5426_v21 }
 0x136   :  { %v4003_v52 = vpop.f32.mrf.mxu2  ;;  %v4013_v1 = vpop.f32.mrf.mxu0  ;;  %v240_v23 = vadd.f32 %v239_v62, %v225_v43  ;;  %v463_v17 = vadd.f32 %v462_v58, %v448_v27  ;;  %v683_v11 = vadd.f32 %v682_v32, %v668_v57  ;;  %v906_v53 = vadd.f32 %v905_v41, %v891_v25 }
 0x137   :  { %5421 = vst [vmem:[#allocation84_spill] sm:$0xff] %v4003_v52  ;;  %v4005_v26 = vpop.f32.mrf.mxu3  ;;  %v4015_v39 = vpop.f32.mrf.mxu1  ;;  %v647_v0 = vadd.f32 %v646_v29, %v5429_v63  ;;  %v670_v33 = vmul.f32 %v5429_v63, %v5429_v63  ;;  %v869_v6 = vadd.f32 %v868_v7, %v5428_v50  ;;  %v893_v2 = vmul.f32 %v5430_v20, %v5430_v20  ;;  %v5434_v7 = vld [vmem:[#allocation67_spill] sm:$0xff] }
 0x138   :  { %5422 = vst [vmem:[#allocation85_spill] sm:$0xff] %v4005_v26  ;;  %v203_v38 = vrot.slane %v202_v61, 4  ;;  %v426_v56 = vrot.slane %v425_v47, 4  ;;  %v684_v35 = vadd.f32 %v683_v11, %v669_v49  ;;  %v907_v3 = vadd.f32 %v906_v53, %v892_v13 }
 0x139   :  { %v648_v31 = vadd.f32 %v647_v0, %v5431_v5  ;;  %v671_v27 = vmul.f32 %v5431_v5, %v5431_v5  ;;  %v870_v58 = vadd.f32 %v869_v6, %v5430_v20  ;;  %v241_v43 = vrot.slane %v240_v23, 4 }
 0x13a   :  { %v464_v32 = vrot.slane %v463_v17, 4  ;;  %v894_v57 = vmul.f32 %v5434_v7, %v5434_v7  ;;  %v685_v62 = vadd.f32 %v684_v35, %v670_v33  ;;  %v908_v49 = vadd.f32 %v907_v3, %v893_v2 }
 0x13b   :  { %v204_v13 = vadd.f32 %v203_v38, %v202_v61  ;;  %v427_v53 = vadd.f32 %v426_v56, %v425_v47  ;;  %v871_v0 = vadd.f32 %v870_v58, %v5434_v7  ;;  %v649_v50 = vrot.slane %v648_v31, 4 }
 0x13c   :  { %v686_v21 = vadd.f32 %v685_v62, %v671_v27  ;;  %v242_v5 = vadd.f32 %v241_v43, %v240_v23  ;;  %v465_v63 = vadd.f32 %v464_v32, %v463_v17  ;;  %v909_v6 = vadd.f32 %v908_v49, %v894_v57 }
 0x13d   :  { %v205_v20 = vrot.slane %v204_v13, 2  ;;  %v428_v42 = vrot.slane %v427_v53, 2  ;;  %v872_v59 = vrot.slane %v871_v0, 4  ;;  %v650_v18 = vadd.f32 %v649_v50, %v648_v31 }
 0x13e   :  { %v4039_v41 = vpop.f32.mrf.mxu2  ;;  %v4046_v25 = vpop.f32.mrf.mxu0  ;;  %v687_v12 = vrot.slane %v686_v21, 4  ;;  %v243_v35 = vrot.slane %v242_v5, 2  ;;  %v466_v3 = vrot.slane %v465_v63, 2  ;;  %v910_v61 = vrot.slane %v909_v6, 4 }
 0x13f   :  { %5432 = vst [vmem:[#allocation86_spill] sm:$0xff] %v4039_v41  ;;  %v4041_v29 = vpop.f32.mrf.mxu3  ;;  %v4048_v11 = vpop.f32.mrf.mxu1  ;;  %v206_v2 = vadd.f32 %v205_v20, %v204_v13  ;;  %v429_v23 = vadd.f32 %v428_v42, %v427_v53  ;;  %v873_v17 = vadd.f32 %v872_v59, %v871_v0  ;;  %v651_v38 = vrot.slane %v650_v18, 2 }
 0x140   :  { %5433 = vst [vmem:[#allocation87_spill] sm:$0xff] %v4041_v29  ;;  %v688_v56 = vadd.f32 %v687_v12, %v686_v21  ;;  %v244_v27 = vadd.f32 %v243_v35, %v242_v5  ;;  %v467_v58 = vadd.f32 %v466_v3, %v465_v63  ;;  %v911_v50 = vadd.f32 %v910_v61, %v909_v6  ;;  %v5439_v35 = vld [vmem:[#allocation72_spill] sm:$0xff] }
 0x141   :  { %v207_v31 = vrot.slane %v206_v2, 1  ;;  %v430_v43 = vrot.slane %v429_v23, 1  ;;  %v874_v32 = vrot.slane %v873_v17, 2  ;;  %v652_v57 = vadd.f32 %v651_v38, %v650_v18 }
 0x142   :  { %v689_v62 = vrot.slane %v688_v56, 2  ;;  %v245_v40 = vrot.slane %v244_v27, 1  ;;  %v468_v34 = vrot.slane %v467_v58, 1  ;;  %v912_v28 = vrot.slane %v911_v50, 2 }
 0x143   :  { %v208_v12 = vadd.f32 %v207_v31, %v206_v2  ;;  %v431_v5 = vadd.f32 %v430_v43, %v429_v23  ;;  %v875_v21 = vadd.f32 %v874_v32, %v873_v17  ;;  %v653_v42 = vrot.slane %v652_v57, 1  ;;  %v5448_v43 = vld [vmem:[#allocation71_spill] sm:$0xff] }
 0x144   :  { %v690_v63 = vadd.f32 %v689_v62, %v688_v56  ;;  %v246_v13 = vadd.f32 %v245_v40, %v244_v27  ;;  %v469_v53 = vadd.f32 %v468_v34, %v467_v58  ;;  %v913_v18 = vadd.f32 %v912_v28, %v911_v50  ;;  %v5445_v34 = vld [vmem:[#allocation69_spill] sm:$0xff]  ;;  %v5446_v27 = vld [vmem:[#allocation70_spill] sm:$0xff] }
 0x145   :  { %v432_v0 = vadd.f32 %v431_v5, %v208_v12  ;;  %v876_v6 = vrot.slane %v875_v21, 1  ;;  %v1103_v3 = vmul.f32 %v5439_v35, %v5439_v35  ;;  %v654_v61 = vadd.f32 %v653_v42, %v652_v57 }
 0x146   :  { %v4051_v60 = vpop.f32.mrf.mxu2  ;;  %v4055_v47 = vpop.f32.mrf.mxu0  ;;  %v691_v38 = vrot.slane %v690_v63, 1  ;;  %v1102_v16 = vmul.f32 %v5440_v22, %v5440_v22  ;;  %v1326_v2 = vmul.f32 %v5441_v10, %v5441_v10  ;;  %v4077_v40 = vadd.f32 %v469_v53, %v246_v13  ;;  %v5449_v53 = vld [vmem:[#allocation76_spill] sm:$0xff] }
 0x147   :  { %5435 = vst [vmem:[#allocation88_spill] sm:$0xff] %v4051_v60  ;;  %v4053_v46 = vpop.f32.mrf.mxu3  ;;  %v4057_v33 = vpop.f32.mrf.mxu1  ;;  %v914_v28 = vrot.slane %v913_v18, 1  ;;  %v1325_v56 = vmul.f32 %v5445_v34, %v5445_v34  ;;  %v1548_v58 = vmul.f32 %v5446_v27, %v5446_v27  ;;  %v1771_v32 = vmul.f32 %v5448_v43, %v5448_v43 }
 0x148   :  { %5436 = vst [vmem:[#allocation89_spill] sm:$0xff] %v4053_v46  ;;  %v1080_v57 = vadd.f32 %v5439_v35, %v5440_v22  ;;  %v1303_v62 = vadd.f32 %v5441_v10, %v5445_v34  ;;  %v1549_v12 = vmul.f32 %v3845_v51, %v3845_v51  ;;  %v4095_v5 = vadd.f32 %v876_v6, %v875_v21 }
 0x149   :  { %5444 = vst [vmem:[#allocation93_spill] sm:$0xff] %v4077_v40  ;;  %v1118_v42 = vadd.f32 %v1103_v3, %v1102_v16  ;;  %v1772_v13 = vmul.f32 %v3847_v24, %v3847_v24  ;;  %v1104_v4 = vmul.f32 %v5449_v53, %v5449_v53  ;;  %v4101_v40 = vadd.f32 %v654_v61, %v432_v0 }
 0x14a   :  { %v1341_v35 = vadd.f32 %v1326_v2, %v1325_v56  ;;  %v1327_v10 = vmul.f32 %v3855_v37, %v3855_v37  ;;  %v4107_v34 = vadd.f32 %v914_v28, %v913_v18  ;;  %v1526_v21 = vadd.f32 %v3845_v51, %v5446_v27 }
 0x14b   :  { %v1749_v16 = vadd.f32 %v3847_v24, %v5448_v43  ;;  %v1081_v6 = vadd.f32 %v1080_v57, %v5449_v53  ;;  %v1564_v3 = vadd.f32 %v1549_v12, %v1548_v58  ;;  %v1550_v0 = vmul.f32 %v3883_v9, %v3883_v9 }
 0x14c   :  { %v1105_v61 = vmul.f32 %v3893_v8, %v3893_v8  ;;  %v1787_v18 = vadd.f32 %v1772_v13, %v1771_v32  ;;  %v1304_v2 = vadd.f32 %v1303_v62, %v3855_v37  ;;  %v1328_v28 = vmul.f32 %v3895_v36, %v3895_v36 }
 0x14d   :  { %v1342_v56 = vadd.f32 %v1341_v35, %v1327_v10  ;;  %v1527_v57 = vadd.f32 %v1526_v21, %v3883_v9  ;;  %v1750_v58 = vadd.f32 %v1749_v16, %v3885_v45  ;;  %v1082_v12 = vadd.f32 %v1081_v6, %v3893_v8 }
 0x14e   :  { %v4059_v49 = vpop.f32.mrf.mxu2  ;;  %v4063_v20 = vpop.f32.mrf.mxu0  ;;  %v1305_v51 = vadd.f32 %v1304_v2, %v3895_v36  ;;  %v1774_v32 = vmul.f32 %v3927_v48, %v3927_v48  ;;  %v1106_v10 = vmul.f32 %v3931_v19, %v3931_v19  ;;  %v1329_v16 = vmul.f32 %v3933_v14, %v3933_v14 }
 0x14f   :  { %5437 = vst [vmem:[#allocation90_spill] sm:$0xff] %v4059_v49  ;;  %v4061_v7 = vpop.f32.mrf.mxu3  ;;  %v4065_v59 = vpop.f32.mrf.mxu1  ;;  %v1343_v6 = vadd.f32 %v1342_v56, %v1328_v28  ;;  %v1528_v2 = vadd.f32 %v1527_v57, %v3925_v15  ;;  %v1083_v9 = vadd.f32 %v1082_v12, %v3931_v19  ;;  %v1552_v36 = vmul.f32 %v3965_v55, %v3965_v55 }
 0x150   :  { %5438 = vst [vmem:[#allocation91_spill] sm:$0xff] %v4061_v7  ;;  %v1306_v27 = vadd.f32 %v1305_v51, %v3933_v14  ;;  %v1553_v12 = vmul.f32 %v4003_v52, %v4003_v52 }
 0x151   :  { %v1344_v28 = vadd.f32 %v1343_v6, %v1329_v16  ;;  %v1529_v56 = vadd.f32 %v1528_v2, %v3965_v55  ;;  %v1084_v57 = vadd.f32 %v1083_v9, %v3973_v44 }
 0x153   :  { %v1530_v16 = vadd.f32 %v1529_v56, %v4003_v52  ;;  %v1085_v2 = vadd.f32 %v1084_v57, %v4013_v1  ;;  %v1555_v52 = vmul.f32 %v4051_v60, %v4051_v60 }
 0x156   :  { %v4073_v23 = vpop.f32.mrf.mxu2  ;;  %v4083_v50 = vpop.f32.mrf.mxu0 }
 0x157   :  { %5442 = vst [vmem:[#allocation68_spill] sm:$0xff] %v4073_v23  ;;  %v4075_v17 = vpop.f32.mrf.mxu3  ;;  %v4085_v31 = vpop.f32.mrf.mxu1 }
 0x158   :  { %5443 = vst [vmem:[#allocation92_spill] sm:$0xff] %v4075_v17 }
 0x159   :  { %5447 = vst [vmem:[#allocation94_spill] sm:$0xff] %v4085_v31  ;;  %v4103_v31 = vadd.f32 %v691_v38, %v690_v63  ;;  %v1773_v63 = vmul.f32 %v3885_v45, %v3885_v45  ;;  %v1119_v38 = vadd.f32 %v1118_v42, %v1104_v4  ;;  %v1551_v4 = vmul.f32 %v3925_v15, %v3925_v15 }
 0x15a   :  { %v1565_v42 = vadd.f32 %v1564_v3, %v1550_v0  ;;  %v1751_v45 = vadd.f32 %v1750_v58, %v3927_v48  ;;  %v1775_v3 = vmul.f32 %v3967_v54, %v3967_v54  ;;  %v1107_v0 = vmul.f32 %v3973_v44, %v3973_v44 }
 0x15b   :  { %v1788_v13 = vadd.f32 %v1787_v18, %v1773_v63  ;;  %v1120_v21 = vadd.f32 %v1119_v38, %v1105_v61  ;;  %v1330_v38 = vmul.f32 %v3975_v30, %v3975_v30  ;;  %v1307_v58 = vadd.f32 %v1306_v27, %v3975_v30 }
 0x15c   :  { %v1566_v63 = vadd.f32 %v1565_v42, %v1551_v4  ;;  %v1752_v51 = vadd.f32 %v1751_v45, %v3967_v54  ;;  %v1776_v4 = vmul.f32 %v4005_v26, %v4005_v26 }
 0x15d   :  { %v1789_v61 = vadd.f32 %v1788_v13, %v1774_v32  ;;  %v1121_v18 = vadd.f32 %v1120_v21, %v1106_v10  ;;  %v1108_v32 = vmul.f32 %v4013_v1, %v4013_v1  ;;  %v1331_v21 = vmul.f32 %v4015_v39, %v4015_v39 }
 0x15e   :  { %v4126_v24 = vpop.f32.mrf.mxu2  ;;  %v4137_v35 = vpop.f32.mrf.mxu0  ;;  %v1567_v10 = vadd.f32 %v1566_v63, %v1552_v36  ;;  %v1345_v27 = vadd.f32 %v1344_v28, %v1330_v38  ;;  %v1753_v6 = vadd.f32 %v1752_v51, %v4005_v26  ;;  %v1308_v36 = vadd.f32 %v1307_v58, %v4015_v39 }
 0x15f   :  { %5450 = vst [vmem:[#allocation76_spill] sm:$0xff] %v4126_v24  ;;  %v4128_v43 = vpop.f32.mrf.mxu3  ;;  %v4139_v62 = vpop.f32.mrf.mxu1  ;;  %v1790_v42 = vadd.f32 %v1789_v61, %v1775_v3  ;;  %v1122_v13 = vadd.f32 %v1121_v18, %v1107_v0  ;;  %v1554_v3 = vmul.f32 %v4039_v41, %v4039_v41  ;;  %v1777_v0 = vmul.f32 %v4041_v29, %v4041_v29 }
 0x160   :  { %5451 = vst [vmem:[#allocation95_spill] sm:$0xff] %v4128_v43  ;;  %v1109_v63 = vmul.f32 %v4046_v25, %v4046_v25  ;;  %v1568_v61 = vadd.f32 %v1567_v10, %v1553_v12  ;;  %v1332_v28 = vmul.f32 %v4048_v11, %v4048_v11  ;;  %v1346_v56 = vadd.f32 %v1345_v27, %v1331_v21 }
 0x161   :  { %v1791_v18 = vadd.f32 %v1790_v42, %v1776_v4  ;;  %v1123_v38 = vadd.f32 %v1122_v13, %v1108_v32  ;;  %v1531_v51 = vadd.f32 %v1530_v16, %v4039_v41  ;;  %v1754_v57 = vadd.f32 %v1753_v6, %v4041_v29 }
 0x162   :  { %v1086_v58 = vadd.f32 %v1085_v2, %v4046_v25  ;;  %v1309_v26 = vadd.f32 %v1308_v36, %v4048_v11  ;;  %v1778_v12 = vmul.f32 %v4053_v46, %v4053_v46  ;;  %v1110_v4 = vmul.f32 %v4055_v47, %v4055_v47 }
 0x163   :  { %v1569_v32 = vadd.f32 %v1568_v61, %v1554_v3  ;;  %v1792_v10 = vadd.f32 %v1791_v18, %v1777_v0  ;;  %v1124_v42 = vadd.f32 %v1123_v38, %v1109_v63  ;;  %v1333_v13 = vmul.f32 %v4057_v33, %v4057_v33 }
 0x164   :  { %v1347_v21 = vadd.f32 %v1346_v56, %v1332_v28  ;;  %v1532_v27 = vadd.f32 %v1531_v51, %v4051_v60  ;;  %v1755_v16 = vadd.f32 %v1754_v57, %v4053_v46  ;;  %v1556_v6 = vmul.f32 %v4059_v49, %v4059_v49 }
 0x165   :  { %v1087_v2 = vadd.f32 %v1086_v58, %v4055_v47  ;;  %v1310_v36 = vadd.f32 %v1309_v26, %v4057_v33  ;;  %v1779_v3 = vmul.f32 %v4061_v7, %v4061_v7  ;;  %v1111_v0 = vmul.f32 %v4063_v20, %v4063_v20 }
 0x166   :  { %v4167_v45 = vpop.f32.mrf.mxu2  ;;  %v4174_v54 = vpop.f32.mrf.mxu0  ;;  %v1570_v18 = vadd.f32 %v1569_v32, %v1555_v52  ;;  %v1793_v38 = vadd.f32 %v1792_v10, %v1778_v12  ;;  %v1125_v28 = vadd.f32 %v1124_v42, %v1110_v4  ;;  %v1334_v56 = vmul.f32 %v4065_v59, %v4065_v59  ;;  %v5457_v42 = vld [vmem:[#allocation94_spill] sm:$0xff] }
 0x167   :  { %5452 = vst [vmem:[#allocation96_spill] sm:$0xff] %v4167_v45  ;;  %v4169_v9 = vpop.f32.mrf.mxu3  ;;  %v4176_v48 = vpop.f32.mrf.mxu1  ;;  %v1348_v26 = vadd.f32 %v1347_v21, %v1333_v13  ;;  %v1533_v58 = vadd.f32 %v1532_v27, %v4059_v49  ;;  %v1756_v46 = vadd.f32 %v1755_v16, %v4061_v7  ;;  %v1088_v29 = vadd.f32 %v1087_v2, %v4063_v20 }
 0x168   :  { %5453 = vst [vmem:[#allocation97_spill] sm:$0xff] %v4169_v9  ;;  %v1571_v60 = vadd.f32 %v1570_v18, %v1556_v6  ;;  %v1311_v41 = vadd.f32 %v1310_v36, %v4065_v59  ;;  %v1557_v52 = vmul.f32 %v4073_v23, %v4073_v23  ;;  %v1780_v12 = vmul.f32 %v4075_v17, %v4075_v17 }
 0x169   :  { %v1794_v4 = vadd.f32 %v1793_v38, %v1779_v3  ;;  %v1126_v32 = vadd.f32 %v1125_v28, %v1111_v0  ;;  %v1112_v10 = vmul.f32 %v4083_v50, %v4083_v50  ;;  %v1335_v13 = vmul.f32 %v5457_v42, %v5457_v42 }
 0x16a   :  { %v1349_v21 = vadd.f32 %v1348_v26, %v1334_v56  ;;  %v1534_v27 = vadd.f32 %v1533_v58, %v4073_v23  ;;  %v1757_v16 = vadd.f32 %v1756_v46, %v4075_v17  ;;  %v1089_v6 = vadd.f32 %v1088_v29, %v4083_v50 }
 0x16b   :  { %v1312_v2 = vadd.f32 %v1311_v41, %v5457_v42  ;;  %v1558_v36 = vmul.f32 %v4126_v24, %v4126_v24  ;;  %v1781_v3 = vmul.f32 %v4128_v43, %v4128_v43  ;;  %v3340_v0 = vmov 0.0  }
 0x16c   :  { %22 = vst [vmem:[#allocation2] sm:$0x1] %v3340_v0  ;;  %v1572_v18 = vadd.f32 %v1571_v60, %v1557_v52  ;;  %v1795_v38 = vadd.f32 %v1794_v4, %v1780_v12  ;;  %v1113_v28 = vmul.f32 %v4137_v35, %v4137_v35  ;;  %v1336_v46 = vmul.f32 %v4139_v62, %v4139_v62 }
 0x16d   :  { %23 = vst [vmem:[#allocation3] sm:$0x1] %v3340_v0  ;;  %v1127_v29 = vadd.f32 %v1126_v32, %v1112_v10  ;;  %v1350_v56 = vadd.f32 %v1349_v21, %v1335_v13  ;;  %v1535_v41 = vadd.f32 %v1534_v27, %v4126_v24  ;;  %v1758_v26 = vadd.f32 %v1757_v16, %v4128_v43 }
 0x16e   :  { %v4209_v63 = vpop.f32.mrf.mxu2  ;;  %v4215_v51 = vpop.f32.mrf.mxu0  ;;  %v1090_v60 = vadd.f32 %v1089_v6, %v4137_v35  ;;  %v1313_v52 = vadd.f32 %v1312_v2, %v4139_v62  ;;  %v1114_v12 = vmul.f32 %v4174_v54, %v4174_v54  ;;  %v1337_v4 = vmul.f32 %v4176_v48, %v4176_v48 }
 0x16f   :  { %5454 = vst [vmem:[#allocation98_spill] sm:$0xff] %v4209_v63  ;;  %v4211_v61 = vpop.f32.mrf.mxu3  ;;  %v4217_v57 = vpop.f32.mrf.mxu1  ;;  %v1573_v13 = vadd.f32 %v1572_v18, %v1558_v36  ;;  %v1796_v21 = vadd.f32 %v1795_v38, %v1781_v3  ;;  %v1559_v27 = vmul.f32 %v4167_v45, %v4167_v45  ;;  %v1782_v16 = vmul.f32 %v4169_v9, %v4169_v9 }
 0x170   :  { %5455 = vst [vmem:[#allocation99_spill] sm:$0xff] %v4211_v61  ;;  %v1128_v6 = vadd.f32 %v1127_v29, %v1113_v28  ;;  %v1351_v2 = vadd.f32 %v1350_v56, %v1336_v46  ;;  %v1115_v0 = vmul.f32 %v4215_v51, %v4215_v51  ;;  %v1338_v43 = vmul.f32 %v4217_v57, %v4217_v57 }
 0x171   :  { %5456 = vst [vmem:[#allocation100_spill] sm:$0xff] %v4217_v57  ;;  %v1536_v7 = vadd.f32 %v1535_v41, %v4167_v45  ;;  %v1759_v24 = vadd.f32 %v1758_v26, %v4169_v9  ;;  %v1091_v36 = vadd.f32 %v1090_v60, %v4174_v54  ;;  %v1314_v3 = vadd.f32 %v1313_v52, %v4176_v48 }
 0x172   :  { %v1129_v18 = vadd.f32 %v1128_v6, %v1114_v12  ;;  %v1352_v38 = vadd.f32 %v1351_v2, %v1337_v4  ;;  %v1574_v29 = vadd.f32 %v1573_v13, %v1559_v27  ;;  %v1797_v56 = vadd.f32 %v1796_v21, %v1782_v16 }
 0x173   :  { %v1092_v23 = vadd.f32 %v1091_v36, %v4215_v51  ;;  %v1315_v41 = vadd.f32 %v1314_v3, %v4217_v57  ;;  %v1560_v26 = vmul.f32 %v4209_v63, %v4209_v63  ;;  %v1783_v60 = vmul.f32 %v4211_v61, %v4211_v61 }
 0x174   :  { %v1130_v52 = vadd.f32 %v1129_v18, %v1115_v0  ;;  %v1353_v12 = vadd.f32 %v1352_v38, %v1338_v43  ;;  %v1537_v4 = vadd.f32 %v1536_v7, %v4209_v63  ;;  %v1760_v6 = vadd.f32 %v1759_v24, %v4211_v61 }
 0x175   :  { %v1798_v61 = vadd.f32 %v1797_v56, %v1783_v60 }
 0x176   :  { %v4245_v58 = vpop.f32.mrf.mxu2  ;;  %v4255_v32 = vpop.f32.mrf.mxu0 }
 0x177   :  { %v4247_v17 = vpop.f32.mrf.mxu3  ;;  %v4257_v10 = vpop.f32.mrf.mxu1  ;;  %v1116_v28 = vmul.f32 %v4255_v32, %v4255_v32  ;;  %v1093_v2 = vadd.f32 %v1092_v23, %v4255_v32  ;;  %v1561_v16 = vmul.f32 %v4245_v58, %v4245_v58  ;;  %v1538_v63 = vadd.f32 %v1537_v4, %v4245_v58 }
 0x178   :  { %5458 = vst [vmem:[#allocation94_spill] sm:$0xff] %v4257_v10  ;;  %v1339_v46 = vmul.f32 %v4257_v10, %v4257_v10  ;;  %v1316_v13 = vadd.f32 %v1315_v41, %v4257_v10  ;;  %v1784_v36 = vmul.f32 %v4247_v17, %v4247_v17  ;;  %v1575_v41 = vadd.f32 %v1574_v29, %v1560_v26 }
 0x179   :  { %v1131_v0 = vadd.f32 %v1130_v52, %v1116_v28 }
 0x17a   :  { %v1354_v43 = vadd.f32 %v1353_v12, %v1339_v46  ;;  %v1576_v45 = vadd.f32 %v1575_v41, %v1561_v16  ;;  %v1799_v49 = vadd.f32 %v1798_v61, %v1784_v36 }
 0x17e   :  { %v4285_v21 = vpop.f32.mrf.mxu2  ;;  %v4293_v3 = vpop.f32.mrf.mxu0 }
 0x17f   :  { %v4287_v27 = vpop.f32.mrf.mxu3  ;;  %v4295_v7 = vpop.f32.mrf.mxu1  ;;  %v1094_v24 = vadd.f32 %v1093_v2, %v4293_v3  ;;  %v1117_v23 = vmul.f32 %v4293_v3, %v4293_v3  ;;  %v1562_v28 = vmul.f32 %v4285_v21, %v4285_v21  ;;  %v1539_v26 = vadd.f32 %v1538_v63, %v4285_v21 }
 0x180   :  { %5459 = vst [vmem:[#allocation101_spill] sm:$0xff] %v4287_v27  ;;  %v1317_v18 = vadd.f32 %v1316_v13, %v4295_v7  ;;  %v1340_v38 = vmul.f32 %v4295_v7, %v4295_v7  ;;  %v1785_v46 = vmul.f32 %v4287_v27, %v4287_v27  ;;  %v1761_v13 = vadd.f32 %v1760_v6, %v4247_v17 }
 0x181   :  { %5460 = vst [vmem:[#allocation102_spill] sm:$0xff] %v4295_v7  ;;  %v1095_v52 = vrot.slane %v1094_v24, 4  ;;  %v1132_v12 = vadd.f32 %v1131_v0, %v1117_v23  ;;  %v1577_v60 = vadd.f32 %v1576_v45, %v1562_v28  ;;  %v5462_v28 = vld [vmem:[#allocation93_spill] sm:$0xff] }
 0x182   :  { %v1318_v9 = vrot.slane %v1317_v18, 4  ;;  %v1355_v2 = vadd.f32 %v1354_v43, %v1340_v38  ;;  %v1762_v7 = vadd.f32 %v1761_v13, %v4287_v27  ;;  %v1800_v10 = vadd.f32 %v1799_v49, %v1785_v46 }
 0x183   :  { %v1096_v55 = vadd.f32 %v1095_v52, %v1094_v24  ;;  %v1133_v15 = vrot.slane %v1132_v12, 4  ;;  %v693_v46 = vadd.f32 %v4103_v31, %v5462_v28 }
 0x184   :  { %v1319_v29 = vadd.f32 %v1318_v9, %v1317_v18  ;;  %v1356_v56 = vrot.slane %v1355_v2, 4 }
 0x185   :  { %v1097_v57 = vrot.slane %v1096_v55, 2  ;;  %v1134_v0 = vadd.f32 %v1133_v15, %v1132_v12 }
 0x186   :  { %v1320_v23 = vrot.slane %v1319_v29, 2  ;;  %v1357_v43 = vadd.f32 %v1356_v56, %v1355_v2  ;;  %v4311_v38 = vpop.f32.mrf.mxu2 }
 0x187   :  { %v4313_v4 = vpop.f32.mrf.mxu3  ;;  %v1540_v61 = vadd.f32 %v1539_v26, %v4311_v38  ;;  %v1563_v9 = vmul.f32 %v4311_v38, %v4311_v38  ;;  %v1098_v63 = vadd.f32 %v1097_v57, %v1096_v55  ;;  %v1135_v49 = vrot.slane %v1134_v0, 2 }
 0x188   :  { %5461 = vst [vmem:[#allocation103_spill] sm:$0xff] %v4313_v4  ;;  %v1763_v6 = vadd.f32 %v1762_v7, %v4313_v4  ;;  %v1786_v45 = vmul.f32 %v4313_v4, %v4313_v4  ;;  %v1321_v16 = vadd.f32 %v1320_v23, %v1319_v29  ;;  %v1358_v15 = vrot.slane %v1357_v43, 2 }
 0x189   :  { %v1541_v36 = vrot.slane %v1540_v61, 4  ;;  %v1578_v24 = vadd.f32 %v1577_v60, %v1563_v9  ;;  %v1099_v52 = vrot.slane %v1098_v63, 1  ;;  %v1136_v12 = vadd.f32 %v1135_v49, %v1134_v0 }
 0x18a   :  { %v1764_v18 = vrot.slane %v1763_v6, 4  ;;  %v1801_v41 = vadd.f32 %v1800_v10, %v1786_v45  ;;  %v1359_v2 = vadd.f32 %v1358_v15, %v1357_v43  ;;  %v878_v55 = vadd.f32 %v4095_v5, %v4101_v40 }
 0x18b   :  { %v1542_v13 = vadd.f32 %v1541_v36, %v1540_v61  ;;  %v1579_v56 = vrot.slane %v1578_v24, 4  ;;  %v1100_v57 = vadd.f32 %v1099_v52, %v1098_v63  ;;  %v1137_v29 = vrot.slane %v1136_v12, 1 }
 0x18c   :  { %v1765_v7 = vadd.f32 %v1764_v18, %v1763_v6  ;;  %v1802_v26 = vrot.slane %v1801_v41, 4  ;;  %v1322_v23 = vrot.slane %v1321_v16, 1  ;;  %v916_v45 = vadd.f32 %v4107_v34, %v693_v46 }
 0x18d   :  { %v1543_v4 = vrot.slane %v1542_v13, 2  ;;  %v1580_v60 = vadd.f32 %v1579_v56, %v1578_v24  ;;  %v1101_v31 = vadd.f32 %v1100_v57, %v878_v55  ;;  %v1138_v28 = vadd.f32 %v1137_v29, %v1136_v12  ;;  %v1809_v55 = vld [vmem:[#allocation2] sm:$0x1]  ;;  %v1812_v57 = vld [vmem:[#allocation3] sm:$0x1] }
 0x18e   :  { %v1766_v9 = vrot.slane %v1765_v7, 2  ;;  %v1803_v10 = vadd.f32 %v1802_v26, %v1801_v41  ;;  %v1360_v0 = vrot.slane %v1359_v2, 1  ;;  %v1323_v36 = vadd.f32 %v1322_v23, %v1321_v16 }
 0x18f   :  { %v1544_v43 = vadd.f32 %v1543_v4, %v1542_v13  ;;  %v1581_v61 = vrot.slane %v1580_v60, 2  ;;  %v1139_v15 = vadd.f32 %v1138_v28, %v916_v45 }
 0x190   :  { %v1767_v49 = vadd.f32 %v1766_v9, %v1765_v7  ;;  %v1804_v6 = vrot.slane %v1803_v10, 2  ;;  %v1361_v52 = vadd.f32 %v1360_v0, %v1359_v2  ;;  %v1324_v27 = vadd.f32 %v1323_v36, %v1101_v31 }
 0x191   :  { %v1545_v18 = vrot.slane %v1544_v43, 1  ;;  %v1582_v40 = vadd.f32 %v1581_v61, %v1580_v60 }
 0x192   :  { %v1768_v5 = vrot.slane %v1767_v49, 1  ;;  %v1805_v63 = vadd.f32 %v1804_v6, %v1803_v10  ;;  %v1362_v26 = vadd.f32 %v1361_v52, %v1139_v15 }
 0x193   :  { %v1546_v24 = vadd.f32 %v1545_v18, %v1544_v43  ;;  %v1583_v56 = vrot.slane %v1582_v40, 1 }
 0x194   :  { %v1806_v41 = vrot.slane %v1805_v63, 1  ;;  %v1769_v12 = vadd.f32 %v1768_v5, %v1767_v49  ;;  %v1831_v5 = vld [vmem:[%s5207_s2] sm:$0x1] }
 0x195   :  { %v1547_v34 = vadd.f32 %v1546_v24, %v1324_v27  ;;  %v1584_v46 = vadd.f32 %v1583_v56, %v1582_v40  ;;  %v1844_v56 = vld [vmem:[%s5208_s3] sm:$0x1] }
 0x196   :  { %v1807_v7 = vadd.f32 %v1806_v41, %v1805_v63 }
 0x197   :  { %v1585_v4 = vadd.f32 %v1584_v46, %v1362_v26  ;;  %v1770_v13 = vadd.f32 %v1769_v12, %v1547_v34  ;;  %v5463_v46 = vld [vmem:[#allocation4_spill] sm:$0xff] }
 0x199   :  { %v1808_v29 = vadd.f32 %v1807_v7, %v1585_v4  ;;  %v1810_v16 = vadd.f32 %v1809_v55, %v1770_v13  ;;  %v5464_v55 = vld [vmem:[#allocation8_spill] sm:$0xff] }
 0x19a   :  { %v5465_v13 = vld [vmem:[#allocation12_spill] sm:$0xff] }
 0x19b   :  { %1811 = vst [vmem:[#allocation2] sm:$0x1] %v1810_v16  ;;  %v1813_v23 = vadd.f32 %v1812_v57, %v1808_v29  ;;  %v5466_v57 = vld [vmem:[#allocation16_spill] sm:$0xff] }
 0x19d   :  { %1814 = vst [vmem:[#allocation3] sm:$0x1] %v1813_v23  ;;  %v5467_v23 = vld [vmem:[#allocation20_spill] sm:$0xff] }
 0x1a2   :  { %v1818_v60 = vld [vmem:[#allocation2] sm:$0x1] }
 0x1a3   :  { %1820 = vrot.lane.b32.xlu0 %v1818_v60, %s3341_s0 }
 0x1a4   :  { %v1819_v2 = vld [vmem:[#allocation3] sm:$0x1] }
 0x1ab   :  { %1823 = vrot.lane.b32.xlu0 %v1819_v2, %s3341_s0 }
 0x215   :  { %v1821_v9 = vpop.permute.xlu0 %1820 }
 0x216   :  { %v1822_v10 = vadd.f32 %v1821_v9, %v1818_v60 }
 0x218   :  { %v1826_v27 = vmul.f32 0.00048828125, %v1822_v10  ;;  %v5469_v10 = vld [vmem:[#allocation28_spill] sm:$0xff] }
 0x21a   :  { %v1828_v28 = vmul.f32 %v1826_v27, %v1826_v27 }
 0x21d   :  { %v1824_v45 = vpop.permute.xlu0 %1823 }
 0x21e   :  { %v1825_v31 = vadd.f32 %v1824_v45, %v1819_v2  ;;  %v5468_v2 = vld [vmem:[#allocation24_spill] sm:$0xff] }
 0x21f   :  { %v5470_v45 = vld [vmem:[#allocation32_spill] sm:$0xff] }
 0x220   :  { %v1827_v0 = vmul.f32 0.00048828125, %v1825_v31 }
 0x222   :  { %v1829_v43 = vsub.f32 %v1827_v0, %v1828_v28  ;;  %v5471_v28 = vld [vmem:[#allocation36_spill] sm:$0xff] }
 0x224   :  { %v1830_v61 = vmax.f32 %v1829_v43, 0.0  ;;  %v5472_v43 = vld [vmem:[#allocation40_spill] sm:$0xff] }
 0x226   :  { %v1832_v49 = vadd.f32 1e-05, %v1830_v61 }
 0x228   :  { %3338 = vrsqrt.f32 %v1832_v49  ;;  %vm1839_vm2 = vweird.f32 %v1832_v49 }
 0x22e   :  { %v3339_v6 = vpop.eup %3338 }
 0x22f   :  { %v1834_v15 = vmul.f32 %v3339_v6, %v1832_v49  ;;  %vm1840_vm1 = vweird.f32 %v3339_v6  ;;  %v5473_v49 = vld [vmem:[#allocation44_spill] sm:$0xff] }
 0x230   :  { %vm1841_vm3 = vmor %vm1839_vm2, %vm1840_vm1 }
 0x231   :  { %v1835_v36 = vmul.f32 %v3339_v6, %v1834_v15  ;;  %v5474_v15 = vld [vmem:[#allocation48_spill] sm:$0xff] }
 0x233   :  { %v1836_v18 = vmul.f32 0.5, %v1835_v36 }
 0x235   :  { %v1837_v40 = vsub.f32 1.5, %v1836_v18  ;;  %v5475_v18 = vld [vmem:[#allocation52_spill] sm:$0xff] }
 0x237   :  { %v1838_v63 = vmul.f32 %v3339_v6, %v1837_v40 }
 0x239   :  { %v1842_v52 = vsel %vm1841_vm3, %v3339_v6, %v1838_v63 }
 0x23a   :  { %v1843_v24 = vmul.f32 %v1842_v52, %v1831_v5  ;;  %v5476_v5 = vld [vmem:[#allocation56_spill] sm:$0xff] }
 0x23b   :  { %v5477_v52 = vld [vmem:[#allocation60_spill] sm:$0xff] }
 0x23c   :  { %v1845_v41 = vmul.f32 %v1843_v24, %v1826_v27  ;;  %v4332_v26 = vperm.slane %v1843_v24, 0 }
 0x23e   :  { %v1846_v34 = vsub.f32 %v1844_v56, %v1845_v41  ;;  %v1866_v12 = vmul.f32 %v4332_v26, %v5463_v46  ;;  %v1867_v4 = vmul.f32 %v4332_v26, %v5464_v55  ;;  %v1868_v7 = vmul.f32 %v4332_v26, %v5465_v13  ;;  %v5478_v56 = vld [vmem:[#allocation64_spill] sm:$0xff]  ;;  %v5479_v55 = vld [vmem:[#allocation5_spill] sm:$0xff] }
 0x23f   :  { %v1869_v29 = vmul.f32 %v4332_v26, %v5466_v57  ;;  %v1870_v60 = vmul.f32 %v4332_v26, %v5467_v23  ;;  %v1871_v9 = vmul.f32 %v4332_v26, %v5468_v2  ;;  %v1872_v27 = vmul.f32 %v4332_v26, %v5469_v10  ;;  %v5480_v57 = vld [vmem:[#allocation9_spill] sm:$0xff] }
 0x240   :  { %v4342_v16 = vperm.slane %v1846_v34, 0  ;;  %v1873_v31 = vmul.f32 %v4332_v26, %v5470_v45  ;;  %v1874_v0 = vmul.f32 %v4332_v26, %v5471_v28  ;;  %v1875_v61 = vmul.f32 %v4332_v26, %v5472_v43  ;;  %v5481_v28 = vld [vmem:[#allocation13_spill] sm:$0xff] }
 0x241   :  { %v1876_v6 = vmul.f32 %v4332_v26, %v5473_v49  ;;  %v1877_v36 = vmul.f32 %v4332_v26, %v5474_v15  ;;  %v1878_v40 = vmul.f32 %v4332_v26, %v5475_v18  ;;  %v1879_v63 = vmul.f32 %v4332_v26, %v5476_v5 }
 0x242   :  { %v1880_v24 = vmul.f32 %v4332_v26, %v5477_v52  ;;  %v1881_v41 = vmul.f32 %v4332_v26, %v5478_v56  ;;  %v1885_v34 = vadd.f32 %v4342_v16, %v1866_v12  ;;  %v1886_v46 = vadd.f32 %v4342_v16, %v1867_v4 }
 0x243   :  { %v4372_v13 = vmul.f32 %v4332_v26, %v5479_v55  ;;  %v4376_v23 = vmul.f32 %v4332_v26, %v5480_v57  ;;  %v1887_v2 = vadd.f32 %v4342_v16, %v1868_v7  ;;  %v1888_v10 = vadd.f32 %v4342_v16, %v1869_v29 }
 0x244   :  { %v1889_v45 = vadd.f32 %v4342_v16, %v1870_v60  ;;  %v4383_v43 = vmul.f32 %v4332_v26, %v5481_v28  ;;  %v1890_v12 = vadd.f32 %v4342_v16, %v1871_v9  ;;  %v1891_v4 = vadd.f32 %v4342_v16, %v1872_v27 }
 0x245   :  { %v1892_v49 = vadd.f32 %v4342_v16, %v1873_v31  ;;  %v1893_v15 = vadd.f32 %v4342_v16, %v1874_v0  ;;  %v1894_v18 = vadd.f32 %v4342_v16, %v1875_v61  ;;  %v1895_v7 = vadd.f32 %v4342_v16, %v1876_v6 }
 0x246   :  { %v1896_v29 = vadd.f32 %v4342_v16, %v1877_v36  ;;  %v4393_v60 = vadd.f32 %v4342_v16, %v1878_v40  ;;  %v4396_v5 = vadd.f32 %v4342_v16, %v1879_v63  ;;  %v4399_v9 = vadd.f32 %v4342_v16, %v1880_v24 }
 0x247   :  { %vm1901_vm4 = vcmp.gt.f32.partialorder %v1885_v34, 0.0  ;;  %vm1902_vm5 = vcmp.gt.f32.partialorder %v1886_v46, 0.0  ;;  %v1900_v27 = vadd.f32 %v4342_v16, %v1881_v41  ;;  %v1917_v31 = vmul.f32 0.2, %v1885_v34 }
 0x248   :  { %v1918_v0 = vmul.f32 0.2, %v1886_v46  ;;  %v1919_v61 = vmul.f32 0.2, %v1887_v2  ;;  %vm1903_vm6 = vcmp.gt.f32.partialorder %v1887_v2, 0.0  ;;  %vm1904_vm7 = vcmp.gt.f32.partialorder %v1888_v10, 0.0 }
 0x249   :  { %v1920_v6 = vmul.f32 0.2, %v1888_v10  ;;  %v1921_v36 = vmul.f32 0.2, %v1889_v45  ;;  %vm1905_vm8 = vcmp.gt.f32.partialorder %v1889_v45, 0.0  ;;  %vm1906_vm9 = vcmp.gt.f32.partialorder %v1890_v12, 0.0 }
 0x24a   :  { %v1922_v40 = vmul.f32 0.2, %v1890_v12  ;;  %v1933_v52 = vsel %vm1901_vm4, %v1885_v34, %v1917_v31  ;;  %vm1907_vm10 = vcmp.gt.f32.partialorder %v1891_v4, 0.0  ;;  %vm1908_vm11 = vcmp.gt.f32.partialorder %v1892_v49, 0.0 }
 0x24b   :  { %v1923_v63 = vmul.f32 0.2, %v1891_v4  ;;  %v1934_v24 = vsel %vm1902_vm5, %v1886_v46, %v1918_v0  ;;  %1949 = vst [vmem:[%s5209_s4] sm:$0xff] %v1933_v52  ;;  %vm1909_vm12 = vcmp.gt.f32.partialorder %v1893_v15, 0.0  ;;  %vm1910_vm13 = vcmp.gt.f32.partialorder %v1894_v18, 0.0  ;;  %v5483_v52 = vld [vmem:[#allocation21_spill] sm:$0xff] }
 0x24c   :  { %v1924_v56 = vmul.f32 0.2, %v1892_v49  ;;  %v1935_v41 = vsel %vm1903_vm6, %v1887_v2, %v1919_v61  ;;  %v1925_v55 = vmul.f32 0.2, %v1893_v15  ;;  %v1926_v57 = vmul.f32 0.2, %v1894_v18 }
 0x24d   :  { %v1936_v28 = vsel %vm1904_vm7, %v1888_v10, %v1920_v6  ;;  %v1937_v34 = vsel %vm1905_vm8, %v1889_v45, %v1921_v36  ;;  %1950 = vst [vmem:[%s5209_s4 + $0x8] sm:$0xff] %v1934_v24  ;;  %vm1911_vm14 = vcmp.gt.f32.partialorder %v1895_v7, 0.0  ;;  %v1927_v46 = vmul.f32 0.2, %v1895_v7  ;;  %v5484_v24 = vld [vmem:[#allocation25_spill] sm:$0xff] }
 0x24e   :  { %v1928_v31 = vmul.f32 0.2, %v1896_v29  ;;  %v1938_v0 = vsel %vm1906_vm9, %v1890_v12, %v1922_v40  ;;  %1951 = vst [vmem:[%s5209_s4 + $0x10] sm:$0xff] %v1935_v41  ;;  %vm1912_vm15 = vcmp.gt.f32.partialorder %v1896_v29, 0.0  ;;  %v1929_v2 = vmul.f32 0.2, %v4393_v60 }
 0x24f   :  { %v1930_v10 = vmul.f32 0.2, %v4396_v5  ;;  %v1939_v45 = vsel %vm1907_vm10, %v1891_v4, %v1923_v63  ;;  %1952 = vst [vmem:[%s5209_s4 + $0x18] sm:$0xff] %v1936_v28  ;;  %vm1913_vm0 = vcmp.gt.f32.partialorder %v4393_v60, 0.0  ;;  %v1931_v61 = vmul.f32 0.2, %v4399_v9 }
 0x250   :  { %v1932_v12 = vmul.f32 0.2, %v1900_v27  ;;  %v1940_v6 = vsel %vm1908_vm11, %v1892_v49, %v1924_v56  ;;  %1953 = vst [vmem:[%s5209_s4 + $0x20] sm:$0xff] %v1937_v34  ;;  %vm1914_vm1 = vcmp.gt.f32.partialorder %v4396_v5, 0.0  ;;  %vm1915_vm2 = vcmp.gt.f32.partialorder %v4399_v9, 0.0  ;;  %v5482_v49 = vld [vmem:[#allocation17_spill] sm:$0xff] }
 0x251   :  { %vm1916_vm3 = vcmp.gt.f32.partialorder %v1900_v27, 0.0  ;;  %v1941_v4 = vsel %vm1909_vm12, %v1893_v15, %v1925_v55  ;;  %1954 = vst [vmem:[%s5209_s4 + $0x28] sm:$0xff] %v1938_v0  ;;  %v1942_v36 = vsel %vm1910_vm13, %v1894_v18, %v1926_v57  ;;  %v1984_v40 = vmul.f32 %v4332_v26, %v5482_v49  ;;  %v5485_v18 = vld [vmem:[#allocation29_spill] sm:$0xff] }
 0x252   :  { %1955 = vst [vmem:[%s5209_s4 + $0x30] sm:$0xff] %v1939_v45  ;;  %v1985_v63 = vmul.f32 %v4332_v26, %v5483_v52  ;;  %v1986_v56 = vmul.f32 %v4332_v26, %v5484_v24  ;;  %v1943_v15 = vsel %vm1911_vm14, %v1895_v7, %v1927_v46  ;;  %v1944_v41 = vsel %vm1912_vm15, %v1896_v29, %v1928_v31  ;;  %v5486_v57 = vld [vmem:[#allocation33_spill] sm:$0xff] }
 0x253   :  { %1956 = vst [vmem:[%s5209_s4 + $0x38] sm:$0xff] %v1940_v6  ;;  %v1987_v55 = vmul.f32 %v4332_v26, %v5485_v18  ;;  %v1988_v28 = vmul.f32 %v4332_v26, %v5486_v57  ;;  %v1945_v34 = vsel %vm1913_vm0, %v4393_v60, %v1929_v2  ;;  %v1946_v7 = vsel %vm1914_vm1, %v4396_v5, %v1930_v10  ;;  %v5487_v31 = vld [vmem:[#allocation37_spill] sm:$0xff] }
 0x254   :  { %v1947_v29 = vsel %vm1915_vm2, %v4399_v9, %v1931_v61  ;;  %v1948_v46 = vsel %vm1916_vm3, %v1900_v27, %v1932_v12  ;;  %1957 = vst [vmem:[%s5209_s4 + $0x40] sm:$0xff] %v1941_v4  ;;  %v1989_v60 = vmul.f32 %v4332_v26, %v5487_v31  ;;  %v5488_v0 = vld [vmem:[#allocation41_spill] sm:$0xff]  ;;  %v1997_v49 = vadd.f32 %v4372_v13, %v4342_v16 }
 0x255   :  { %1958 = vst [vmem:[%s5209_s4 + $0x48] sm:$0xff] %v1942_v36  ;;  %v1990_v5 = vmul.f32 %v4332_v26, %v5488_v0  ;;  %v5489_v2 = vld [vmem:[#allocation45_spill] sm:$0xff]  ;;  %v1999_v18 = vadd.f32 %v4383_v43, %v4342_v16  ;;  %v2000_v57 = vadd.f32 %v1984_v40, %v4342_v16  ;;  %v2001_v13 = vadd.f32 %v1985_v63, %v4342_v16 }
 0x256   :  { %v1991_v10 = vmul.f32 %v4332_v26, %v5489_v2  ;;  %v5490_v9 = vld [vmem:[#allocation49_spill] sm:$0xff]  ;;  %1959 = vst [vmem:[%s5209_s4 + $0x50] sm:$0xff] %v1943_v15  ;;  %v1998_v15 = vadd.f32 %v4376_v23, %v4342_v16  ;;  %v2002_v31 = vadd.f32 %v1986_v56, %v4342_v16  ;;  %v2004_v0 = vadd.f32 %v1988_v28, %v4342_v16 }
 0x257   :  { %v1992_v27 = vmul.f32 %v4332_v26, %v5490_v9  ;;  %v5491_v45 = vld [vmem:[#allocation53_spill] sm:$0xff]  ;;  %1960 = vst [vmem:[%s5209_s4 + $0x58] sm:$0xff] %v1944_v41  ;;  %v2003_v41 = vadd.f32 %v1987_v55, %v4342_v16  ;;  %v2005_v23 = vadd.f32 %v1989_v60, %v4342_v16  ;;  %v2006_v43 = vadd.f32 %v1990_v5, %v4342_v16 }
 0x258   :  { %v1993_v61 = vmul.f32 %v4332_v26, %v5491_v45  ;;  %v5492_v12 = vld [vmem:[#allocation57_spill] sm:$0xff]  ;;  %1961 = vst [vmem:[%s5209_s4 + $0x60] sm:$0xff] %v1945_v34  ;;  %v2007_v40 = vadd.f32 %v1991_v10, %v4342_v16  ;;  %vm2013_vm4 = vcmp.gt.f32.partialorder %v1997_v49, 0.0  ;;  %v2029_v55 = vmul.f32 0.2, %v1997_v49 }
 0x259   :  { %v1994_v6 = vmul.f32 %v4332_v26, %v5492_v12  ;;  %v5493_v4 = vld [vmem:[#allocation61_spill] sm:$0xff]  ;;  %1962 = vst [vmem:[%s5209_s4 + $0x68] sm:$0xff] %v1946_v7  ;;  %v2008_v34 = vadd.f32 %v1992_v27, %v4342_v16  ;;  %vm2014_vm5 = vcmp.gt.f32.partialorder %v1998_v15, 0.0  ;;  %v2030_v7 = vmul.f32 0.2, %v1998_v15 }
 0x25a   :  { %v1995_v36 = vmul.f32 %v4332_v26, %v5493_v4  ;;  %v5494_v52 = vld [vmem:[#allocation65_spill] sm:$0xff]  ;;  %1963 = vst [vmem:[%s5209_s4 + $0x70] sm:$0xff] %v1947_v29  ;;  %v2009_v63 = vadd.f32 %v1993_v61, %v4342_v16  ;;  %v2031_v60 = vmul.f32 0.2, %v1999_v18  ;;  %vm2015_vm6 = vcmp.gt.f32.partialorder %v1999_v18, 0.0 }
 0x25b   :  { %v1996_v24 = vmul.f32 %v4332_v26, %v5494_v52  ;;  %v2010_v56 = vadd.f32 %v1994_v6, %v4342_v16  ;;  %1964 = vst [vmem:[%s5209_s4 + $0x78] sm:$0xff] %v1948_v46  ;;  %vm2016_vm7 = vcmp.gt.f32.partialorder %v2000_v57, 0.0  ;;  %v2032_v29 = vmul.f32 0.2, %v2000_v57 }
 0x25c   :  { %v2011_v28 = vadd.f32 %v1995_v36, %v4342_v16  ;;  %vm2017_vm8 = vcmp.gt.f32.partialorder %v2001_v13, 0.0  ;;  %vm2018_vm9 = vcmp.gt.f32.partialorder %v2002_v31, 0.0  ;;  %v2033_v2 = vmul.f32 0.2, %v2001_v13 }
 0x25d   :  { %v2012_v5 = vadd.f32 %v1996_v24, %v4342_v16  ;;  %v2045_v10 = vsel %vm2013_vm4, %v1997_v49, %v2029_v55  ;;  %vm2019_vm10 = vcmp.gt.f32.partialorder %v2003_v41, 0.0  ;;  %vm2020_vm11 = vcmp.gt.f32.partialorder %v2004_v0, 0.0 }
 0x25e   :  { %v2034_v9 = vmul.f32 0.2, %v2002_v31  ;;  %v2046_v27 = vsel %vm2014_vm5, %v1998_v15, %v2030_v7  ;;  %vm2021_vm12 = vcmp.gt.f32.partialorder %v2005_v23, 0.0  ;;  %v2035_v46 = vmul.f32 0.2, %v2003_v41  ;;  %2061 = vst [vmem:[%s5209_s4 + $0x80] sm:$0xff] %v2045_v10 }
 0x25f   :  { %v2036_v45 = vmul.f32 0.2, %v2004_v0  ;;  %v2047_v61 = vsel %vm2015_vm6, %v1999_v18, %v2031_v60  ;;  %vm2022_vm13 = vcmp.gt.f32.partialorder %v2006_v43, 0.0  ;;  %v2037_v12 = vmul.f32 0.2, %v2005_v23  ;;  %2062 = vst [vmem:[%s5209_s4 + $0x88] sm:$0xff] %v2046_v27 }
 0x260   :  { %v2038_v6 = vmul.f32 0.2, %v2006_v43  ;;  %v2048_v4 = vsel %vm2016_vm7, %v2000_v57, %v2032_v29  ;;  %vm2023_vm14 = vcmp.gt.f32.partialorder %v2007_v40, 0.0  ;;  %v2039_v36 = vmul.f32 0.2, %v2007_v40  ;;  %2063 = vst [vmem:[%s5209_s4 + $0x90] sm:$0xff] %v2047_v61 }
 0x261   :  { %v2040_v49 = vmul.f32 0.2, %v2008_v34  ;;  %v2049_v52 = vsel %vm2017_vm8, %v2001_v13, %v2033_v2  ;;  %vm2024_vm15 = vcmp.gt.f32.partialorder %v2008_v34, 0.0  ;;  %v2041_v24 = vmul.f32 0.2, %v2009_v63  ;;  %2064 = vst [vmem:[%s5209_s4 + $0x98] sm:$0xff] %v2048_v4 }
 0x262   :  { %v2042_v15 = vmul.f32 0.2, %v2010_v56  ;;  %v2050_v18 = vsel %vm2018_vm9, %v2002_v31, %v2034_v9  ;;  %vm2025_vm0 = vcmp.gt.f32.partialorder %v2009_v63, 0.0  ;;  %v2043_v57 = vmul.f32 0.2, %v2011_v28  ;;  %2065 = vst [vmem:[%s5209_s4 + $0xa0] sm:$0xff] %v2049_v52 }
 0x263   :  { %v2044_v55 = vmul.f32 0.2, %v2012_v5  ;;  %v2051_v7 = vsel %vm2019_vm10, %v2003_v41, %v2035_v46  ;;  %vm2026_vm1 = vcmp.gt.f32.partialorder %v2010_v56, 0.0  ;;  %vm2027_vm2 = vcmp.gt.f32.partialorder %v2011_v28, 0.0  ;;  %2066 = vst [vmem:[%s5209_s4 + $0xa8] sm:$0xff] %v2050_v18  ;;  %v5495_v41 = vld [vmem:[#allocation6_spill] sm:$0xff] }
 0x264   :  { %vm2028_vm3 = vcmp.gt.f32.partialorder %v2012_v5, 0.0  ;;  %v2052_v13 = vsel %vm2020_vm11, %v2004_v0, %v2036_v45  ;;  %v2053_v31 = vsel %vm2021_vm12, %v2005_v23, %v2037_v12  ;;  %v2093_v60 = vmul.f32 %v4332_v26, %v5495_v41  ;;  %v5496_v29 = vld [vmem:[#allocation10_spill] sm:$0xff]  ;;  %2067 = vst [vmem:[%s5209_s4 + $0xb0] sm:$0xff] %v2051_v7 }
 0x265   :  { %v2094_v2 = vmul.f32 %v4332_v26, %v5496_v29  ;;  %v2054_v10 = vsel %vm2022_vm13, %v2006_v43, %v2038_v6  ;;  %v2055_v0 = vsel %vm2023_vm14, %v2007_v40, %v2039_v36  ;;  %v2056_v9 = vsel %vm2024_vm15, %v2008_v34, %v2040_v49  ;;  %v5497_v23 = vld [vmem:[#allocation14_spill] sm:$0xff]  ;;  %2068 = vst [vmem:[%s5209_s4 + $0xb8] sm:$0xff] %v2052_v13 }
 0x266   :  { %v2095_v27 = vmul.f32 %v4332_v26, %v5497_v23  ;;  %v2057_v46 = vsel %vm2025_vm0, %v2009_v63, %v2041_v24  ;;  %v2058_v45 = vsel %vm2026_vm1, %v2010_v56, %v2042_v15  ;;  %v2059_v61 = vsel %vm2027_vm2, %v2011_v28, %v2043_v57  ;;  %2069 = vst [vmem:[%s5209_s4 + $0xc0] sm:$0xff] %v2053_v31  ;;  %v5498_v43 = vld [vmem:[#allocation18_spill] sm:$0xff] }
 0x267   :  { %v2060_v12 = vsel %vm2028_vm3, %v2012_v5, %v2044_v55  ;;  %v2096_v40 = vmul.f32 %v4332_v26, %v5498_v43  ;;  %v5499_v34 = vld [vmem:[#allocation22_spill] sm:$0xff]  ;;  %2070 = vst [vmem:[%s5209_s4 + $0xc8] sm:$0xff] %v2054_v10  ;;  %v2109_v10 = vadd.f32 %v2093_v60, %v4342_v16 }
 0x268   :  { %v2097_v6 = vmul.f32 %v4332_v26, %v5499_v34  ;;  %v5500_v4 = vld [vmem:[#allocation26_spill] sm:$0xff]  ;;  %2071 = vst [vmem:[%s5209_s4 + $0xd0] sm:$0xff] %v2055_v0 }
 0x269   :  { %v2098_v63 = vmul.f32 %v4332_v26, %v5500_v4  ;;  %v5501_v56 = vld [vmem:[#allocation30_spill] sm:$0xff]  ;;  %2072 = vst [vmem:[%s5209_s4 + $0xd8] sm:$0xff] %v2056_v9  ;;  %v2110_v4 = vadd.f32 %v2094_v2, %v4342_v16  ;;  %v2112_v60 = vadd.f32 %v2096_v40, %v4342_v16  ;;  %vm2125_vm4 = vcmp.gt.f32.partialorder %v2109_v10, 0.0 }
 0x26a   :  { %v2099_v28 = vmul.f32 %v4332_v26, %v5501_v56  ;;  %v5502_v5 = vld [vmem:[#allocation34_spill] sm:$0xff]  ;;  %v2111_v56 = vadd.f32 %v2095_v27, %v4342_v16  ;;  %2073 = vst [vmem:[%s5209_s4 + $0xe0] sm:$0xff] %v2057_v46 }
 0x26b   :  { %v2100_v36 = vmul.f32 %v4332_v26, %v5502_v5  ;;  %v5503_v49 = vld [vmem:[#allocation38_spill] sm:$0xff]  ;;  %v2113_v5 = vadd.f32 %v2097_v6, %v4342_v16  ;;  %v2114_v9 = vadd.f32 %v2098_v63, %v4342_v16  ;;  %2074 = vst [vmem:[%s5209_s4 + $0xe8] sm:$0xff] %v2058_v45  ;;  %v2141_v63 = vmul.f32 0.2, %v2109_v10 }
 0x26c   :  { %v2101_v52 = vmul.f32 %v4332_v26, %v5503_v49  ;;  %v5504_v24 = vld [vmem:[#allocation42_spill] sm:$0xff]  ;;  %v2115_v49 = vadd.f32 %v2099_v28, %v4342_v16  ;;  %2075 = vst [vmem:[%s5209_s4 + $0xf0] sm:$0xff] %v2059_v61  ;;  %vm2126_vm5 = vcmp.gt.f32.partialorder %v2110_v4, 0.0  ;;  %v2142_v28 = vmul.f32 0.2, %v2110_v4 }
 0x26d   :  { %v2102_v15 = vmul.f32 %v4332_v26, %v5504_v24  ;;  %v5505_v18 = vld [vmem:[#allocation46_spill] sm:$0xff]  ;;  %v2116_v2 = vadd.f32 %v2100_v36, %v4342_v16  ;;  %2076 = vst [vmem:[%s5209_s4 + $0xf8] sm:$0xff] %v2060_v12  ;;  %v2143_v36 = vmul.f32 0.2, %v2111_v56  ;;  %vm2127_vm6 = vcmp.gt.f32.partialorder %v2111_v56, 0.0 }
 0x26e   :  { %v2103_v57 = vmul.f32 %v4332_v26, %v5505_v18  ;;  %v5506_v55 = vld [vmem:[#allocation50_spill] sm:$0xff]  ;;  %v2117_v27 = vadd.f32 %v2101_v52, %v4342_v16  ;;  %v2144_v61 = vmul.f32 0.2, %v2112_v60  ;;  %vm2128_vm7 = vcmp.gt.f32.partialorder %v2112_v60, 0.0 }
 0x26f   :  { %v2104_v7 = vmul.f32 %v4332_v26, %v5506_v55  ;;  %v5507_v13 = vld [vmem:[#allocation54_spill] sm:$0xff]  ;;  %v2118_v24 = vadd.f32 %v2102_v15, %v4342_v16  ;;  %vm2129_vm8 = vcmp.gt.f32.partialorder %v2113_v5, 0.0  ;;  %v2145_v18 = vmul.f32 0.2, %v2113_v5 }
 0x270   :  { %v2105_v31 = vmul.f32 %v4332_v26, %v5507_v13  ;;  %v5508_v41 = vld [vmem:[#allocation58_spill] sm:$0xff]  ;;  %v2119_v46 = vadd.f32 %v2103_v57, %v4342_v16  ;;  %v2157_v57 = vsel %vm2125_vm4, %v2109_v10, %v2141_v63  ;;  %vm2130_vm9 = vcmp.gt.f32.partialorder %v2114_v9, 0.0 }
 0x271   :  { %v2106_v29 = vmul.f32 %v4332_v26, %v5508_v41  ;;  %v5509_v23 = vld [vmem:[#allocation62_spill] sm:$0xff]  ;;  %v2120_v40 = vadd.f32 %v2104_v7, %v4342_v16  ;;  %vm2131_vm10 = vcmp.gt.f32.partialorder %v2115_v49, 0.0  ;;  %v2146_v55 = vmul.f32 0.2, %v2114_v9  ;;  %2173 = vst [vmem:[%s5209_s4 + $0x100] sm:$0xff] %v2157_v57 }
 0x272   :  { %v2107_v43 = vmul.f32 %v4332_v26, %v5509_v23  ;;  %v5510_v34 = vld [vmem:[#allocation66_spill] sm:$0xff]  ;;  %v2121_v6 = vadd.f32 %v2105_v31, %v4342_v16  ;;  %v2158_v7 = vsel %vm2126_vm5, %v2110_v4, %v2142_v28  ;;  %vm2132_vm11 = vcmp.gt.f32.partialorder %v2116_v2, 0.0 }
 0x273   :  { %v2108_v0 = vmul.f32 %v4332_v26, %v5510_v34  ;;  %v2122_v45 = vadd.f32 %v2106_v29, %v4342_v16  ;;  %vm2133_vm12 = vcmp.gt.f32.partialorder %v2117_v27, 0.0  ;;  %v2147_v12 = vmul.f32 0.2, %v2115_v49  ;;  %2174 = vst [vmem:[%s5209_s4 + $0x108] sm:$0xff] %v2158_v7 }
 0x274   :  { %v2123_v52 = vadd.f32 %v2107_v43, %v4342_v16  ;;  %v2159_v13 = vsel %vm2127_vm6, %v2111_v56, %v2143_v36  ;;  %vm2134_vm13 = vcmp.gt.f32.partialorder %v2118_v24, 0.0  ;;  %v2148_v31 = vmul.f32 0.2, %v2116_v2 }
 0x275   :  { %v2124_v15 = vadd.f32 %v2108_v0, %v4342_v16  ;;  %v2149_v41 = vmul.f32 0.2, %v2117_v27  ;;  %v2160_v29 = vsel %vm2128_vm7, %v2112_v60, %v2144_v61  ;;  %vm2135_vm14 = vcmp.gt.f32.partialorder %v2119_v46, 0.0  ;;  %2175 = vst [vmem:[%s5209_s4 + $0x110] sm:$0xff] %v2159_v13 }
 0x276   :  { %v2150_v23 = vmul.f32 0.2, %v2118_v24  ;;  %v2151_v43 = vmul.f32 0.2, %v2119_v46  ;;  %v2161_v10 = vsel %vm2129_vm8, %v2113_v5, %v2145_v18  ;;  %vm2136_vm15 = vcmp.gt.f32.partialorder %v2120_v40, 0.0  ;;  %2176 = vst [vmem:[%s5209_s4 + $0x118] sm:$0xff] %v2160_v29 }
 0x277   :  { %v2152_v34 = vmul.f32 0.2, %v2120_v40  ;;  %v2153_v0 = vmul.f32 0.2, %v2121_v6  ;;  %v2162_v4 = vsel %vm2130_vm9, %v2114_v9, %v2146_v55  ;;  %vm2137_vm0 = vcmp.gt.f32.partialorder %v2121_v6, 0.0  ;;  %2177 = vst [vmem:[%s5209_s4 + $0x120] sm:$0xff] %v2161_v10 }
 0x278   :  { %v2154_v56 = vmul.f32 0.2, %v2122_v45  ;;  %v2155_v60 = vmul.f32 0.2, %v2123_v52  ;;  %v2163_v63 = vsel %vm2131_vm10, %v2115_v49, %v2147_v12  ;;  %vm2138_vm1 = vcmp.gt.f32.partialorder %v2122_v45, 0.0  ;;  %2178 = vst [vmem:[%s5209_s4 + $0x128] sm:$0xff] %v2162_v4 }
 0x279   :  { %vm2139_vm2 = vcmp.gt.f32.partialorder %v2123_v52, 0.0  ;;  %v2156_v5 = vmul.f32 0.2, %v2124_v15  ;;  %v2164_v28 = vsel %vm2132_vm11, %v2116_v2, %v2148_v31  ;;  %vm2140_vm3 = vcmp.gt.f32.partialorder %v2124_v15, 0.0  ;;  %v5511_v49 = vld [vmem:[#allocation7_spill] sm:$0xff]  ;;  %2179 = vst [vmem:[%s5209_s4 + $0x130] sm:$0xff] %v2163_v63 }
 0x27a   :  { %v2165_v9 = vsel %vm2133_vm12, %v2117_v27, %v2149_v41  ;;  %v2205_v36 = vmul.f32 %v4332_v26, %v5511_v49  ;;  %v2166_v61 = vsel %vm2134_vm13, %v2118_v24, %v2150_v23  ;;  %v2167_v18 = vsel %vm2135_vm14, %v2119_v46, %v2151_v43  ;;  %v5512_v2 = vld [vmem:[#allocation11_spill] sm:$0xff]  ;;  %2180 = vst [vmem:[%s5209_s4 + $0x138] sm:$0xff] %v2164_v28 }
 0x27b   :  { %v2206_v57 = vmul.f32 %v4332_v26, %v5512_v2  ;;  %v5513_v55 = vld [vmem:[#allocation15_spill] sm:$0xff]  ;;  %v2168_v7 = vsel %vm2136_vm15, %v2120_v40, %v2152_v34  ;;  %v2169_v12 = vsel %vm2137_vm0, %v2121_v6, %v2153_v0  ;;  %v2170_v13 = vsel %vm2138_vm1, %v2122_v45, %v2154_v56  ;;  %2181 = vst [vmem:[%s5209_s4 + $0x140] sm:$0xff] %v2165_v9 }
 0x27c   :  { %v2207_v27 = vmul.f32 %v4332_v26, %v5513_v55  ;;  %v2171_v24 = vsel %vm2139_vm2, %v2123_v52, %v2155_v60  ;;  %v2172_v46 = vsel %vm2140_vm3, %v2124_v15, %v2156_v5  ;;  %v5514_v31 = vld [vmem:[#allocation19_spill] sm:$0xff]  ;;  %2182 = vst [vmem:[%s5209_s4 + $0x148] sm:$0xff] %v2166_v61  ;;  %v2221_v49 = vadd.f32 %v2205_v36, %v4342_v16 }
 0x27d   :  { %v2208_v41 = vmul.f32 %v4332_v26, %v5514_v31  ;;  %v5515_v29 = vld [vmem:[#allocation23_spill] sm:$0xff]  ;;  %2183 = vst [vmem:[%s5209_s4 + $0x150] sm:$0xff] %v2167_v18  ;;  %v2222_v31 = vadd.f32 %v2206_v57, %v4342_v16 }
 0x27e   :  { %v2209_v40 = vmul.f32 %v4332_v26, %v5515_v29  ;;  %v5516_v6 = vld [vmem:[#allocation27_spill] sm:$0xff]  ;;  %2184 = vst [vmem:[%s5209_s4 + $0x158] sm:$0xff] %v2168_v7  ;;  %v2223_v29 = vadd.f32 %v2207_v27, %v4342_v16  ;;  %vm2237_vm4 = vcmp.gt.f32.partialorder %v2221_v49, 0.0 }
 0x27f   :  { %v2210_v45 = vmul.f32 %v4332_v26, %v5516_v6  ;;  %v5517_v52 = vld [vmem:[#allocation31_spill] sm:$0xff]  ;;  %2185 = vst [vmem:[%s5209_s4 + $0x160] sm:$0xff] %v2169_v12  ;;  %vm2238_vm5 = vcmp.gt.f32.partialorder %v2222_v31, 0.0 }
 0x280   :  { %v2211_v15 = vmul.f32 %v4332_v26, %v5517_v52  ;;  %v5518_v23 = vld [vmem:[#allocation35_spill] sm:$0xff]  ;;  %v2224_v52 = vadd.f32 %v2208_v41, %v4342_v16  ;;  %v2225_v7 = vadd.f32 %v2209_v40, %v4342_v16  ;;  %2186 = vst [vmem:[%s5209_s4 + $0x168] sm:$0xff] %v2170_v13  ;;  %vm2239_vm6 = vcmp.gt.f32.partialorder %v2223_v29, 0.0 }
 0x281   :  { %v2212_v43 = vmul.f32 %v4332_v26, %v5518_v23  ;;  %v5519_v10 = vld [vmem:[#allocation39_spill] sm:$0xff]  ;;  %v2226_v23 = vadd.f32 %v2210_v45, %v4342_v16  ;;  %2187 = vst [vmem:[%s5209_s4 + $0x170] sm:$0xff] %v2171_v24  ;;  %v2253_v45 = vmul.f32 0.2, %v2221_v49 }
 0x282   :  { %v2213_v34 = vmul.f32 %v4332_v26, %v5519_v10  ;;  %v5520_v0 = vld [vmem:[#allocation43_spill] sm:$0xff]  ;;  %v2227_v57 = vadd.f32 %v2211_v15, %v4342_v16  ;;  %2188 = vst [vmem:[%s5209_s4 + $0x178] sm:$0xff] %v2172_v46  ;;  %v2254_v15 = vmul.f32 0.2, %v2222_v31  ;;  %v2256_v24 = vmul.f32 0.2, %v2224_v52 }
 0x283   :  { %v2214_v4 = vmul.f32 %v4332_v26, %v5520_v0  ;;  %v5521_v56 = vld [vmem:[#allocation47_spill] sm:$0xff]  ;;  %v2228_v27 = vadd.f32 %v2212_v43, %v4342_v16  ;;  %v2255_v43 = vmul.f32 0.2, %v2223_v29  ;;  %vm2240_vm7 = vcmp.gt.f32.partialorder %v2224_v52, 0.0 }
 0x284   :  { %v2215_v60 = vmul.f32 %v4332_v26, %v5521_v56  ;;  %v5522_v63 = vld [vmem:[#allocation51_spill] sm:$0xff]  ;;  %v2229_v10 = vadd.f32 %v2213_v34, %v4342_v16  ;;  %v2257_v56 = vmul.f32 0.2, %v2225_v7  ;;  %vm2241_vm8 = vcmp.gt.f32.partialorder %v2225_v7, 0.0 }
 0x285   :  { %v2216_v5 = vmul.f32 %v4332_v26, %v5522_v63  ;;  %v5523_v28 = vld [vmem:[#allocation55_spill] sm:$0xff]  ;;  %v2230_v12 = vadd.f32 %v2214_v4, %v4342_v16  ;;  %vm2242_vm9 = vcmp.gt.f32.partialorder %v2226_v23, 0.0  ;;  %v2258_v63 = vmul.f32 0.2, %v2226_v23 }
 0x286   :  { %v2217_v9 = vmul.f32 %v4332_v26, %v5523_v28  ;;  %v5524_v61 = vld [vmem:[#allocation59_spill] sm:$0xff]  ;;  %v2231_v41 = vadd.f32 %v2215_v60, %v4342_v16  ;;  %v2269_v60 = vsel %vm2237_vm4, %v2221_v49, %v2253_v45  ;;  %v2270_v46 = vsel %vm2238_vm5, %v2222_v31, %v2254_v15 }
 0x287   :  { %v2218_v2 = vmul.f32 %v4332_v26, %v5524_v61  ;;  %v5525_v55 = vld [vmem:[#allocation63_spill] sm:$0xff]  ;;  %v2232_v40 = vadd.f32 %v2216_v5, %v4342_v16  ;;  %vm2243_vm10 = vcmp.gt.f32.partialorder %v2227_v57, 0.0  ;;  %vm2244_vm11 = vcmp.gt.f32.partialorder %v2228_v27, 0.0  ;;  %2285 = vst [vmem:[%s5209_s4 + $0x180] sm:$0xff] %v2269_v60 }
 0x288   :  { %v2219_v18 = vmul.f32 %v4332_v26, %v5525_v55  ;;  %v5526_v6 = vld [vmem:[#allocation67_spill] sm:$0xff]  ;;  %v2233_v13 = vadd.f32 %v2217_v9, %v4342_v16  ;;  %v2259_v5 = vmul.f32 0.2, %v2227_v57  ;;  %v2271_v28 = vsel %vm2239_vm6, %v2223_v29, %v2255_v43  ;;  %2286 = vst [vmem:[%s5209_s4 + $0x188] sm:$0xff] %v2270_v46  ;;  %v5527_v43 = vld [vmem:[#allocation72_spill] sm:$0xff] }
 0x289   :  { %v2220_v36 = vmul.f32 %v4332_v26, %v5526_v6  ;;  %v2234_v34 = vadd.f32 %v2218_v2, %v4342_v16  ;;  %vm2245_vm12 = vcmp.gt.f32.partialorder %v2229_v10, 0.0  ;;  %vm2246_vm13 = vcmp.gt.f32.partialorder %v2230_v12, 0.0  ;;  %2287 = vst [vmem:[%s5209_s4 + $0x190] sm:$0xff] %v2271_v28 }
 0x28a   :  { %v2235_v0 = vadd.f32 %v2219_v18, %v4342_v16  ;;  %v2260_v9 = vmul.f32 0.2, %v2228_v27  ;;  %v2272_v61 = vsel %vm2240_vm7, %v2224_v52, %v2256_v24  ;;  %vm2247_vm14 = vcmp.gt.f32.partialorder %v2231_v41, 0.0 }
 0x28b   :  { %v2236_v4 = vadd.f32 %v2220_v36, %v4342_v16  ;;  %v2261_v2 = vmul.f32 0.2, %v2229_v10  ;;  %v2262_v55 = vmul.f32 0.2, %v2230_v12  ;;  %v2273_v49 = vsel %vm2241_vm8, %v2225_v7, %v2257_v56  ;;  %2288 = vst [vmem:[%s5209_s4 + $0x198] sm:$0xff] %v2272_v61 }
 0x28c   :  { %vm2248_vm15 = vcmp.gt.f32.partialorder %v2232_v40, 0.0  ;;  %v2263_v18 = vmul.f32 0.2, %v2231_v41  ;;  %v2264_v31 = vmul.f32 0.2, %v2232_v40  ;;  %v2274_v29 = vsel %vm2242_vm9, %v2226_v23, %v2258_v63  ;;  %2289 = vst [vmem:[%s5209_s4 + $0x1a0] sm:$0xff] %v2273_v49 }
 0x28d   :  { %vm2249_vm0 = vcmp.gt.f32.partialorder %v2233_v13, 0.0  ;;  %v2265_v6 = vmul.f32 0.2, %v2233_v13  ;;  %v2266_v36 = vmul.f32 0.2, %v2234_v34  ;;  %v2275_v52 = vsel %vm2243_vm10, %v2227_v57, %v2259_v5  ;;  %2290 = vst [vmem:[%s5209_s4 + $0x1a8] sm:$0xff] %v2274_v29 }
 0x28e   :  { %vm2250_vm1 = vcmp.gt.f32.partialorder %v2234_v34, 0.0  ;;  %v2267_v7 = vmul.f32 0.2, %v2235_v0  ;;  %v2268_v45 = vmul.f32 0.2, %v2236_v4  ;;  %v2276_v15 = vsel %vm2244_vm11, %v2228_v27, %v2260_v9  ;;  %2291 = vst [vmem:[%s5209_s4 + $0x1b0] sm:$0xff] %v2275_v52 }
 0x28f   :  { %vm2251_vm2 = vcmp.gt.f32.partialorder %v2235_v0, 0.0  ;;  %vm2252_vm3 = vcmp.gt.f32.partialorder %v2236_v4, 0.0  ;;  %v2277_v23 = vsel %vm2245_vm12, %v2229_v10, %v2261_v2  ;;  %v2278_v57 = vsel %vm2246_vm13, %v2230_v12, %v2262_v55  ;;  %2292 = vst [vmem:[%s5209_s4 + $0x1b8] sm:$0xff] %v2276_v15 }
 0x290   :  { %v2317_v27 = vmul.f32 %v4332_v26, %v5440_v22  ;;  %v2318_v24 = vmul.f32 %v4332_v26, %v5527_v43  ;;  %v2319_v56 = vmul.f32 %v4332_v26, %v5449_v53  ;;  %v2279_v10 = vsel %vm2247_vm14, %v2231_v41, %v2263_v18  ;;  %2293 = vst [vmem:[%s5209_s4 + $0x1c0] sm:$0xff] %v2277_v23 }
 0x291   :  { %v2280_v60 = vsel %vm2248_vm15, %v2232_v40, %v2264_v31  ;;  %v2281_v63 = vsel %vm2249_vm0, %v2233_v13, %v2265_v6  ;;  %v2282_v12 = vsel %vm2250_vm1, %v2234_v34, %v2266_v36  ;;  %v2283_v46 = vsel %vm2251_vm2, %v2235_v0, %v2267_v7  ;;  %2294 = vst [vmem:[%s5209_s4 + $0x1c8] sm:$0xff] %v2278_v57 }
 0x292   :  { %v2284_v22 = vsel %vm2252_vm3, %v2236_v4, %v2268_v45  ;;  %v2320_v53 = vmul.f32 %v4332_v26, %v3893_v8  ;;  %v2321_v41 = vmul.f32 %v4332_v26, %v3931_v19  ;;  %v2322_v40 = vmul.f32 %v4332_v26, %v3973_v44  ;;  %2295 = vst [vmem:[%s5209_s4 + $0x1d0] sm:$0xff] %v2279_v10 }
 0x293   :  { %v2323_v13 = vmul.f32 %v4332_v26, %v4013_v1  ;;  %v2324_v34 = vmul.f32 %v4332_v26, %v4046_v25  ;;  %v2325_v0 = vmul.f32 %v4332_v26, %v4055_v47  ;;  %v2326_v19 = vmul.f32 %v4332_v26, %v4063_v20  ;;  %2296 = vst [vmem:[%s5209_s4 + $0x1d8] sm:$0xff] %v2280_v60 }
 0x294   :  { %v2327_v8 = vmul.f32 %v4332_v26, %v4083_v50  ;;  %v2328_v44 = vmul.f32 %v4332_v26, %v4137_v35  ;;  %v2333_v1 = vadd.f32 %v2317_v27, %v4342_v16  ;;  %v2329_v25 = vmul.f32 %v4332_v26, %v4174_v54  ;;  %2297 = vst [vmem:[%s5209_s4 + $0x1e0] sm:$0xff] %v2281_v63 }
 0x295   :  { %v2330_v47 = vmul.f32 %v4332_v26, %v4215_v51  ;;  %v2334_v20 = vadd.f32 %v2318_v24, %v4342_v16  ;;  %v2335_v4 = vadd.f32 %v2319_v56, %v4342_v16  ;;  %v2331_v50 = vmul.f32 %v4332_v26, %v4255_v32  ;;  %2298 = vst [vmem:[%s5209_s4 + $0x1e8] sm:$0xff] %v2282_v12 }
 0x296   :  { %v2332_v35 = vmul.f32 %v4332_v26, %v4293_v3  ;;  %v2336_v5 = vadd.f32 %v2320_v53, %v4342_v16  ;;  %v2337_v54 = vadd.f32 %v2321_v41, %v4342_v16  ;;  %v2338_v51 = vadd.f32 %v2322_v40, %v4342_v16  ;;  %2299 = vst [vmem:[%s5209_s4 + $0x1f0] sm:$0xff] %v2283_v46 }
 0x297   :  { %v2339_v28 = vadd.f32 %v2323_v13, %v4342_v16  ;;  %v2340_v9 = vadd.f32 %v2324_v34, %v4342_v16  ;;  %v2341_v61 = vadd.f32 %v2325_v0, %v4342_v16  ;;  %v2342_v32 = vadd.f32 %v2326_v19, %v4342_v16  ;;  %2300 = vst [vmem:[%s5209_s4 + $0x1f8] sm:$0xff] %v2284_v22 }
 0x298   :  { %v2343_v3 = vadd.f32 %v2327_v8, %v4342_v16  ;;  %vm2349_vm4 = vcmp.gt.f32.partialorder %v2333_v1, 0.0  ;;  %v2365_v2 = vmul.f32 0.2, %v2333_v1  ;;  %v2344_v55 = vadd.f32 %v2328_v44, %v4342_v16  ;;  %v5528_v8 = vld [vmem:[#allocation69_spill] sm:$0xff] }
 0x299   :  { %vm2350_vm5 = vcmp.gt.f32.partialorder %v2334_v20, 0.0  ;;  %v2366_v49 = vmul.f32 0.2, %v2334_v20  ;;  %v2367_v18 = vmul.f32 0.2, %v2335_v4  ;;  %v2345_v31 = vadd.f32 %v2329_v25, %v4342_v16 }
 0x29a   :  { %v2346_v29 = vadd.f32 %v2330_v47, %v4342_v16  ;;  %vm2351_vm6 = vcmp.gt.f32.partialorder %v2335_v4, 0.0  ;;  %v2368_v6 = vmul.f32 0.2, %v2336_v5  ;;  %v2347_v36 = vadd.f32 %v2331_v50, %v4342_v16 }
 0x29b   :  { %vm2352_vm7 = vcmp.gt.f32.partialorder %v2336_v5, 0.0  ;;  %v2369_v52 = vmul.f32 0.2, %v2337_v54  ;;  %v2381_v7 = vsel %vm2349_vm4, %v2333_v1, %v2365_v2  ;;  %v2348_v45 = vadd.f32 %v2332_v35, %v4342_v16  ;;  %v5529_v1 = vld [vmem:[#allocation73_spill] sm:$0xff] }
 0x29c   :  { %vm2353_vm8 = vcmp.gt.f32.partialorder %v2337_v54, 0.0  ;;  %v2370_v15 = vmul.f32 0.2, %v2338_v51  ;;  %v2382_v23 = vsel %vm2350_vm5, %v2334_v20, %v2366_v49  ;;  %vm2354_vm9 = vcmp.gt.f32.partialorder %v2338_v51, 0.0  ;;  %2397 = vst [vmem:[%s5209_s4 + $0x200] sm:$0xff] %v2381_v7  ;;  %v5532_v49 = vld [vmem:[#allocation94_spill] sm:$0xff] }
 0x29d   :  { %vm2355_vm10 = vcmp.gt.f32.partialorder %v2339_v28, 0.0  ;;  %v2371_v57 = vmul.f32 0.2, %v2339_v28  ;;  %v2383_v27 = vsel %vm2351_vm6, %v2335_v4, %v2367_v18  ;;  %vm2356_vm11 = vcmp.gt.f32.partialorder %v2340_v9, 0.0  ;;  %2398 = vst [vmem:[%s5209_s4 + $0x208] sm:$0xff] %v2382_v23 }
 0x29e   :  { %vm2357_vm12 = vcmp.gt.f32.partialorder %v2341_v61, 0.0  ;;  %v2372_v43 = vmul.f32 0.2, %v2340_v9  ;;  %v2384_v24 = vsel %vm2352_vm7, %v2336_v5, %v2368_v6  ;;  %vm2358_vm13 = vcmp.gt.f32.partialorder %v2342_v32, 0.0  ;;  %2399 = vst [vmem:[%s5209_s4 + $0x210] sm:$0xff] %v2383_v27 }
 0x29f   :  { %v2373_v56 = vmul.f32 0.2, %v2341_v61  ;;  %v2374_v10 = vmul.f32 0.2, %v2342_v32  ;;  %v2385_v60 = vsel %vm2353_vm8, %v2337_v54, %v2369_v52  ;;  %vm2359_vm14 = vcmp.gt.f32.partialorder %v2343_v3, 0.0  ;;  %2400 = vst [vmem:[%s5209_s4 + $0x218] sm:$0xff] %v2384_v24 }
 0x2a0   :  { %v2375_v63 = vmul.f32 0.2, %v2343_v3  ;;  %v2376_v12 = vmul.f32 0.2, %v2344_v55  ;;  %v2386_v46 = vsel %vm2354_vm9, %v2338_v51, %v2370_v15  ;;  %vm2360_vm15 = vcmp.gt.f32.partialorder %v2344_v55, 0.0  ;;  %2401 = vst [vmem:[%s5209_s4 + $0x220] sm:$0xff] %v2385_v60 }
 0x2a1   :  { %v2377_v22 = vmul.f32 0.2, %v2345_v31  ;;  %v2378_v53 = vmul.f32 0.2, %v2346_v29  ;;  %v2387_v41 = vsel %vm2355_vm10, %v2339_v28, %v2371_v57  ;;  %vm2361_vm0 = vcmp.gt.f32.partialorder %v2345_v31, 0.0  ;;  %2402 = vst [vmem:[%s5209_s4 + $0x228] sm:$0xff] %v2386_v46 }
 0x2a2   :  { %v2379_v40 = vmul.f32 0.2, %v2347_v36  ;;  %v2380_v13 = vmul.f32 0.2, %v2348_v45  ;;  %v2388_v34 = vsel %vm2356_vm11, %v2340_v9, %v2372_v43  ;;  %vm2362_vm1 = vcmp.gt.f32.partialorder %v2346_v29, 0.0  ;;  %2403 = vst [vmem:[%s5209_s4 + $0x230] sm:$0xff] %v2387_v41 }
 0x2a3   :  { %vm2363_vm2 = vcmp.gt.f32.partialorder %v2347_v36, 0.0  ;;  %vm2364_vm3 = vcmp.gt.f32.partialorder %v2348_v45, 0.0  ;;  %v2389_v0 = vsel %vm2357_vm12, %v2341_v61, %v2373_v56  ;;  %v2390_v19 = vsel %vm2358_vm13, %v2342_v32, %v2374_v10  ;;  %2404 = vst [vmem:[%s5209_s4 + $0x238] sm:$0xff] %v2388_v34  ;;  %v5530_v51 = vld [vmem:[#allocation79_spill] sm:$0xff] }
 0x2a4   :  { %v2429_v44 = vmul.f32 %v4332_v26, %v5528_v8  ;;  %v2430_v25 = vmul.f32 %v4332_v26, %v5529_v1  ;;  %v2391_v47 = vsel %vm2359_vm14, %v2343_v3, %v2375_v63  ;;  %v2392_v20 = vsel %vm2360_vm15, %v2344_v55, %v2376_v12  ;;  %2405 = vst [vmem:[%s5209_s4 + $0x240] sm:$0xff] %v2389_v0 }
 0x2a5   :  { %v2393_v4 = vsel %vm2361_vm0, %v2345_v31, %v2377_v22  ;;  %v2431_v50 = vmul.f32 %v4332_v26, %v3855_v37  ;;  %v2394_v35 = vsel %vm2362_vm1, %v2346_v29, %v2378_v53  ;;  %v2395_v5 = vsel %vm2363_vm2, %v2347_v36, %v2379_v40  ;;  %2406 = vst [vmem:[%s5209_s4 + $0x248] sm:$0xff] %v2390_v19  ;;  %v5533_v31 = vld [vmem:[#allocation102_spill] sm:$0xff] }
 0x2a6   :  { %v2396_v54 = vsel %vm2364_vm3, %v2348_v45, %v2380_v13  ;;  %v2432_v28 = vmul.f32 %v4332_v26, %v5530_v51  ;;  %v2433_v9 = vmul.f32 %v4332_v26, %v3933_v14  ;;  %v2434_v37 = vmul.f32 %v4332_v26, %v3975_v30  ;;  %2407 = vst [vmem:[%s5209_s4 + $0x250] sm:$0xff] %v2391_v47 }
 0x2a7   :  { %v2435_v61 = vmul.f32 %v4332_v26, %v4015_v39  ;;  %v2436_v32 = vmul.f32 %v4332_v26, %v4048_v11  ;;  %v2437_v3 = vmul.f32 %v4332_v26, %v4057_v33  ;;  %v2438_v2 = vmul.f32 %v4332_v26, %v4065_v59  ;;  %2408 = vst [vmem:[%s5209_s4 + $0x258] sm:$0xff] %v2392_v20  ;;  %v5531_v59 = vld [vmem:[#allocation100_spill] sm:$0xff] }
 0x2a8   :  { %v2439_v14 = vmul.f32 %v4332_v26, %v5457_v42  ;;  %v2445_v30 = vadd.f32 %v2429_v44, %v4342_v16  ;;  %v2440_v39 = vmul.f32 %v4332_v26, %v4139_v62  ;;  %v2441_v11 = vmul.f32 %v4332_v26, %v4176_v48  ;;  %2409 = vst [vmem:[%s5209_s4 + $0x260] sm:$0xff] %v2393_v4 }
 0x2a9   :  { %v2446_v33 = vadd.f32 %v2430_v25, %v4342_v16  ;;  %v2447_v55 = vadd.f32 %v2431_v50, %v4342_v16  ;;  %v2442_v42 = vmul.f32 %v4332_v26, %v5531_v59  ;;  %v2443_v18 = vmul.f32 %v4332_v26, %v5532_v49  ;;  %2410 = vst [vmem:[%s5209_s4 + $0x268] sm:$0xff] %v2394_v35 }
 0x2aa   :  { %v2444_v62 = vmul.f32 %v4332_v26, %v5533_v31  ;;  %v2448_v29 = vadd.f32 %v2432_v28, %v4342_v16  ;;  %v2449_v48 = vadd.f32 %v2433_v9, %v4342_v16  ;;  %v2450_v6 = vadd.f32 %v2434_v37, %v4342_v16  ;;  %2411 = vst [vmem:[%s5209_s4 + $0x270] sm:$0xff] %v2395_v5  ;;  %v5534_v9 = vld [vmem:[#allocation70_spill] sm:$0xff] }
 0x2ab   :  { %v2451_v36 = vadd.f32 %v2435_v61, %v4342_v16  ;;  %v2452_v52 = vadd.f32 %v2436_v32, %v4342_v16  ;;  %v2453_v7 = vadd.f32 %v2437_v3, %v4342_v16  ;;  %v2454_v45 = vadd.f32 %v2438_v2, %v4342_v16  ;;  %2412 = vst [vmem:[%s5209_s4 + $0x278] sm:$0xff] %v2396_v54  ;;  %v5535_v61 = vld [vmem:[#allocation74_spill] sm:$0xff]  ;;  %v5536_v3 = vld [vmem:[#allocation77_spill] sm:$0xff] }
 0x2ac   :  { %vm2461_vm4 = vcmp.gt.f32.partialorder %v2445_v30, 0.0  ;;  %v2477_v15 = vmul.f32 0.2, %v2445_v30  ;;  %v2455_v23 = vadd.f32 %v2439_v14, %v4342_v16  ;;  %vm2462_vm5 = vcmp.gt.f32.partialorder %v2446_v33, 0.0 }
 0x2ad   :  { %v2478_v57 = vmul.f32 0.2, %v2446_v33  ;;  %v2479_v27 = vmul.f32 0.2, %v2447_v55  ;;  %v2456_v43 = vadd.f32 %v2440_v39, %v4342_v16  ;;  %v2457_v24 = vadd.f32 %v2441_v11, %v4342_v16 }
 0x2ae   :  { %vm2463_vm6 = vcmp.gt.f32.partialorder %v2447_v55, 0.0  ;;  %v2480_v56 = vmul.f32 0.2, %v2448_v29  ;;  %v2458_v10 = vadd.f32 %v2442_v42, %v4342_v16  ;;  %vm2464_vm7 = vcmp.gt.f32.partialorder %v2448_v29, 0.0  ;;  %v5538_v42 = vld [vmem:[#allocation82_spill] sm:$0xff] }
 0x2af   :  { %v2481_v60 = vmul.f32 0.2, %v2449_v48  ;;  %v2493_v63 = vsel %vm2461_vm4, %v2445_v30, %v2477_v15  ;;  %v2459_v12 = vadd.f32 %v2443_v18, %v4342_v16  ;;  %vm2465_vm8 = vcmp.gt.f32.partialorder %v2449_v48, 0.0  ;;  %v5539_v18 = vld [vmem:[#allocation84_spill] sm:$0xff] }
 0x2b0   :  { %v2482_v46 = vmul.f32 0.2, %v2450_v6  ;;  %v2494_v22 = vsel %vm2462_vm5, %v2446_v33, %v2478_v57  ;;  %v2460_v53 = vadd.f32 %v2444_v62, %v4342_v16  ;;  %vm2466_vm9 = vcmp.gt.f32.partialorder %v2450_v6, 0.0  ;;  %2509 = vst [vmem:[%s5209_s4 + $0x280] sm:$0xff] %v2493_v63  ;;  %v5540_v62 = vld [vmem:[#allocation86_spill] sm:$0xff] }
 0x2b1   :  { %v2483_v41 = vmul.f32 0.2, %v2451_v36  ;;  %v2495_v40 = vsel %vm2463_vm6, %v2447_v55, %v2479_v27  ;;  %vm2467_vm10 = vcmp.gt.f32.partialorder %v2451_v36, 0.0  ;;  %vm2468_vm11 = vcmp.gt.f32.partialorder %v2452_v52, 0.0  ;;  %2510 = vst [vmem:[%s5209_s4 + $0x288] sm:$0xff] %v2494_v22  ;;  %v5537_v55 = vld [vmem:[#allocation80_spill] sm:$0xff] }
 0x2b2   :  { %v2484_v13 = vmul.f32 0.2, %v2452_v52  ;;  %v2496_v34 = vsel %vm2464_vm7, %v2448_v29, %v2480_v56  ;;  %vm2469_vm12 = vcmp.gt.f32.partialorder %v2453_v7, 0.0  ;;  %vm2470_vm13 = vcmp.gt.f32.partialorder %v2454_v45, 0.0  ;;  %2511 = vst [vmem:[%s5209_s4 + $0x290] sm:$0xff] %v2495_v40 }
 0x2b3   :  { %v2485_v0 = vmul.f32 0.2, %v2453_v7  ;;  %v2497_v19 = vsel %vm2465_vm8, %v2449_v48, %v2481_v60  ;;  %vm2471_vm14 = vcmp.gt.f32.partialorder %v2455_v23, 0.0  ;;  %v2486_v8 = vmul.f32 0.2, %v2454_v45  ;;  %2512 = vst [vmem:[%s5209_s4 + $0x298] sm:$0xff] %v2496_v34 }
 0x2b4   :  { %v2487_v44 = vmul.f32 0.2, %v2455_v23  ;;  %v2498_v1 = vsel %vm2466_vm9, %v2450_v6, %v2482_v46  ;;  %vm2472_vm15 = vcmp.gt.f32.partialorder %v2456_v43, 0.0  ;;  %v2488_v25 = vmul.f32 0.2, %v2456_v43  ;;  %2513 = vst [vmem:[%s5209_s4 + $0x2a0] sm:$0xff] %v2497_v19 }
 0x2b5   :  { %v2489_v47 = vmul.f32 0.2, %v2457_v24  ;;  %v2499_v20 = vsel %vm2467_vm10, %v2451_v36, %v2483_v41  ;;  %vm2473_vm0 = vcmp.gt.f32.partialorder %v2457_v24, 0.0  ;;  %v2490_v4 = vmul.f32 0.2, %v2458_v10  ;;  %2514 = vst [vmem:[%s5209_s4 + $0x2a8] sm:$0xff] %v2498_v1 }
 0x2b6   :  { %v2491_v50 = vmul.f32 0.2, %v2459_v12  ;;  %v2500_v35 = vsel %vm2468_vm11, %v2452_v52, %v2484_v13  ;;  %vm2474_vm1 = vcmp.gt.f32.partialorder %v2458_v10, 0.0  ;;  %vm2475_vm2 = vcmp.gt.f32.partialorder %v2459_v12, 0.0  ;;  %2515 = vst [vmem:[%s5209_s4 + $0x2b0] sm:$0xff] %v2499_v20  ;;  %v5541_v48 = vld [vmem:[#allocation88_spill] sm:$0xff] }
 0x2b7   :  { %v2492_v5 = vmul.f32 0.2, %v2460_v53  ;;  %v2501_v54 = vsel %vm2469_vm12, %v2453_v7, %v2485_v0  ;;  %vm2476_vm3 = vcmp.gt.f32.partialorder %v2460_v53, 0.0  ;;  %v2502_v51 = vsel %vm2470_vm13, %v2454_v45, %v2486_v8  ;;  %2516 = vst [vmem:[%s5209_s4 + $0x2b8] sm:$0xff] %v2500_v35  ;;  %v5542_v36 = vld [vmem:[#allocation90_spill] sm:$0xff]  ;;  %v5543_v45 = vld [vmem:[#allocation68_spill] sm:$0xff] }
 0x2b8   :  { %v2503_v28 = vsel %vm2471_vm14, %v2455_v23, %v2487_v44  ;;  %v2541_v37 = vmul.f32 %v4332_v26, %v5534_v9  ;;  %v2542_v32 = vmul.f32 %v4332_v26, %v5535_v61  ;;  %v2543_v2 = vmul.f32 %v4332_v26, %v5536_v3  ;;  %2517 = vst [vmem:[%s5209_s4 + $0x2c0] sm:$0xff] %v2501_v54  ;;  %v5544_v23 = vld [vmem:[#allocation76_spill] sm:$0xff] }
 0x2b9   :  { %v2504_v14 = vsel %vm2472_vm15, %v2456_v43, %v2488_v25  ;;  %v2505_v30 = vsel %vm2473_vm0, %v2457_v24, %v2489_v47  ;;  %v2506_v39 = vsel %vm2474_vm1, %v2458_v10, %v2490_v4  ;;  %v2507_v11 = vsel %vm2475_vm2, %v2459_v12, %v2491_v50  ;;  %2518 = vst [vmem:[%s5209_s4 + $0x2c8] sm:$0xff] %v2502_v51  ;;  %v5545_v24 = vld [vmem:[#allocation96_spill] sm:$0xff]  ;;  %v5546_v10 = vld [vmem:[#allocation98_spill] sm:$0xff] }
 0x2ba   :  { %v2508_v33 = vsel %vm2476_vm3, %v2460_v53, %v2492_v5  ;;  %v2544_v59 = vmul.f32 %v4332_v26, %v5537_v55  ;;  %v2545_v49 = vmul.f32 %v4332_v26, %v5538_v42  ;;  %v2546_v31 = vmul.f32 %v4332_v26, %v5539_v18  ;;  %2519 = vst [vmem:[%s5209_s4 + $0x2d0] sm:$0xff] %v2503_v28 }
 0x2bb   :  { %v2547_v29 = vmul.f32 %v4332_v26, %v5540_v62  ;;  %v2548_v6 = vmul.f32 %v4332_v26, %v5541_v48  ;;  %v2549_v52 = vmul.f32 %v4332_v26, %v5542_v36  ;;  %v2557_v7 = vadd.f32 %v2541_v37, %v4342_v16  ;;  %2520 = vst [vmem:[%s5209_s4 + $0x2d8] sm:$0xff] %v2504_v14  ;;  %v5547_v62 = vld [vmem:[#allocation71_spill] sm:$0xff]  ;;  %v5549_v36 = vld [vmem:[#allocation78_spill] sm:$0xff] }
 0x2bc   :  { %v2550_v15 = vmul.f32 %v4332_v26, %v5543_v45  ;;  %v2551_v57 = vmul.f32 %v4332_v26, %v5544_v23  ;;  %v2558_v27 = vadd.f32 %v2542_v32, %v4342_v16  ;;  %v2559_v43 = vadd.f32 %v2543_v2, %v4342_v16  ;;  %2521 = vst [vmem:[%s5209_s4 + $0x2e0] sm:$0xff] %v2505_v30  ;;  %v5548_v48 = vld [vmem:[#allocation75_spill] sm:$0xff] }
 0x2bd   :  { %v2552_v56 = vmul.f32 %v4332_v26, %v5545_v24  ;;  %v2553_v60 = vmul.f32 %v4332_v26, %v5546_v10  ;;  %v2554_v63 = vmul.f32 %v4332_v26, %v4245_v58  ;;  %v2560_v12 = vadd.f32 %v2544_v59, %v4342_v16  ;;  %2522 = vst [vmem:[%s5209_s4 + $0x2e8] sm:$0xff] %v2506_v39 }
 0x2be   :  { %v2555_v46 = vmul.f32 %v4332_v26, %v4285_v21  ;;  %v2556_v22 = vmul.f32 %v4332_v26, %v4311_v38  ;;  %v2561_v53 = vadd.f32 %v2545_v49, %v4342_v16  ;;  %v2562_v41 = vadd.f32 %v2546_v31, %v4342_v16  ;;  %2523 = vst [vmem:[%s5209_s4 + $0x2f0] sm:$0xff] %v2507_v11 }
 0x2bf   :  { %v2563_v58 = vadd.f32 %v2547_v29, %v4342_v16  ;;  %v2564_v40 = vadd.f32 %v2548_v6, %v4342_v16  ;;  %vm2573_vm4 = vcmp.gt.f32.partialorder %v2557_v7, 0.0  ;;  %v2589_v13 = vmul.f32 0.2, %v2557_v7  ;;  %2524 = vst [vmem:[%s5209_s4 + $0x2f8] sm:$0xff] %v2508_v33 }
 0x2c0   :  { %v2565_v21 = vadd.f32 %v2549_v52, %v4342_v16  ;;  %vm2574_vm5 = vcmp.gt.f32.partialorder %v2558_v27, 0.0  ;;  %v2590_v38 = vmul.f32 0.2, %v2558_v27  ;;  %v2591_v34 = vmul.f32 0.2, %v2559_v43 }
 0x2c1   :  { %v2566_v0 = vadd.f32 %v2550_v15, %v4342_v16  ;;  %v2567_v19 = vadd.f32 %v2551_v57, %v4342_v16  ;;  %vm2575_vm6 = vcmp.gt.f32.partialorder %v2559_v43, 0.0  ;;  %v2592_v8 = vmul.f32 0.2, %v2560_v12  ;;  %v5550_v57 = vld [vmem:[#allocation81_spill] sm:$0xff] }
 0x2c2   :  { %v2568_v44 = vadd.f32 %v2552_v56, %v4342_v16  ;;  %vm2576_vm7 = vcmp.gt.f32.partialorder %v2560_v12, 0.0  ;;  %v2593_v1 = vmul.f32 0.2, %v2561_v53  ;;  %v2605_v25 = vsel %vm2573_vm4, %v2557_v7, %v2589_v13  ;;  %v5552_v56 = vld [vmem:[#allocation85_spill] sm:$0xff]  ;;  %v5556_v13 = vld [vmem:[#allocation92_spill] sm:$0xff] }
 0x2c3   :  { %v2569_v47 = vadd.f32 %v2553_v60, %v4342_v16  ;;  %vm2577_vm8 = vcmp.gt.f32.partialorder %v2561_v53, 0.0  ;;  %v2594_v20 = vmul.f32 0.2, %v2562_v41  ;;  %v2606_v4 = vsel %vm2574_vm5, %v2558_v27, %v2590_v38  ;;  %2621 = vst [vmem:[%s5209_s4 + $0x300] sm:$0xff] %v2605_v25  ;;  %v5557_v38 = vld [vmem:[#allocation95_spill] sm:$0xff] }
 0x2c4   :  { %v2570_v50 = vadd.f32 %v2554_v63, %v4342_v16  ;;  %vm2578_vm9 = vcmp.gt.f32.partialorder %v2562_v41, 0.0  ;;  %v2595_v35 = vmul.f32 0.2, %v2563_v58  ;;  %v2607_v5 = vsel %vm2575_vm6, %v2559_v43, %v2591_v34  ;;  %2622 = vst [vmem:[%s5209_s4 + $0x308] sm:$0xff] %v2606_v4  ;;  %v5551_v43 = vld [vmem:[#allocation83_spill] sm:$0xff] }
 0x2c5   :  { %v2571_v54 = vadd.f32 %v2555_v46, %v4342_v16  ;;  %vm2579_vm10 = vcmp.gt.f32.partialorder %v2563_v58, 0.0  ;;  %v2596_v51 = vmul.f32 0.2, %v2564_v40  ;;  %v2608_v28 = vsel %vm2576_vm7, %v2560_v12, %v2592_v8  ;;  %2623 = vst [vmem:[%s5209_s4 + $0x310] sm:$0xff] %v2607_v5  ;;  %v5553_v63 = vld [vmem:[#allocation87_spill] sm:$0xff]  ;;  %v5554_v46 = vld [vmem:[#allocation89_spill] sm:$0xff] }
 0x2c6   :  { %v2572_v9 = vadd.f32 %v2556_v22, %v4342_v16  ;;  %vm2580_vm11 = vcmp.gt.f32.partialorder %v2564_v40, 0.0  ;;  %v2597_v37 = vmul.f32 0.2, %v2565_v21  ;;  %v2609_v61 = vsel %vm2577_vm8, %v2561_v53, %v2593_v1  ;;  %2624 = vst [vmem:[%s5209_s4 + $0x318] sm:$0xff] %v2608_v28 }
 0x2c7   :  { %vm2581_vm12 = vcmp.gt.f32.partialorder %v2565_v21, 0.0  ;;  %vm2582_vm13 = vcmp.gt.f32.partialorder %v2566_v0, 0.0  ;;  %v2598_v32 = vmul.f32 0.2, %v2566_v0  ;;  %v2610_v3 = vsel %vm2578_vm9, %v2562_v41, %v2594_v20  ;;  %2625 = vst [vmem:[%s5209_s4 + $0x320] sm:$0xff] %v2609_v61  ;;  %v5560_v20 = vld [vmem:[#allocation101_spill] sm:$0xff] }
 0x2c8   :  { %vm2583_vm14 = vcmp.gt.f32.partialorder %v2567_v19, 0.0  ;;  %v2599_v2 = vmul.f32 0.2, %v2567_v19  ;;  %v2600_v14 = vmul.f32 0.2, %v2568_v44  ;;  %v2611_v30 = vsel %vm2579_vm10, %v2563_v58, %v2595_v35  ;;  %2626 = vst [vmem:[%s5209_s4 + $0x328] sm:$0xff] %v2610_v3 }
 0x2c9   :  { %vm2584_vm15 = vcmp.gt.f32.partialorder %v2568_v44, 0.0  ;;  %v2601_v39 = vmul.f32 0.2, %v2569_v47  ;;  %v2602_v11 = vmul.f32 0.2, %v2570_v50  ;;  %v2612_v33 = vsel %vm2580_vm11, %v2564_v40, %v2596_v51  ;;  %2627 = vst [vmem:[%s5209_s4 + $0x330] sm:$0xff] %v2611_v30 }
 0x2ca   :  { %vm2585_vm0 = vcmp.gt.f32.partialorder %v2569_v47, 0.0  ;;  %v2603_v55 = vmul.f32 0.2, %v2571_v54  ;;  %v2604_v59 = vmul.f32 0.2, %v2572_v9  ;;  %v2613_v42 = vsel %vm2581_vm12, %v2565_v21, %v2597_v37  ;;  %2628 = vst [vmem:[%s5209_s4 + $0x338] sm:$0xff] %v2612_v33 }
 0x2cb   :  { %vm2586_vm1 = vcmp.gt.f32.partialorder %v2570_v50, 0.0  ;;  %vm2587_vm2 = vcmp.gt.f32.partialorder %v2571_v54, 0.0  ;;  %vm2588_vm3 = vcmp.gt.f32.partialorder %v2572_v9, 0.0  ;;  %v2614_v49 = vsel %vm2582_vm13, %v2566_v0, %v2598_v32  ;;  %2629 = vst [vmem:[%s5209_s4 + $0x340] sm:$0xff] %v2613_v42  ;;  %v5555_v58 = vld [vmem:[#allocation91_spill] sm:$0xff] }
 0x2cc   :  { %v2615_v18 = vsel %vm2583_vm14, %v2567_v19, %v2599_v2  ;;  %v2616_v31 = vsel %vm2584_vm15, %v2568_v44, %v2600_v14  ;;  %v2653_v29 = vmul.f32 %v4332_v26, %v5547_v62  ;;  %v2654_v6 = vmul.f32 %v4332_v26, %v5548_v48  ;;  %2630 = vst [vmem:[%s5209_s4 + $0x348] sm:$0xff] %v2614_v49  ;;  %v5558_v19 = vld [vmem:[#allocation97_spill] sm:$0xff]  ;;  %v5559_v44 = vld [vmem:[#allocation99_spill] sm:$0xff] }
 0x2cd   :  { %v2655_v52 = vmul.f32 %v4332_v26, %v5549_v36  ;;  %v2617_v7 = vsel %vm2585_vm0, %v2569_v47, %v2601_v39  ;;  %v2618_v45 = vsel %vm2586_vm1, %v2570_v50, %v2602_v11  ;;  %v2619_v15 = vsel %vm2587_vm2, %v2571_v54, %v2603_v55  ;;  %2631 = vst [vmem:[%s5209_s4 + $0x350] sm:$0xff] %v2615_v18  ;;  %v5561_v51 = vld [vmem:[#allocation103_spill] sm:$0xff] }
 0x2ce   :  { %v2620_v23 = vsel %vm2588_vm3, %v2572_v9, %v2604_v59  ;;  %v2656_v27 = vmul.f32 %v4332_v26, %v5550_v57  ;;  %v2657_v24 = vmul.f32 %v4332_v26, %v5551_v43  ;;  %v2658_v10 = vmul.f32 %v4332_v26, %v5552_v56  ;;  %2632 = vst [vmem:[%s5209_s4 + $0x358] sm:$0xff] %v2616_v31 }
 0x2cf   :  { %v2669_v60 = vadd.f32 %v2653_v29, %v4342_v16  ;;  %v2659_v12 = vmul.f32 %v4332_v26, %v5553_v63  ;;  %v2660_v22 = vmul.f32 %v4332_v26, %v5554_v46  ;;  %v2670_v53 = vadd.f32 %v2654_v6, %v4342_v16  ;;  %2633 = vst [vmem:[%s5209_s4 + $0x360] sm:$0xff] %v2617_v7 }
 0x2d0   :  { %v2671_v41 = vadd.f32 %v2655_v52, %v4342_v16  ;;  %v2661_v40 = vmul.f32 %v4332_v26, %v5555_v58  ;;  %v2662_v21 = vmul.f32 %v4332_v26, %v5556_v13  ;;  %v2663_v34 = vmul.f32 %v4332_v26, %v5557_v38  ;;  %2634 = vst [vmem:[%s5209_s4 + $0x368] sm:$0xff] %v2618_v45 }
 0x2d1   :  { %v2672_v0 = vadd.f32 %v2656_v27, %v4342_v16  ;;  %v2664_v8 = vmul.f32 %v4332_v26, %v5558_v19  ;;  %v2665_v1 = vmul.f32 %v4332_v26, %v5559_v44  ;;  %v2666_v25 = vmul.f32 %v4332_v26, %v4247_v17  ;;  %2635 = vst [vmem:[%s5209_s4 + $0x370] sm:$0xff] %v2619_v15 }
 0x2d2   :  { %v2673_v47 = vadd.f32 %v2657_v24, %v4342_v16  ;;  %v2667_v4 = vmul.f32 %v4332_v26, %v5560_v20  ;;  %v2674_v50 = vadd.f32 %v2658_v10, %v4342_v16  ;;  %vm2685_vm4 = vcmp.gt.f32.partialorder %v2669_v60, 0.0  ;;  %2636 = vst [vmem:[%s5209_s4 + $0x378] sm:$0xff] %v2620_v23 }
 0x2d3   :  { %v2701_v35 = vmul.f32 0.2, %v2669_v60  ;;  %v2675_v5 = vadd.f32 %v2659_v12, %v4342_v16  ;;  %vm2686_vm5 = vcmp.gt.f32.partialorder %v2670_v53, 0.0  ;;  %v2702_v17 = vmul.f32 0.2, %v2670_v53 }
 0x2d4   :  { %v2703_v54 = vmul.f32 0.2, %v2671_v41  ;;  %v2668_v28 = vmul.f32 %v4332_v26, %v5561_v51  ;;  %v2676_v9 = vadd.f32 %v2660_v22, %v4342_v16  ;;  %vm2687_vm6 = vcmp.gt.f32.partialorder %v2671_v41, 0.0 }
 0x2d5   :  { %v2704_v37 = vmul.f32 0.2, %v2672_v0  ;;  %v2677_v61 = vadd.f32 %v2661_v40, %v4342_v16  ;;  %vm2688_vm7 = vcmp.gt.f32.partialorder %v2672_v0, 0.0  ;;  %v2705_v32 = vmul.f32 0.2, %v2673_v47 }
 0x2d6   :  { %v2717_v3 = vsel %vm2685_vm4, %v2669_v60, %v2701_v35  ;;  %v2678_v2 = vadd.f32 %v2662_v21, %v4342_v16  ;;  %vm2689_vm8 = vcmp.gt.f32.partialorder %v2673_v47, 0.0  ;;  %v2706_v14 = vmul.f32 0.2, %v2674_v50 }
 0x2d7   :  { %v2718_v30 = vsel %vm2686_vm5, %v2670_v53, %v2702_v17  ;;  %v2679_v39 = vadd.f32 %v2663_v34, %v4342_v16  ;;  %vm2690_vm9 = vcmp.gt.f32.partialorder %v2674_v50, 0.0  ;;  %v2707_v11 = vmul.f32 0.2, %v2675_v5  ;;  %2733 = vst [vmem:[%s5209_s4 + $0x380] sm:$0xff] %v2717_v3 }
 0x2d8   :  { %v2719_v33 = vsel %vm2687_vm6, %v2671_v41, %v2703_v54  ;;  %v2680_v26 = vadd.f32 %v2664_v8, %v4342_v16  ;;  %vm2691_vm10 = vcmp.gt.f32.partialorder %v2675_v5, 0.0  ;;  %v2708_v55 = vmul.f32 0.2, %v2676_v9  ;;  %2734 = vst [vmem:[%s5209_s4 + $0x388] sm:$0xff] %v2718_v30 }
 0x2d9   :  { %v2720_v59 = vsel %vm2688_vm7, %v2672_v0, %v2704_v37  ;;  %v2681_v42 = vadd.f32 %v2665_v1, %v4342_v16  ;;  %vm2692_vm11 = vcmp.gt.f32.partialorder %v2676_v9, 0.0  ;;  %v2709_v49 = vmul.f32 0.2, %v2677_v61  ;;  %2735 = vst [vmem:[%s5209_s4 + $0x390] sm:$0xff] %v2719_v33 }
 0x2da   :  { %v2721_v18 = vsel %vm2689_vm8, %v2673_v47, %v2705_v32  ;;  %v2682_v31 = vadd.f32 %v2666_v25, %v4342_v16  ;;  %vm2693_vm12 = vcmp.gt.f32.partialorder %v2677_v61, 0.0  ;;  %v2710_v62 = vmul.f32 0.2, %v2678_v2  ;;  %2736 = vst [vmem:[%s5209_s4 + $0x398] sm:$0xff] %v2720_v59 }
 0x2db   :  { %v2722_v29 = vsel %vm2690_vm9, %v2674_v50, %v2706_v14  ;;  %v2683_v48 = vadd.f32 %v2667_v4, %v4342_v16  ;;  %vm2694_vm13 = vcmp.gt.f32.partialorder %v2678_v2, 0.0  ;;  %v2711_v6 = vmul.f32 0.2, %v2679_v39  ;;  %2737 = vst [vmem:[%s5209_s4 + $0x3a0] sm:$0xff] %v2721_v18 }
 0x2dc   :  { %v2723_v36 = vsel %vm2691_vm10, %v2675_v5, %v2707_v11  ;;  %v2684_v52 = vadd.f32 %v2668_v28, %v4342_v16  ;;  %vm2695_vm14 = vcmp.gt.f32.partialorder %v2679_v39, 0.0  ;;  %v2712_v7 = vmul.f32 0.2, %v2680_v26  ;;  %2738 = vst [vmem:[%s5209_s4 + $0x3a8] sm:$0xff] %v2722_v29 }
 0x2dd   :  { %v2724_v45 = vsel %vm2692_vm11, %v2676_v9, %v2708_v55  ;;  %vm2696_vm15 = vcmp.gt.f32.partialorder %v2680_v26, 0.0  ;;  %v2713_v15 = vmul.f32 0.2, %v2681_v42  ;;  %v2725_v23 = vsel %vm2693_vm12, %v2677_v61, %v2709_v49  ;;  %2739 = vst [vmem:[%s5209_s4 + $0x3b0] sm:$0xff] %v2723_v36 }
 0x2de   :  { %vm2697_vm0 = vcmp.gt.f32.partialorder %v2681_v42, 0.0  ;;  %v2714_v57 = vmul.f32 0.2, %v2682_v31  ;;  %v2726_v27 = vsel %vm2694_vm13, %v2678_v2, %v2710_v62  ;;  %vm2698_vm1 = vcmp.gt.f32.partialorder %v2682_v31, 0.0  ;;  %2740 = vst [vmem:[%s5209_s4 + $0x3b8] sm:$0xff] %v2724_v45 }
 0x2df   :  { %v2715_v16 = vmul.f32 0.2, %v2683_v48  ;;  %v2727_v43 = vsel %vm2695_vm14, %v2679_v39, %v2711_v6  ;;  %vm2699_vm2 = vcmp.gt.f32.partialorder %v2683_v48, 0.0  ;;  %v2716_v24 = vmul.f32 0.2, %v2684_v52  ;;  %2741 = vst [vmem:[%s5209_s4 + $0x3c0] sm:$0xff] %v2725_v23 }
 0x2e0   :  { %v2728_v56 = vsel %vm2696_vm15, %v2680_v26, %v2712_v7  ;;  %vm2700_vm3 = vcmp.gt.f32.partialorder %v2684_v52, 0.0  ;;  %v2729_v10 = vsel %vm2697_vm0, %v2681_v42, %v2713_v15  ;;  %2742 = vst [vmem:[%s5209_s4 + $0x3c8] sm:$0xff] %v2726_v27  ;;  %v2730_v60 = vsel %vm2698_vm1, %v2682_v31, %v2714_v57 }
 0x2e1   :  { %2743 = vst [vmem:[%s5209_s4 + $0x3d0] sm:$0xff] %v2727_v43  ;;  %v2731_v63 = vsel %vm2699_vm2, %v2683_v48, %v2715_v16  ;;  %v2732_v12 = vsel %vm2700_vm3, %v2684_v52, %v2716_v24 }
 0x2e2   :  { %2744 = vst [vmem:[%s5209_s4 + $0x3d8] sm:$0xff] %v2728_v56 }
 0x2e3   :  { %2745 = vst [vmem:[%s5209_s4 + $0x3e0] sm:$0xff] %v2729_v10 }
 0x2e4   :  { %2746 = vst [vmem:[%s5209_s4 + $0x3e8] sm:$0xff] %v2730_v60 }
 0x2e5   :  { %2747 = vst [vmem:[%s5209_s4 + $0x3f0] sm:$0xff] %v2731_v63 }
 0x2e6   :  { %2748 = vst [vmem:[%s5209_s4 + $0x3f8] sm:$0xff] %v2732_v12 }

</bundles_post_ra>
